<compile_context>
chip_gen: v6e
topology: v6e:2x2x1
jax: 0.10.0
libtpu: 0.0.40
codegen_flags: <defaults>
</compile_context>

<pallas_src>
import numpy as np
import jax
import jax.numpy as jnp
from jax import lax
from jax.experimental import pallas as pl
from jax.experimental.pallas import tpu as pltpu

NC = 1                    # number of classes (yolov7-pose head uses 1)
NKPT = 17                 # keypoints (the torch code hard-codes repeat(...,17))
NO_DET = NC + 5           # 6
NO_KPT = 3 * NKPT         # 51
NO = NO_DET + NO_KPT      # 57


def _column_tables(anchors_wh, na):
    """Per-output-column decode constants packed as an (8, na*NO) f32 table.

    rows: 0 use_raw (kpt x/y decode from the raw value, not sigmoid)
          1 gx_mask   2 gy_mask   3 lin_mask  ((t*2-0.5+g)*stride columns)
          4 wh_coef   (anchor w/h baked in for box w/h columns, else 0)
          5 sig_mask  (columns whose decoded value is plain sigmoid)
          6 det_mask  (x[i] keeps the raw value)
          7 kpt_mask  (x[i] keeps the decoded value — torch in-place write)
    Column c corresponds to torch channel c of cat(det, kpt, axis=1), i.e.
    anchor a = c // NO, slot j = c % NO — exactly the view(bs, na, no, ...) split.
    """
    nof = na * NO
    tbl = np.zeros((8, nof), np.float32)
    for c in range(nof):
        a, j = divmod(c, NO)
        aw, ah = anchors_wh[a]
        if j == 0:                                  # box x
            tbl[1, c] = 1.0; tbl[3, c] = 1.0; tbl[6, c] = 1.0
        elif j == 1:                                # box y
            tbl[2, c] = 1.0; tbl[3, c] = 1.0; tbl[6, c] = 1.0
        elif j == 2:                                # box w
            tbl[4, c] = aw; tbl[6, c] = 1.0
        elif j == 3:                                # box h
            tbl[4, c] = ah; tbl[6, c] = 1.0
        elif j < NO_DET:                            # obj / cls -> sigmoid
            tbl[5, c] = 1.0; tbl[6, c] = 1.0
        else:
            k = (j - NO_DET) % 3
            tbl[7, c] = 1.0
            if k == 0:                              # kpt x (raw-based)
                tbl[0, c] = 1.0; tbl[1, c] = 1.0; tbl[3, c] = 1.0
            elif k == 1:                            # kpt y (raw-based)
                tbl[0, c] = 1.0; tbl[2, c] = 1.0; tbl[3, c] = 1.0
            else:                                   # kpt conf -> sigmoid
                tbl[5, c] = 1.0
    return jnp.asarray(tbl)


def _fuse_params(p):
    """Fold ImplicitA into the det bias and ImplicitM into det weight/bias, then
    fuse det + kpt 1x1 convs into one (C, na*NO) matmul (torch concat order)."""
    w_det_eff = p["w_det"] * p["im"]
    b_det_eff = (p["ia"] @ p["w_det"] + p["b_det"]) * p["im"]
    w_fused = jnp.concatenate([w_det_eff, p["w_kpt"]], axis=1)   # (C, na*NO)
    b_fused = jnp.concatenate([b_det_eff, p["b_kpt"]], axis=1)   # (1, na*NO)
    return w_fused, b_fused


def _choose_tile(S, cap=1024):
    if S <= cap:
        return S
    for d in range(cap, 7, -1):
        if S % d == 0 and d % 8 == 0:
            return d
    return S   # fallback: single spatial tile


def _make_level_kernel(stride):
    def kernel(x_ref, w_ref, b_ref, tbl_ref, gx_ref, gy_ref, z_ref, xf_ref):
        x = x_ref[0]                                           # (TILE_S, C)
        # single fused matmul, default precision (bf16-native MXU path)
        raw = jnp.dot(x, w_ref[...],
                      preferred_element_type=jnp.float32) + b_ref[...]
        sv = jax.nn.sigmoid(raw)

        tbl = tbl_ref[...]
        use_raw, gx_m, gy_m, lin_m = tbl[0:1], tbl[1:2], tbl[2:3], tbl[3:4]
        wh_coef, sig_m, det_m, kpt_m = tbl[4:5], tbl[5:6], tbl[6:7], tbl[7:8]

        g = gx_ref[...] * gx_m + gy_ref[...] * gy_m            # (TILE_S, na*NO)
        t = sv + use_raw * (raw - sv)                          # raw for kpt x/y, sigmoid else
        lin = (t * 2.0 - 0.5 + g) * stride                     # box xy / kpt xy decode
        sv2 = sv * 2.0
        wh = sv2 * sv2 * wh_coef                               # box wh (anchor baked in)
        z = lin * lin_m + wh + sv * sig_m                      # decoded predictions
        xf = raw * det_m + z * kpt_m                           # torch in-place x[i] update
        z_ref[0] = z
        xf_ref[0] = xf
    return kernel


def ikeypoint_level(x_nchw, params, stride, anchors_wh):
    bs, C, ny, nx = x_nchw.shape
    na = len(anchors_wh)
    S = ny * nx
    nof = na * NO
    tile_s = _choose_tile(S)
    n_tiles = S // tile_s

    x_flat = jnp.transpose(x_nchw, (0, 2, 3, 1)).reshape(bs, S, C)
    w_fused, b_fused = _fuse_params(params)
    tbl = _column_tables(anchors_wh, na)

    r = np.arange(S, dtype=np.int64)
    gx_col = jnp.asarray((r % nx).astype(np.float32).reshape(S, 1))
    gy_col = jnp.asarray((r // nx).astype(np.float32).reshape(S, 1))

    kernel = _make_level_kernel(float(stride))
    grid_spec = pltpu.PrefetchScalarGridSpec(
        num_scalar_prefetch=0,
        grid=(bs, n_tiles),
        in_specs=[
            pl.BlockSpec((1, tile_s, C), lambda b, s: (b, s, 0)),
            pl.BlockSpec((C, nof), lambda b, s: (0, 0)),
            pl.BlockSpec((1, nof), lambda b, s: (0, 0)),
            pl.BlockSpec((8, nof), lambda b, s: (0, 0)),
            pl.BlockSpec((tile_s, 1), lambda b, s: (s, 0)),
            pl.BlockSpec((tile_s, 1), lambda b, s: (s, 0)),
        ],
        out_specs=[
            pl.BlockSpec((1, tile_s, nof), lambda b, s: (b, s, 0)),
            pl.BlockSpec((1, tile_s, nof), lambda b, s: (b, s, 0)),
        ],
    )
    z_flat, xf_flat = pl.pallas_call(
        kernel,
        out_shape=(jax.ShapeDtypeStruct((bs, S, nof), jnp.float32),
                   jax.ShapeDtypeStruct((bs, S, nof), jnp.float32)),
        grid_spec=grid_spec,
        compiler_params=pltpu.CompilerParams(
            dimension_semantics=("parallel", "parallel")),
    )(x_flat, w_fused, b_fused, tbl, gx_col, gy_col)

    z = jnp.transpose(z_flat.reshape(bs, S, na, NO), (0, 2, 1, 3))
    xf = jnp.transpose(xf_flat.reshape(bs, S, na, NO), (0, 2, 1, 3))
    z = z.reshape(bs, na * S, NO)              # == y.view(bs, -1, no)
    xfeat = xf.reshape(bs, na, ny, nx, NO)     # == x[i] (bs, na, ny, nx, no)
    return z, xfeat


def ikeypoint_forward(xs, params_list, strides, anchors):
    """Eval-mode IKeypoint forward: returns (cat(z, 1), [x_i])."""
    nl = len(xs)
    na = int(anchors.shape[1])
    z_list, xfeat_list = [], []
    for i in range(nl):
        anchors_wh = tuple((float(anchors[i, a, 0]), float(anchors[i, a, 1]))
                           for a in range(na))
        z_i, xfeat_i = ikeypoint_level(xs[i], params_list[i],
                                       float(strides[i]), anchors_wh)
        z_list.append(z_i)
        xfeat_list.append(xfeat_i)
    return jnp.concatenate(z_list, axis=1), xfeat_list


# ---------------- pure-JAX reference (direct translation of the torch code) ---

def ref_forward(xs, params_list, strides, anchors):
    nl = len(xs)
    na = int(anchors.shape[1])
    z, xfeats = [], []
    for i in range(nl):
        x = xs[i]
        p = params_list[i]
        bs, C, ny, nx = x.shape
        stride = float(strides[i])
        xh = jnp.transpose(x, (0, 2, 3, 1))                       # NHWC
        det = jnp.einsum('byxc,co->byxo', xh + p['ia'][0], p['w_det'],
                         precision='highest') + p['b_det'][0]
        det = det * p['im'][0]
        kpt = jnp.einsum('byxc,co->byxo', xh, p['w_kpt'],
                         precision='highest') + p['b_kpt'][0]
        cat = jnp.concatenate([det, kpt], axis=-1)                # (bs,ny,nx,na*NO)
        xi = jnp.transpose(cat.reshape(bs, ny, nx, na, NO), (0, 3, 1, 2, 4))
        yv, xv = jnp.meshgrid(jnp.arange(ny), jnp.arange(nx), indexing='ij')
        grid = jnp.stack((xv, yv), axis=2).reshape(1, 1, ny, nx, 2).astype(jnp.float32)
        x_det = xi[..., :NO_DET]
        x_kpt = xi[..., NO_DET:]
        y = jax.nn.sigmoid(x_det)
        xy = (y[..., 0:2] * 2.0 - 0.5 + grid) * stride
        ag = anchors[i].reshape(1, na, 1, 1, 2)
        wh = (y[..., 2:4] * 2.0) ** 2 * ag
        kgx, kgy = grid[..., 0:1], grid[..., 1:2]
        kx = (x_kpt[..., 0::3] * 2.0 - 0.5 + jnp.repeat(kgx, NKPT, -1)) * stride
        ky = (x_kpt[..., 1::3] * 2.0 - 0.5 + jnp.repeat(kgy, NKPT, -1)) * stride
        kc = jax.nn.sigmoid(x_kpt[..., 2::3])
        x_kpt_new = jnp.stack([kx, ky, kc], axis=-1).reshape(x_kpt.shape[:-1] + (NO_KPT,))
        yfull = jnp.concatenate([xy, wh, y[..., 4:], x_kpt_new], axis=-1)
        z.append(yfull.reshape(bs, -1, NO))
        xfeats.append(jnp.concatenate([x_det, x_kpt_new], axis=-1))
    return jnp.concatenate(z, axis=1), xfeats


# ---------------------------------- setup -------------------------------------

def init_level_params(key, C, na):
    ks = jax.random.split(key, 6)
    return dict(
        ia=0.02 * jax.random.normal(ks[0], (1, C), jnp.float32),             # ImplicitA
        w_det=0.1 * jax.random.normal(ks[1], (C, na * NO_DET), jnp.float32),   # 1x1 conv W^T
        b_det=0.1 * jax.random.normal(ks[2], (1, na * NO_DET), jnp.float32),
        im=1.0 + 0.02 * jax.random.normal(ks[3], (1, na * NO_DET), jnp.float32),  # ImplicitM
        w_kpt=0.1 * jax.random.normal(ks[4], (C, na * NO_KPT), jnp.float32),
        b_kpt=0.1 * jax.random.normal(ks[5], (1, na * NO_KPT), jnp.float32),
    )


if __name__ == "__main__":
    key = jax.random.PRNGKey(0)
    anchors = jnp.array([[10., 13., 16., 30., 33., 23.],
                         [30., 61., 62., 45., 59., 119.]],
                        jnp.float32).reshape(2, 3, 2)   # nl=2, na=3
    strides = (8.0, 16.0)                               # self.stride (set by builder)
    ch = (4, 8)
    spatial = ((16, 16), (8, 8))
    bs = 2

    keys = jax.random.split(key, 2 * len(ch))
    xs = [jax.random.normal(keys[i], (bs, ch[i], spatial[i][0], spatial[i][1]),
                            jnp.float32) for i in range(len(ch))]
    params = [init_level_params(keys[len(ch) + i], ch[i], 3) for i in range(len(ch))]

    z, xfeats = ikeypoint_forward(xs, params, strides, anchors)
    jax.block_until_ready(z)
    for xf in xfeats:
        jax.block_until_ready(xf)

    z_ref, xfeats_ref = ref_forward(xs, params, strides, anchors)
    assert z.shape == z_ref.shape
    assert jnp.allclose(z, z_ref, atol=5e-2, rtol=1e-2), \
        float(jnp.max(jnp.abs(z - z_ref)))
    for a, b in zip(xfeats, xfeats_ref):
        assert a.shape == b.shape
        assert jnp.allclose(a, b, atol=5e-2, rtol=1e-2), \
            float(jnp.max(jnp.abs(a - b)))

    print("KERNEL_OK")
</pallas_src>

<mosaic_0001>
module attributes {stable_mosaic.version = 11 : i64} {
  func.func @kernel(%arg0: i32, %arg1: i32, %arg2: memref<1x256x4xf32, #tpu.memory_space<vmem>>, %arg3: memref<4x171xf32, #tpu.memory_space<vmem>>, %arg4: memref<1x171xf32, #tpu.memory_space<vmem>>, %arg5: memref<8x171xf32, #tpu.memory_space<vmem>>, %arg6: memref<256x1xf32, #tpu.memory_space<vmem>>, %arg7: memref<256x1xf32, #tpu.memory_space<vmem>>, %arg8: memref<1x256x171xf32, #tpu.memory_space<vmem>>, %arg9: memref<1x256x171xf32, #tpu.memory_space<vmem>>) attributes {dimension_semantics = [#tpu.dimension_semantics<parallel>, #tpu.dimension_semantics<parallel>], iteration_bounds = array<i64: 2, 1>, scalar_prefetch = 0 : i64, scratch_operands = 0 : i64, tpu.core_type = #tpu.core_type<tc>, window_params = [{transform_indices = @transform_0, window_bounds = array<i64: 1, 256, 4>}, {pipeline_mode = #tpu.pipeline_mode<synchronous>, transform_indices = @transform_1, window_bounds = array<i64: 4, 171>}, {pipeline_mode = #tpu.pipeline_mode<synchronous>, transform_indices = @transform_2, window_bounds = array<i64: 1, 171>}, {pipeline_mode = #tpu.pipeline_mode<synchronous>, transform_indices = @transform_3, window_bounds = array<i64: 8, 171>}, {transform_indices = @transform_4, window_bounds = array<i64: 256, 1>}, {transform_indices = @transform_5, window_bounds = array<i64: 256, 1>}, {transform_indices = @transform_6, window_bounds = array<i64: 1, 256, 171>}, {transform_indices = @transform_7, window_bounds = array<i64: 1, 256, 171>}]} {
    %c0 = arith.constant 0 : index
    %c0_0 = arith.constant 0 : index
    %c0_1 = arith.constant 0 : index
    %0 = vector.load %arg2[%c0, %c0_0, %c0_1] : memref<1x256x4xf32, #tpu.memory_space<vmem>>, vector<1x256x4xf32>
    %1 = vector.shape_cast %0 : vector<1x256x4xf32> to vector<256x4xf32>
    %c0_2 = arith.constant 0 : index
    %c0_3 = arith.constant 0 : index
    %2 = vector.load %arg3[%c0_2, %c0_3] : memref<4x171xf32, #tpu.memory_space<vmem>>, vector<4x171xf32>
    %cst = arith.constant dense<0.000000e+00> : vector<256x171xf32>
    %3 = tpu.matmul %1, %2, %cst {dimension_numbers = #tpu.dot_dimension_numbers<[1], [0], [0], [1], [0, 0, 1, 1], [], []>} : vector<256x4xf32>, vector<4x171xf32>, vector<256x171xf32> -> vector<256x171xf32>
    %c0_4 = arith.constant 0 : index
    %c0_5 = arith.constant 0 : index
    %4 = vector.load %arg4[%c0_4, %c0_5] : memref<1x171xf32, #tpu.memory_space<vmem>>, vector<1x171xf32>
    %5 = vector.broadcast %4 : vector<1x171xf32> to vector<256x171xf32>
    %6 = arith.addf %3, %5 : vector<256x171xf32>
    %7 = arith.negf %6 : vector<256x171xf32>
    %8 = math.exp %7 : vector<256x171xf32>
    %cst_6 = arith.constant 1.000000e+00 : f32
    %9 = vector.broadcast %cst_6 : f32 to vector<256x171xf32>
    %10 = arith.addf %9, %8 : vector<256x171xf32>
    %11 = arith.divf %9, %10 : vector<256x171xf32>
    %c0_7 = arith.constant 0 : index
    %c0_8 = arith.constant 0 : index
    %12 = vector.load %arg5[%c0_7, %c0_8] : memref<8x171xf32, #tpu.memory_space<vmem>>, vector<8x171xf32>
    %13 = vector.extract_strided_slice %12 {offsets = [0, 0], sizes = [1, 171], strides = [1, 1]} : vector<8x171xf32> to vector<1x171xf32>
    %14 = vector.extract_strided_slice %12 {offsets = [1, 0], sizes = [1, 171], strides = [1, 1]} : vector<8x171xf32> to vector<1x171xf32>
    %15 = vector.extract_strided_slice %12 {offsets = [2, 0], sizes = [1, 171], strides = [1, 1]} : vector<8x171xf32> to vector<1x171xf32>
    %16 = vector.extract_strided_slice %12 {offsets = [3, 0], sizes = [1, 171], strides = [1, 1]} : vector<8x171xf32> to vector<1x171xf32>
    %17 = vector.extract_strided_slice %12 {offsets = [4, 0], sizes = [1, 171], strides = [1, 1]} : vector<8x171xf32> to vector<1x171xf32>
    %18 = vector.extract_strided_slice %12 {offsets = [5, 0], sizes = [1, 171], strides = [1, 1]} : vector<8x171xf32> to vector<1x171xf32>
    %19 = vector.extract_strided_slice %12 {offsets = [6, 0], sizes = [1, 171], strides = [1, 1]} : vector<8x171xf32> to vector<1x171xf32>
    %20 = vector.extract_strided_slice %12 {offsets = [7, 0], sizes = [1, 171], strides = [1, 1]} : vector<8x171xf32> to vector<1x171xf32>
    %c0_9 = arith.constant 0 : index
    %c0_10 = arith.constant 0 : index
    %21 = vector.load %arg6[%c0_9, %c0_10] : memref<256x1xf32, #tpu.memory_space<vmem>>, vector<256x1xf32>
    %22 = vector.broadcast %21 : vector<256x1xf32> to vector<256x171xf32>
    %23 = vector.broadcast %14 : vector<1x171xf32> to vector<256x171xf32>
    %24 = arith.mulf %22, %23 : vector<256x171xf32>
    %c0_11 = arith.constant 0 : index
    %c0_12 = arith.constant 0 : index
    %25 = vector.load %arg7[%c0_11, %c0_12] : memref<256x1xf32, #tpu.memory_space<vmem>>, vector<256x1xf32>
    %26 = vector.broadcast %25 : vector<256x1xf32> to vector<256x171xf32>
    %27 = vector.broadcast %15 : vector<1x171xf32> to vector<256x171xf32>
    %28 = arith.mulf %26, %27 : vector<256x171xf32>
    %29 = arith.addf %24, %28 : vector<256x171xf32>
    %30 = arith.subf %6, %11 : vector<256x171xf32>
    %31 = vector.broadcast %13 : vector<1x171xf32> to vector<256x171xf32>
    %32 = arith.mulf %31, %30 : vector<256x171xf32>
    %33 = arith.addf %11, %32 : vector<256x171xf32>
    %cst_13 = arith.constant 2.000000e+00 : f32
    %34 = vector.broadcast %cst_13 : f32 to vector<256x171xf32>
    %35 = arith.mulf %33, %34 : vector<256x171xf32>
    %cst_14 = arith.constant 5.000000e-01 : f32
    %36 = vector.broadcast %cst_14 : f32 to vector<256x171xf32>
    %37 = arith.subf %35, %36 : vector<256x171xf32>
    %38 = arith.addf %37, %29 : vector<256x171xf32>
    %cst_15 = arith.constant 8.000000e+00 : f32
    %39 = vector.broadcast %cst_15 : f32 to vector<256x171xf32>
    %40 = arith.mulf %38, %39 : vector<256x171xf32>
    %cst_16 = arith.constant 2.000000e+00 : f32
    %41 = vector.broadcast %cst_16 : f32 to vector<256x171xf32>
    %42 = arith.mulf %11, %41 : vector<256x171xf32>
    %43 = arith.mulf %42, %42 : vector<256x171xf32>
    %44 = vector.broadcast %17 : vector<1x171xf32> to vector<256x171xf32>
    %45 = arith.mulf %43, %44 : vector<256x171xf32>
    %46 = vector.broadcast %16 : vector<1x171xf32> to vector<256x171xf32>
    %47 = arith.mulf %40, %46 : vector<256x171xf32>
    %48 = arith.addf %47, %45 : vector<256x171xf32>
    %49 = vector.broadcast %18 : vector<1x171xf32> to vector<256x171xf32>
    %50 = arith.mulf %11, %49 : vector<256x171xf32>
    %51 = arith.addf %48, %50 : vector<256x171xf32>
    %52 = vector.broadcast %19 : vector<1x171xf32> to vector<256x171xf32>
    %53 = arith.mulf %6, %52 : vector<256x171xf32>
    %54 = vector.broadcast %20 : vector<1x171xf32> to vector<256x171xf32>
    %55 = arith.mulf %51, %54 : vector<256x171xf32>
    %56 = arith.addf %53, %55 : vector<256x171xf32>
    %c0_17 = arith.constant 0 : index
    %c0_18 = arith.constant 0 : index
    %c0_19 = arith.constant 0 : index
    %57 = vector.load %arg8[%c0_17, %c0_18, %c0_19] : memref<1x256x171xf32, #tpu.memory_space<vmem>>, vector<1x256x171xf32>
    %58 = vector.shape_cast %57 : vector<1x256x171xf32> to vector<256x171xf32>
    %59 = vector.shape_cast %51 : vector<256x171xf32> to vector<1x256x171xf32>
    tpu.vector_store %arg8[%c0_17, %c0_18, %c0_19], %59 {strides = array<i32>} : memref<1x256x171xf32, #tpu.memory_space<vmem>>, vector<1x256x171xf32>,
    %c0_20 = arith.constant 0 : index
    %c0_21 = arith.constant 0 : index
    %c0_22 = arith.constant 0 : index
    %60 = vector.load %arg9[%c0_20, %c0_21, %c0_22] : memref<1x256x171xf32, #tpu.memory_space<vmem>>, vector<1x256x171xf32>
    %61 = vector.shape_cast %60 : vector<1x256x171xf32> to vector<256x171xf32>
    %62 = vector.shape_cast %56 : vector<256x171xf32> to vector<1x256x171xf32>
    tpu.vector_store %arg9[%c0_20, %c0_21, %c0_22], %62 {strides = array<i32>} : memref<1x256x171xf32, #tpu.memory_space<vmem>>, vector<1x256x171xf32>,
    return
  }
  func.func @transform_0(%arg0: i32, %arg1: i32) -> (i32, i32, i32) {
    %c0_i32 = arith.constant 0 : i32
    %c0_i32_0 = arith.constant 0 : i32
    return %arg0, %arg1, %c0_i32 : i32, i32, i32
  }
  func.func @transform_1(%arg0: i32, %arg1: i32) -> (i32, i32) {
    %c0_i32 = arith.constant 0 : i32
    %c0_i32_0 = arith.constant 0 : i32
    %c0_i32_1 = arith.constant 0 : i32
    return %c0_i32, %c0_i32_0 : i32, i32
  }
  func.func @transform_2(%arg0: i32, %arg1: i32) -> (i32, i32) {
    %c0_i32 = arith.constant 0 : i32
    %c0_i32_0 = arith.constant 0 : i32
    %c0_i32_1 = arith.constant 0 : i32
    return %c0_i32, %c0_i32_0 : i32, i32
  }
  func.func @transform_3(%arg0: i32, %arg1: i32) -> (i32, i32) {
    %c0_i32 = arith.constant 0 : i32
    %c0_i32_0 = arith.constant 0 : i32
    %c0_i32_1 = arith.constant 0 : i32
    return %c0_i32, %c0_i32_0 : i32, i32
  }
  func.func @transform_4(%arg0: i32, %arg1: i32) -> (i32, i32) {
    %c0_i32 = arith.constant 0 : i32
    %c0_i32_0 = arith.constant 0 : i32
    return %arg1, %c0_i32 : i32, i32
  }
  func.func @transform_5(%arg0: i32, %arg1: i32) -> (i32, i32) {
    %c0_i32 = arith.constant 0 : i32
    %c0_i32_0 = arith.constant 0 : i32
    return %arg1, %c0_i32 : i32, i32
  }
  func.func @transform_6(%arg0: i32, %arg1: i32) -> (i32, i32, i32) {
    %c0_i32 = arith.constant 0 : i32
    %c0_i32_0 = arith.constant 0 : i32
    return %arg0, %arg1, %c0_i32 : i32, i32, i32
  }
  func.func @transform_7(%arg0: i32, %arg1: i32) -> (i32, i32, i32) {
    %c0_i32 = arith.constant 0 : i32
    %c0_i32_0 = arith.constant 0 : i32
    return %arg0, %arg1, %c0_i32 : i32, i32, i32
  }
}

</mosaic_0001>

<bundles_post_ra>
// kernel: tpu_custom_call.1
= control target key start
LH: loop header
LB: loop body
LE: loop exit
PB: predicated region body
PF: predicated region fallthrough
CT: control target
= control target key end

     0   :  { %s3751_s24 = smov 0   ;;  %s3753_s25 = smov 0   ;;  %s6016_s0 = inlined_call_operand.vmem [shape: f32[2,256,4], index: 0, kind: input, shape index: {}]   ;;  %s6017_s1 = inlined_call_operand.vmem [shape: f32[4,171], index: 1, kind: input, shape index: {}]   ;;  %s6018_s2 = inlined_call_operand.vmem [shape: f32[1,171], index: 2, kind: input, shape index: {}]   ;;  %s6019_s3 = inlined_call_operand.vmem [shape: f32[8,171], index: 3, kind: input, shape index: {}]   ;;  %s6020_s4 = inlined_call_operand.vmem [shape: f32[256,1], index: 4, kind: input, shape index: {}]   ;;  %s6021_s5 = inlined_call_operand.vmem [shape: f32[256,1], index: 5, kind: input, shape index: {}]   ;;  %s6022_s6 = inlined_call_operand.vmem [shape: f32[2,256,171], index: 6, kind: output, shape index: {0}]   ;;  %s6023_s7 = inlined_call_operand.vmem [shape: f32[2,256,171], index: 7, kind: output, shape index: {1}]  }
   0x1   :  { %s3755_s26 = smov 0  }
   0x2 LB: > { %s30_s27 = sadd.s32 1, %s3703_s25  ;;  %p3224_p0 = scmp.ge.s32.totalorder %s3707_s26, 1  ;;  %s3707_s26 = sphi %s3755_s26, %s18_s26   ;;  %s3703_s25 = sphi %s3753_s25, %s6260_s25   ;;  %s3699_s24 = sphi %s3751_s24, %s6259_s24  }
   0x3   : > { %p32_p1 = scmp.ge.s32.totalorder %s30_s27, 2  ;;  %p285_p2 = scmp.lt.s32.totalorder %s3707_s26, 3 }
   0x5   : > { %s6262_s27 = smov (%p32_p1, %s30_s27), 0  ;;  %p286_p3 = pnand %p3224_p0, %p285_p2 }
   0x7   : > { %289 = sbr.rel (%p286_p3) target bundleno = 611 (0x263), region = 44 }
   0xc   : > { %v1184_v0 = vld [vmem:[%s6020_s4 + $0x10] sm:$0xff]  ;;  %v1182_v1 = vld [vmem:[%s6020_s4] sm:$0xff]  ;;  %vm534_vm0 = vcmask 1043456   ;;  %v3709_v3 = vmov 0   ;;  %p347_p4 = scmp.lt.s32.totalorder %s3699_s24, 1  ;;  %v1185_v5 = vld [vmem:[%s6020_s4 + $0x18] sm:$0xff] }
   0xd   : > { %v422_v2 = vld [vmem:[%s6017_s1] sm:$0xff]  ;;  %3427 = vset.pattern.permute.xlu1 %v3709_v3  ;;  %3426 = vset.pattern.permute.xlu0 %v3709_v3  ;;  %v1183_v6 = vld [vmem:[%s6020_s4 + $0x8] sm:$0xff]  ;;  %v3710_v7 = vmov 0.0   ;;  %vm437_vm1 = vcmask 31744   ;;  %v1189_v14 = vld [vmem:[%s6020_s4 + $0x38] sm:$0xff]  ;;  %vm2911_vm2 = vcmask 351232  }
   0xe   : > { %v436_v4 = vcombine.high %v422_v2, %v422_v2  ;;  %1226 = vperm.xlu1 %3427, %v1184_v0   ;;  %1216 = vperm.xlu0 %3426, %v1182_v1   ;;  %s6264_s24 = smov (!%p347_p4, %s3699_s24), 1  ;;  %v1187_v8 = vld [vmem:[%s6020_s4 + $0x28] sm:$0xff]  ;;  %v1186_v11 = vld [vmem:[%s6020_s4 + $0x20] sm:$0xff]  ;;  %v1188_v15 = vld [vmem:[%s6020_s4 + $0x30] sm:$0xff] }
   0xf   : > { %603 = vmatprep.mubr.f32.mxu0 %v3710_v7  ;;  %699 = vmatprep.mubr.f32.mxu1 %v3710_v7  ;;  %s3395_s15 = sshll.u32 %s6264_s24, 8  ;;  %v1191_v18 = vld [vmem:[%s6020_s4 + $0x48] sm:$0xff]  ;;  %v1190_v19 = vld [vmem:[%s6020_s4 + $0x40] sm:$0xff]  ;;  %v1193_v22 = vld [vmem:[%s6020_s4 + $0x58] sm:$0xff]  ;;  %s3396_s14 = sshll.u32 %s6264_s24, 9 }
  0x10   : > { %3231 = vmatprep.subr.msk.mxu0 %vm534_vm0, %v436_v4  ;;  %3398 = vmatprep.subr.msk.mxu1 %vm534_vm0, %v436_v4  ;;  %s3792_s18 = scalar_lea.vmem %s6016_s0, %s3395_s15  ;;  %v1192_v23 = vld [vmem:[%s6020_s4 + $0x50] sm:$0xff]  ;;  %v1195_v26 = vld [vmem:[%s6020_s4 + $0x68] sm:$0xff]  ;;  %v1194_v27 = vld [vmem:[%s6020_s4 + $0x60] sm:$0xff]  ;;  %s4713_s17 = scalar_lea.vmem %s6022_s6, %s3396_s14 }
  0x11   : > { %3232 = vmatpush1.msk.msra.mxu0 %vm534_vm0, %v422_v2  ;;  %3399 = vmatpush1.msk.msra.mxu1 %vm534_vm0, %v422_v2  ;;  %v390_v9 = vld [vmem:[%s3792_s18] sm:$0xff]  ;;  %v391_v12 = vld [vmem:[%s3792_s18 + $0x8] sm:$0xff]  ;;  %v392_v16 = vld [vmem:[%s3792_s18 + $0x10] sm:$0xff]  ;;  %s4733_s21 = scalar_lea.vmem %s6023_s7, %s3396_s14 }
  0x12   : > { %1231 = vperm.xlu1 %3427, %v1185_v5   ;;  %1221 = vperm.xlu0 %3426, %v1183_v6   ;;  %v406_v10 = vld [vmem:[%s3792_s18 + $0x80] sm:$0xff]  ;;  %v407_v13 = vld [vmem:[%s3792_s18 + $0x88] sm:$0xff]  ;;  %v408_v17 = vld [vmem:[%s3792_s18 + $0x90] sm:$0xff] }
  0x13   : > { %3233 = vmatmul.mubr.msk.f32.vlgmr.msra.gmra.mxu0 %vm437_vm1, %v390_v9  ;;  %3249 = vmatmul.mubr.msk.f32.vlgmr.msra.gmra.mxu1 %vm437_vm1, %v406_v10  ;;  %v393_v20 = vld [vmem:[%s3792_s18 + $0x18] sm:$0xff]  ;;  %v394_v24 = vld [vmem:[%s3792_s18 + $0x20] sm:$0xff]  ;;  %v395_v28 = vld [vmem:[%s3792_s18 + $0x28] sm:$0xff] }
  0x14   : > { %609 = vmatprep.mubr.f32.mxu0 %v3710_v7  ;;  %705 = vmatprep.mubr.f32.mxu1 %v3710_v7  ;;  %v409_v21 = vld [vmem:[%s3792_s18 + $0x98] sm:$0xff]  ;;  %v410_v25 = vld [vmem:[%s3792_s18 + $0xa0] sm:$0xff]  ;;  %v411_v29 = vld [vmem:[%s3792_s18 + $0xa8] sm:$0xff] }
  0x15   : > { %v1197_v30 = vld [vmem:[%s6020_s4 + $0x78] sm:$0xff]  ;;  %v1196_v31 = vld [vmem:[%s6020_s4 + $0x70] sm:$0xff]  ;;  %v1199_v34 = vld [vmem:[%s6020_s4 + $0x88] sm:$0xff] }
  0x16   : > { %1241 = vperm.xlu1 %3427, %v1187_v8   ;;  %1236 = vperm.xlu0 %3426, %v1186_v11   ;;  %v396_v32 = vld [vmem:[%s3792_s18 + $0x30] sm:$0xff]  ;;  %v1198_v35 = vld [vmem:[%s6020_s4 + $0x80] sm:$0xff]  ;;  %v397_v36 = vld [vmem:[%s3792_s18 + $0x38] sm:$0xff] }
  0x17   : > { %3234 = vmatmul.mubr.msk.f32.gmra.mxu0 %vm437_vm1, %v391_v12  ;;  %3250 = vmatmul.mubr.msk.f32.gmra.mxu1 %vm437_vm1, %v407_v13  ;;  %v412_v33 = vld [vmem:[%s3792_s18 + $0xb0] sm:$0xff]  ;;  %v413_v37 = vld [vmem:[%s3792_s18 + $0xb8] sm:$0xff]  ;;  %v398_v40 = vld [vmem:[%s3792_s18 + $0x40] sm:$0xff] }
  0x18   : > { %615 = vmatprep.mubr.f32.mxu0 %v3710_v7  ;;  %711 = vmatprep.mubr.f32.mxu1 %v3710_v7  ;;  %v1201_v38 = vld [vmem:[%s6020_s4 + $0x98] sm:$0xff]  ;;  %v1200_v39 = vld [vmem:[%s6020_s4 + $0x90] sm:$0xff]  ;;  %v414_v41 = vld [vmem:[%s3792_s18 + $0xc0] sm:$0xff] }
  0x19   : > { %v1203_v42 = vld [vmem:[%s6020_s4 + $0xa8] sm:$0xff]  ;;  %v1202_v43 = vld [vmem:[%s6020_s4 + $0xa0] sm:$0xff]  ;;  %v1205_v46 = vld [vmem:[%s6020_s4 + $0xb8] sm:$0xff] }
  0x1a   : > { %1251 = vperm.xlu1 %3427, %v1189_v14   ;;  %1246 = vperm.xlu0 %3426, %v1188_v15   ;;  %v399_v44 = vld [vmem:[%s3792_s18 + $0x48] sm:$0xff]  ;;  %v1204_v47 = vld [vmem:[%s6020_s4 + $0xb0] sm:$0xff]  ;;  %v1206_v51 = vld [vmem:[%s6020_s4 + $0xc0] sm:$0xff] }
  0x1b   : > { %3235 = vmatmul.mubr.msk.f32.gmra.mxu0 %vm437_vm1, %v392_v16  ;;  %3251 = vmatmul.mubr.msk.f32.gmra.mxu1 %vm437_vm1, %v408_v17  ;;  %v415_v45 = vld [vmem:[%s3792_s18 + $0xc8] sm:$0xff]  ;;  %v400_v48 = vld [vmem:[%s3792_s18 + $0x50] sm:$0xff]  ;;  %v401_v52 = vld [vmem:[%s3792_s18 + $0x58] sm:$0xff] }
  0x1c   : > { %621 = vmatprep.mubr.f32.mxu0 %v3710_v7  ;;  %717 = vmatprep.mubr.f32.mxu1 %v3710_v7  ;;  %v416_v49 = vld [vmem:[%s3792_s18 + $0xd0] sm:$0xff]  ;;  %v1207_v50 = vld [vmem:[%s6020_s4 + $0xc8] sm:$0xff]  ;;  %v417_v53 = vld [vmem:[%s3792_s18 + $0xd8] sm:$0xff] }
  0x1d   : > { %v1209_v54 = vld [vmem:[%s6020_s4 + $0xd8] sm:$0xff]  ;;  %v1208_v55 = vld [vmem:[%s6020_s4 + $0xd0] sm:$0xff]  ;;  %v402_v56 = vld [vmem:[%s3792_s18 + $0x60] sm:$0xff] }
  0x1e   : > { %1261 = vperm.xlu1 %3427, %v1191_v18   ;;  %1256 = vperm.xlu0 %3426, %v1190_v19   ;;  %v418_v57 = vld [vmem:[%s3792_s18 + $0xe0] sm:$0xff]  ;;  %v1211_v58 = vld [vmem:[%s6020_s4 + $0xe8] sm:$0xff]  ;;  %v1213_v62 = vld [vmem:[%s6020_s4 + $0xf8] sm:$0xff] }
  0x1f   : > { %3236 = vmatmul.mubr.msk.f32.gmra.mxu0 %vm437_vm1, %v393_v20  ;;  %3252 = vmatmul.mubr.msk.f32.gmra.mxu1 %vm437_vm1, %v409_v21  ;;  %v1210_v59 = vld [vmem:[%s6020_s4 + $0xe0] sm:$0xff]  ;;  %v403_v60 = vld [vmem:[%s3792_s18 + $0x68] sm:$0xff]  ;;  %v1212_v63 = vld [vmem:[%s6020_s4 + $0xf0] sm:$0xff] }
  0x20   : > { %627 = vmatprep.mubr.f32.mxu0 %v3710_v7  ;;  %723 = vmatprep.mubr.f32.mxu1 %v3710_v7  ;;  %v419_v61 = vld [vmem:[%s3792_s18 + $0xe8] sm:$0xff]  ;;  %v404_v0 = vld [vmem:[%s3792_s18 + $0x70] sm:$0xff]  ;;  %v1446_v3 = vld [vmem:[%s6021_s5] sm:$0xff] }
  0x21   : > { %v420_v1 = vld [vmem:[%s3792_s18 + $0xf0] sm:$0xff]  ;;  %v1447_v2 = vld [vmem:[%s6021_s5 + $0x8] sm:$0xff]  ;;  %v405_v4 = vld [vmem:[%s3792_s18 + $0x78] sm:$0xff] }
  0x22   : > { %1271 = vperm.xlu1 %3427, %v1193_v22   ;;  %1266 = vperm.xlu0 %3426, %v1192_v23   ;;  %v421_v5 = vld [vmem:[%s3792_s18 + $0xf8] sm:$0xff]  ;;  %v1448_v8 = vld [vmem:[%s6021_s5 + $0x10] sm:$0xff]  ;;  %v1450_v9 = vld [vmem:[%s6021_s5 + $0x20] sm:$0xff] }
  0x23   : > { %3237 = vmatmul.mubr.msk.f32.gmra.mxu0 %vm437_vm1, %v394_v24  ;;  %3253 = vmatmul.mubr.msk.f32.gmra.mxu1 %vm437_vm1, %v410_v25  ;;  %v1449_v6 = vld [vmem:[%s6021_s5 + $0x18] sm:$0xff]  ;;  %v1452_v11 = vld [vmem:[%s6021_s5 + $0x30] sm:$0xff]  ;;  %v1455_v12 = vld [vmem:[%s6021_s5 + $0x48] sm:$0xff] }
  0x24   : > { %633 = vmatprep.mubr.f32.mxu0 %v3710_v7  ;;  %729 = vmatprep.mubr.f32.mxu1 %v3710_v7  ;;  %v1453_v10 = vld [vmem:[%s6021_s5 + $0x38] sm:$0xff]  ;;  %v1454_v13 = vld [vmem:[%s6021_s5 + $0x40] sm:$0xff]  ;;  %v1456_v15 = vld [vmem:[%s6021_s5 + $0x50] sm:$0xff] }
  0x25   : > { %v1457_v14 = vld [vmem:[%s6021_s5 + $0x58] sm:$0xff]  ;;  %v1459_v16 = vld [vmem:[%s6021_s5 + $0x68] sm:$0xff]  ;;  %v1458_v17 = vld [vmem:[%s6021_s5 + $0x60] sm:$0xff] }
  0x26   : > { %1281 = vperm.xlu1 %3427, %v1195_v26   ;;  %1276 = vperm.xlu0 %3426, %v1194_v27   ;;  %v1461_v18 = vld [vmem:[%s6021_s5 + $0x78] sm:$0xff]  ;;  %v1460_v19 = vld [vmem:[%s6021_s5 + $0x70] sm:$0xff]  ;;  %v1463_v20 = vld [vmem:[%s6021_s5 + $0x88] sm:$0xff] }
  0x27   : > { %3238 = vmatmul.mubr.msk.f32.gmra.mxu0 %vm437_vm1, %v395_v28  ;;  %3254 = vmatmul.mubr.msk.f32.gmra.mxu1 %vm437_vm1, %v411_v29  ;;  %v1462_v21 = vld [vmem:[%s6021_s5 + $0x80] sm:$0xff]  ;;  %v1465_v22 = vld [vmem:[%s6021_s5 + $0x98] sm:$0xff]  ;;  %v1464_v23 = vld [vmem:[%s6021_s5 + $0x90] sm:$0xff] }
  0x28   : > { %639 = vmatprep.mubr.f32.mxu0 %v3710_v7  ;;  %735 = vmatprep.mubr.f32.mxu1 %v3710_v7  ;;  %v1467_v24 = vld [vmem:[%s6021_s5 + $0xa8] sm:$0xff]  ;;  %v1466_v25 = vld [vmem:[%s6021_s5 + $0xa0] sm:$0xff]  ;;  %v1469_v26 = vld [vmem:[%s6021_s5 + $0xb8] sm:$0xff] }
  0x29   : > { %v1468_v27 = vld [vmem:[%s6021_s5 + $0xb0] sm:$0xff]  ;;  %v1471_v28 = vld [vmem:[%s6021_s5 + $0xc8] sm:$0xff]  ;;  %v1470_v29 = vld [vmem:[%s6021_s5 + $0xc0] sm:$0xff] }
  0x2a   : > { %1291 = vperm.xlu1 %3427, %v1197_v30   ;;  %1286 = vperm.xlu0 %3426, %v1196_v31   ;;  %v1473_v30 = vld [vmem:[%s6021_s5 + $0xd8] sm:$0xff]  ;;  %v1472_v31 = vld [vmem:[%s6021_s5 + $0xd0] sm:$0xff] }
  0x2b   : > { %3239 = vmatmul.mubr.msk.f32.gmra.mxu0 %vm437_vm1, %v396_v32  ;;  %3255 = vmatmul.mubr.msk.f32.gmra.mxu1 %vm437_vm1, %v412_v33  ;;  %v425_v32 = vlaneseq  ;;  %v1475_v33 = vld [vmem:[%s6021_s5 + $0xe8] sm:$0xff] }
  0x2c   : > { %645 = vmatprep.mubr.f32.mxu0 %v3710_v7  ;;  %741 = vmatprep.mubr.f32.mxu1 %v3710_v7 }
  0x2e   : > { %1301 = vperm.xlu1 %3427, %v1199_v34   ;;  %1296 = vperm.xlu0 %3426, %v1198_v35   ;;  %v1474_v34 = vld [vmem:[%s6021_s5 + $0xe0] sm:$0xff]  ;;  %v4062_v35 = vshrl.u32 %v425_v32, 7 }
  0x2f   : > { %3240 = vmatmul.mubr.msk.f32.gmra.mxu0 %vm437_vm1, %v397_v36  ;;  %3256 = vmatmul.mubr.msk.f32.gmra.mxu1 %vm437_vm1, %v413_v37  ;;  %v1477_v36 = vld [vmem:[%s6021_s5 + $0xf8] sm:$0xff]  ;;  %v1476_v37 = vld [vmem:[%s6021_s5 + $0xf0] sm:$0xff] }
  0x30   : > { %651 = vmatprep.mubr.f32.mxu0 %v3710_v7  ;;  %747 = vmatprep.mubr.f32.mxu1 %v3710_v7 }
  0x32   : > { %1311 = vperm.xlu1 %3427, %v1201_v38   ;;  %1306 = vperm.xlu0 %3426, %v1200_v39  }
  0x33   : > { %3241 = vmatmul.mubr.msk.f32.gmra.mxu0 %vm437_vm1, %v398_v40  ;;  %3257 = vmatmul.mubr.msk.f32.gmra.mxu1 %vm437_vm1, %v414_v41  ;;  %v4075_v40 = vsub.s32 1, %v4062_v35  ;;  %v4080_v41 = vld [vmem:[%s6019_s3] sm:$0xff] }
  0x34   : > { %657 = vmatprep.mubr.f32.mxu0 %v3710_v7  ;;  %753 = vmatprep.mubr.f32.mxu1 %v3710_v7 }
  0x36   : > { %1321 = vperm.xlu1 %3427, %v1203_v42   ;;  %1316 = vperm.xlu0 %3426, %v1202_v43   ;;  %v4085_v42 = vld [vmem:[%s6019_s3 + $0x8] sm:$0xff] }
  0x37   : > { %3242 = vmatmul.mubr.msk.f32.gmra.mxu0 %vm437_vm1, %v399_v44  ;;  %3258 = vmatmul.mubr.msk.f32.gmra.mxu1 %vm437_vm1, %v415_v45  ;;  %v4093_v45 = vrot.slane %v4080_v41, %v4075_v40 }
  0x38   : > { %663 = vmatprep.mubr.f32.mxu0 %v3710_v7  ;;  %759 = vmatprep.mubr.f32.mxu1 %v3710_v7 }
  0x3a   : > { %1331 = vperm.xlu1 %3427, %v1205_v46   ;;  %1326 = vperm.xlu0 %3426, %v1204_v47   ;;  %v4097_v46 = vrot.slane %v4085_v42, %v4075_v40 }
  0x3b   : > { %3243 = vmatmul.mubr.msk.f32.gmra.mxu0 %vm437_vm1, %v400_v48  ;;  %3259 = vmatmul.mubr.msk.f32.gmra.mxu1 %vm437_vm1, %v416_v49 }
  0x3c   : > { %669 = vmatprep.mubr.f32.mxu0 %v3710_v7  ;;  %765 = vmatprep.mubr.f32.mxu1 %v3710_v7 }
  0x3e   : > { %1341 = vperm.xlu1 %3427, %v1207_v50   ;;  %1336 = vperm.xlu0 %3426, %v1206_v51  }
  0x3f   : > { %3244 = vmatmul.mubr.msk.f32.gmra.mxu0 %vm437_vm1, %v401_v52  ;;  %3260 = vmatmul.mubr.msk.f32.gmra.mxu1 %vm437_vm1, %v417_v53 }
  0x40   : > { %675 = vmatprep.mubr.f32.mxu0 %v3710_v7  ;;  %771 = vmatprep.mubr.f32.mxu1 %v3710_v7 }
  0x42   : > { %1351 = vperm.xlu1 %3427, %v1209_v54   ;;  %1346 = vperm.xlu0 %3426, %v1208_v55  }
  0x43   : > { %3245 = vmatmul.mubr.msk.f32.gmra.mxu0 %vm437_vm1, %v402_v56  ;;  %3261 = vmatmul.mubr.msk.f32.gmra.mxu1 %vm437_vm1, %v418_v57 }
  0x44   : > { %681 = vmatprep.mubr.f32.mxu0 %v3710_v7  ;;  %777 = vmatprep.mubr.f32.mxu1 %v3710_v7 }
  0x46   : > { %1361 = vperm.xlu1 %3427, %v1211_v58   ;;  %1356 = vperm.xlu0 %3426, %v1210_v59  }
  0x47   : > { %3246 = vmatmul.mubr.msk.f32.gmra.mxu0 %vm437_vm1, %v403_v60  ;;  %3262 = vmatmul.mubr.msk.f32.gmra.mxu1 %vm437_vm1, %v419_v61 }
  0x48   : > { %687 = vmatprep.mubr.f32.mxu0 %v3710_v7  ;;  %783 = vmatprep.mubr.f32.mxu1 %v3710_v7 }
  0x4a   : > { %1371 = vperm.xlu1 %3427, %v1213_v62   ;;  %1366 = vperm.xlu0 %3426, %v1212_v63  }
  0x4b   : > { %3247 = vmatmul.mubr.msk.f32.gmra.mxu0 %vm437_vm1, %v404_v0  ;;  %3263 = vmatmul.mubr.msk.f32.gmra.mxu1 %vm437_vm1, %v420_v1 }
  0x4c   : > { %693 = vmatprep.mubr.f32.mxu0 %v3710_v7  ;;  %789 = vmatprep.mubr.f32.mxu1 %v3710_v7  ;;  %v1451_v7 = vld [vmem:[%s6021_s5 + $0x28] sm:$0xff] }
  0x4e   : > { %1485 = vperm.xlu1 %3427, %v1447_v2   ;;  %1480 = vperm.xlu0 %3426, %v1446_v3  }
  0x4f   : > { %3248 = vmatmul.mubr.msk.f32.gmra.mxu0 %vm437_vm1, %v405_v4  ;;  %3264 = vmatmul.mubr.msk.f32.gmra.mxu1 %vm437_vm1, %v421_v5 }
  0x52   : > { %1495 = vperm.xlu1 %3427, %v1449_v6   ;;  %1490 = vperm.xlu0 %3426, %v1448_v8  }
  0x56   : > { %1505 = vperm.xlu1 %3427, %v1451_v7   ;;  %1500 = vperm.xlu0 %3426, %v1450_v9  }
  0x5a   : > { %1515 = vperm.xlu1 %3427, %v1453_v10   ;;  %1510 = vperm.xlu0 %3426, %v1452_v11  }
  0x5e   : > { %1525 = vperm.xlu1 %3427, %v1455_v12   ;;  %1520 = vperm.xlu0 %3426, %v1454_v13  }
  0x62   : > { %1535 = vperm.xlu1 %3427, %v1457_v14   ;;  %1530 = vperm.xlu0 %3426, %v1456_v15  }
  0x66   : > { %1545 = vperm.xlu1 %3427, %v1459_v16   ;;  %1540 = vperm.xlu0 %3426, %v1458_v17  }
  0x6a   : > { %1555 = vperm.xlu1 %3427, %v1461_v18   ;;  %1550 = vperm.xlu0 %3426, %v1460_v19  }
  0x6e   : > { %1565 = vperm.xlu1 %3427, %v1463_v20   ;;  %1560 = vperm.xlu0 %3426, %v1462_v21  }
  0x72   : > { %1575 = vperm.xlu1 %3427, %v1465_v22   ;;  %1570 = vperm.xlu0 %3426, %v1464_v23  }
  0x76   : > { %1585 = vperm.xlu1 %3427, %v1467_v24   ;;  %1580 = vperm.xlu0 %3426, %v1466_v25  }
  0x7a   : > { %1595 = vperm.xlu1 %3427, %v1469_v26   ;;  %1590 = vperm.xlu0 %3426, %v1468_v27  }
  0x7e   : > { %1605 = vperm.xlu1 %3427, %v1471_v28   ;;  %1600 = vperm.xlu0 %3426, %v1470_v29  }
  0x82   : > { %1615 = vperm.xlu1 %3427, %v1473_v30   ;;  %1610 = vperm.xlu0 %3426, %v1472_v31  }
  0x86   : > { %1625 = vperm.xlu1 %3427, %v1475_v33   ;;  %1620 = vperm.xlu0 %3426, %v1474_v34  }
  0x89   : > { %v4070_v38 = vpop.permute.xlu1 %1226  ;;  %v4072_v39 = vpop.permute.xlu0 %1216 }
  0x8a   : > { %1635 = vperm.xlu1 %3427, %v1477_v36   ;;  %1630 = vperm.xlu0 %3426, %v1476_v37  }
  0x8d   : > { %v4087_v43 = vpop.permute.xlu1 %1231  ;;  %v4089_v44 = vpop.permute.xlu0 %1221 }
  0x91   : > { %v1242_v47 = vpop.permute.xlu1 %1241  ;;  %v4099_v48 = vpop.permute.xlu0 %1236 }
  0x92   : > { %v4102_v49 = vmul.f32 %v4093_v45, %v1242_v47  ;;  %v4105_v50 = vmul.f32 %v4097_v46, %v1242_v47 }
  0x95   : > { %v1252_v51 = vpop.permute.xlu1 %1251  ;;  %v1247_v52 = vpop.permute.xlu0 %1246 }
  0x96   : > { %v4108_v53 = vmul.f32 %v4093_v45, %v1252_v51  ;;  %v4111_v54 = vmul.f32 %v4097_v46, %v1252_v51  ;;  %v4114_v55 = vmul.f32 %v4093_v45, %v1247_v52  ;;  %v4117_v56 = vmul.f32 %v4097_v46, %v1247_v52 }
  0x99   : > { %v1262_v57 = vpop.permute.xlu1 %1261  ;;  %v1257_v58 = vpop.permute.xlu0 %1256 }
  0x9a   : > { %v4120_v59 = vmul.f32 %v4093_v45, %v1262_v57  ;;  %v4123_v60 = vmul.f32 %v4097_v46, %v1262_v57  ;;  %v4126_v61 = vmul.f32 %v4093_v45, %v1257_v58  ;;  %v4129_v62 = vmul.f32 %v4097_v46, %v1257_v58 }
  0x9d   : > { %v1272_v63 = vpop.permute.xlu1 %1271  ;;  %v1267_v0 = vpop.permute.xlu0 %1266 }
  0x9e   : > { %v4132_v1 = vmul.f32 %v4093_v45, %v1272_v63  ;;  %v4135_v2 = vmul.f32 %v4097_v46, %v1272_v63  ;;  %v4138_v3 = vmul.f32 %v4093_v45, %v1267_v0  ;;  %v4141_v4 = vmul.f32 %v4097_v46, %v1267_v0 }
  0xa1   : > { %v1282_v5 = vpop.permute.xlu1 %1281  ;;  %v1277_v6 = vpop.permute.xlu0 %1276 }
  0xa2   : > { %v4144_v8 = vmul.f32 %v4093_v45, %v1282_v5  ;;  %v4147_v7 = vmul.f32 %v4097_v46, %v1282_v5  ;;  %v4150_v9 = vmul.f32 %v4093_v45, %v1277_v6  ;;  %v4153_v10 = vmul.f32 %v4097_v46, %v1277_v6 }
  0xa5   : > { %v1292_v11 = vpop.permute.xlu1 %1291  ;;  %v1287_v12 = vpop.permute.xlu0 %1286 }
  0xa6   : > { %v4156_v13 = vmul.f32 %v4093_v45, %v1292_v11  ;;  %v4159_v14 = vmul.f32 %v4097_v46, %v1292_v11  ;;  %v4162_v15 = vmul.f32 %v4093_v45, %v1287_v12  ;;  %v4165_v16 = vmul.f32 %v4097_v46, %v1287_v12 }
  0xa9   : > { %v4167_v17 = vpop.permute.xlu1 %1301  ;;  %v4169_v18 = vpop.permute.xlu0 %1296 }
  0xad   : > { %v1312_v19 = vpop.permute.xlu1 %1311  ;;  %v1307_v20 = vpop.permute.xlu0 %1306 }
  0xae   : > { %v4172_v21 = vmul.f32 %v4093_v45, %v1312_v19  ;;  %v4175_v22 = vmul.f32 %v4097_v46, %v1312_v19  ;;  %v4178_v23 = vmul.f32 %v4093_v45, %v1307_v20  ;;  %v4181_v24 = vmul.f32 %v4097_v46, %v1307_v20 }
  0xb0   : > { %6059 = vst [vmem:[#allocation2_spill] sm:$0xff] %v4172_v21  ;;  %6060 = vst [vmem:[#allocation3_spill] sm:$0xff] %v4175_v22  ;;  %v4340_v21 = vmul.f32 %v4097_v46, %v4099_v48 }
  0xb1   : > { %6061 = vst [vmem:[#allocation4_spill] sm:$0xff] %v4178_v23  ;;  %6062 = vst [vmem:[#allocation5_spill] sm:$0xff] %v4181_v24  ;;  %v1322_v25 = vpop.permute.xlu1 %1321  ;;  %v1317_v26 = vpop.permute.xlu0 %1316  ;;  %v1385_v24 = vmul.f32 %v4097_v46, %v4089_v44 }
  0xb2   : > { %v4184_v27 = vmul.f32 %v4093_v45, %v1322_v25  ;;  %v4187_v28 = vmul.f32 %v4097_v46, %v1322_v25  ;;  %v4190_v29 = vmul.f32 %v4093_v45, %v1317_v26  ;;  %v4193_v30 = vmul.f32 %v4097_v46, %v1317_v26 }
  0xb4   : > { %6063 = vst [vmem:[#allocation6_spill] sm:$0xff] %v4184_v27  ;;  %6064 = vst [vmem:[#allocation7_spill] sm:$0xff] %v4187_v28  ;;  %v1388_v28 = vmul.f32 %v4093_v45, %v4087_v43 }
  0xb5   : > { %6065 = vst [vmem:[#allocation8_spill] sm:$0xff] %v4190_v29  ;;  %6066 = vst [vmem:[#allocation9_spill] sm:$0xff] %v4193_v30  ;;  %v1332_v31 = vpop.permute.xlu1 %1331  ;;  %v1327_v32 = vpop.permute.xlu0 %1326  ;;  %v1383_v29 = vmul.f32 %v4097_v46, %v4072_v39 }
  0xb6   : > { %v4196_v33 = vmul.f32 %v4093_v45, %v1332_v31  ;;  %v4199_v34 = vmul.f32 %v4097_v46, %v1332_v31  ;;  %v4202_v36 = vmul.f32 %v4093_v45, %v1327_v32  ;;  %v4205_v37 = vmul.f32 %v4097_v46, %v1327_v32 }
  0xb8   : > { %6067 = vst [vmem:[#allocation10_spill] sm:$0xff] %v4196_v33  ;;  %6068 = vst [vmem:[#allocation11_spill] sm:$0xff] %v4199_v34  ;;  %v1386_v33 = vmul.f32 %v4093_v45, %v4070_v38 }
  0xb9   : > { %6069 = vst [vmem:[#allocation12_spill] sm:$0xff] %v4202_v36  ;;  %6070 = vst [vmem:[#allocation13_spill] sm:$0xff] %v4205_v37  ;;  %v1342_v47 = vpop.permute.xlu1 %1341  ;;  %v1337_v51 = vpop.permute.xlu0 %1336 }
  0xba   : > { %v4208_v52 = vmul.f32 %v4093_v45, %v1342_v47  ;;  %v4211_v57 = vmul.f32 %v4097_v46, %v1342_v47  ;;  %v4214_v58 = vmul.f32 %v4093_v45, %v1337_v51  ;;  %v4217_v63 = vmul.f32 %v4097_v46, %v1337_v51 }
  0xbc   : > { %6071 = vst [vmem:[#allocation14_spill] sm:$0xff] %v4208_v52  ;;  %6072 = vst [vmem:[#allocation15_spill] sm:$0xff] %v4211_v57 }
  0xbd   : > { %6073 = vst [vmem:[#allocation16_spill] sm:$0xff] %v4214_v58  ;;  %6074 = vst [vmem:[#allocation17_spill] sm:$0xff] %v4217_v63  ;;  %v1352_v0 = vpop.permute.xlu1 %1351  ;;  %v1347_v5 = vpop.permute.xlu0 %1346 }
  0xbe   : > { %v4220_v6 = vmul.f32 %v4093_v45, %v1352_v0  ;;  %v4223_v11 = vmul.f32 %v4097_v46, %v1352_v0  ;;  %v4226_v12 = vmul.f32 %v4093_v45, %v1347_v5  ;;  %v4229_v19 = vmul.f32 %v4097_v46, %v1347_v5 }
  0xbf   : > { %v427_v5 = vsub.s32 0, %v4062_v35 }
  0xc0   : > { %6075 = vst [vmem:[#allocation18_spill] sm:$0xff] %v4220_v6  ;;  %6076 = vst [vmem:[#allocation19_spill] sm:$0xff] %v4223_v11 }
  0xc1   : > { %6077 = vst [vmem:[#allocation20_spill] sm:$0xff] %v4226_v12  ;;  %6078 = vst [vmem:[#allocation21_spill] sm:$0xff] %v4229_v19  ;;  %v1362_v20 = vpop.permute.xlu1 %1361  ;;  %v1357_v25 = vpop.permute.xlu0 %1356  ;;  %v1640_v12 = vsub.s32 2, %v4062_v35  ;;  %v2704_v19 = vsub.s32 6, %v4062_v35  ;;  %v4277_v57 = vrot.slane %v4080_v41, %v427_v5  ;;  %v4292_v34 = vrot.slane %v4085_v42, %v427_v5 }
  0xc2   : > { %v4232_v26 = vmul.f32 %v4093_v45, %v1362_v20  ;;  %v4235_v31 = vmul.f32 %v4097_v46, %v1362_v20  ;;  %v4238_v32 = vmul.f32 %v4093_v45, %v1357_v25  ;;  %v4241_v47 = vmul.f32 %v4097_v46, %v1357_v25 }
  0xc4   : > { %6079 = vst [vmem:[#allocation22_spill] sm:$0xff] %v4232_v26  ;;  %6080 = vst [vmem:[#allocation23_spill] sm:$0xff] %v4235_v31  ;;  %v2360_v26 = vsub.s32 4, %v4062_v35 }
  0xc5   : > { %6081 = vst [vmem:[#allocation24_spill] sm:$0xff] %v4238_v32  ;;  %6082 = vst [vmem:[#allocation25_spill] sm:$0xff] %v4241_v47  ;;  %v1372_v51 = vpop.permute.xlu1 %1371  ;;  %v1367_v0 = vpop.permute.xlu0 %1366  ;;  %v423_v47 = vld [vmem:[%s6018_s2] sm:$0x3]  ;;  %v2568_v32 = vsub.s32 5, %v4062_v35 }
  0xc6   : > { %v4247_v11 = vmul.f32 %v4093_v45, %v1372_v51  ;;  %v4250_v20 = vmul.f32 %v4097_v46, %v1372_v51  ;;  %v4253_v31 = vmul.f32 %v4093_v45, %v1367_v0  ;;  %v4256_v25 = vmul.f32 %v4097_v46, %v1367_v0 }
  0xc7   : > { %v2776_v51 = vsub.s32 7, %v4062_v35  ;;  %v4269_v0 = vrot.slane %v4085_v42, %v1640_v12  ;;  %v4280_v52 = vrot.slane %v4080_v41, %v2568_v32  ;;  %v4283_v58 = vrot.slane %v423_v47, %v4075_v40 }
  0xc8   : > { %6083 = vst [vmem:[#allocation26_spill] sm:$0xff] %v4247_v11  ;;  %6084 = vst [vmem:[#allocation27_spill] sm:$0xff] %v4250_v20  ;;  %v2432_v11 = vsub.s32 3, %v4062_v35  ;;  %v4266_v20 = vrot.slane %v4080_v41, %v1640_v12  ;;  %v4286_v35 = vrot.slane %v4085_v42, %v2704_v19  ;;  %v4289_v12 = vrot.slane %v4080_v41, %v2360_v26 }
  0xc9   : > { %6085 = vst [vmem:[#allocation28_spill] sm:$0xff] %v4253_v31  ;;  %6086 = vst [vmem:[#allocation29_spill] sm:$0xff] %v4256_v25  ;;  %v1486_v6 = vpop.permute.xlu1 %1485  ;;  %v1481_v63 = vpop.permute.xlu0 %1480  ;;  %v4271_v25 = vrot.slane %v423_v47, %v427_v5  ;;  %v4274_v31 = vrot.slane %v4080_v41, %v2704_v19  ;;  %v4295_v37 = vrot.slane %v4085_v42, %v2360_v26 }
  0xca   : > { %6087 = vst [vmem:[#allocation30_spill] sm:$0xff] %v4266_v20  ;;  %6088 = vst [vmem:[#allocation31_spill] sm:$0xff] %v4269_v0  ;;  %v4298_v36 = vrot.slane %v4085_v42, %v2568_v32  ;;  %v4303_v19 = vrot.slane %v4080_v41, %v2432_v11  ;;  %v4306_v30 = vrot.slane %v4080_v41, %v2776_v51 }
  0xcb   : > { %6089 = vst [vmem:[#allocation32_spill] sm:$0xff] %v4271_v25  ;;  %6090 = vst [vmem:[#allocation33_spill] sm:$0xff] %v4274_v31  ;;  %v4309_v5 = vrot.slane %v4085_v42, %v2432_v11  ;;  %v4313_v26 = vmul.f32 %v4097_v46, %v4070_v38  ;;  %v1382_v32 = vmul.f32 %v4093_v45, %v4072_v39 }
  0xcc   : > { %6091 = vst [vmem:[#allocation34_spill] sm:$0xff] %v4283_v58  ;;  %6092 = vst [vmem:[#allocation35_spill] sm:$0xff] %v4286_v35  ;;  %v1389_v41 = vmul.f32 %v4097_v46, %v4087_v43  ;;  %v1384_v11 = vmul.f32 %v4093_v45, %v4089_v44  ;;  %v1648_v27 = vmul.f32 %v4266_v20, %v1486_v6 }
  0xcd   : > { %6093 = vst [vmem:[#allocation36_spill] sm:$0xff] %v4289_v12  ;;  %6094 = vst [vmem:[#allocation37_spill] sm:$0xff] %v4295_v37  ;;  %v1496_v40 = vpop.permute.xlu1 %1495  ;;  %v1491_v47 = vpop.permute.xlu0 %1490  ;;  %v1649_v38 = vmul.f32 %v4269_v0, %v1486_v6  ;;  %v1646_v23 = vmul.f32 %v4266_v20, %v1481_v63  ;;  %v1647_v39 = vmul.f32 %v4269_v0, %v1481_v63 }
  0xce   : > { %6095 = vst [vmem:[#allocation38_spill] sm:$0xff] %v4298_v36  ;;  %6096 = vst [vmem:[#allocation39_spill] sm:$0xff] %v4303_v19  ;;  %v4332_v22 = vrot.slane %v4085_v42, %v2776_v51  ;;  %v4336_v43 = vmul.f32 %v4093_v45, %v4099_v48  ;;  %v1652_v6 = vmul.f32 %v4266_v20, %v1496_v40 }
  0xcf   : > { %6097 = vst [vmem:[#allocation40_spill] sm:$0xff] %v4306_v30  ;;  %6098 = vst [vmem:[#allocation41_spill] sm:$0xff] %v4309_v5  ;;  %v1653_v30 = vmul.f32 %v4269_v0, %v1496_v40  ;;  %v4346_v63 = vmul.f32 %v4093_v45, %v4167_v17  ;;  %v4350_v42 = vmul.f32 %v4097_v46, %v4167_v17 }
  0xd0   : > { %6099 = vst [vmem:[#allocation42_spill] sm:$0xff] %v4332_v22  ;;  %v4354_v51 = vmul.f32 %v4093_v45, %v4169_v18  ;;  %v4359_v22 = vmul.f32 %v4097_v46, %v4169_v18  ;;  %v4361_v40 = vadd.f32 %v1648_v27, %v1384_v11  ;;  %v4363_v19 = vadd.f32 %v1649_v38, %v1385_v24 }
  0xd1   : > { %v1506_v44 = vpop.permute.xlu1 %1505  ;;  %v1501_v5 = vpop.permute.xlu0 %1500  ;;  %6100 = vst [vmem:[#allocation43_spill] sm:$0xff] %v4346_v63  ;;  %6101 = vst [vmem:[#allocation44_spill] sm:$0xff] %v4350_v42  ;;  %v1650_v63 = vmul.f32 %v4266_v20, %v1491_v47  ;;  %v4366_v37 = vadd.f32 %v1646_v23, %v1382_v32  ;;  %v4368_v17 = vadd.f32 %v1647_v39, %v1383_v29 }
  0xd2   : > { %6102 = vst [vmem:[#allocation45_spill] sm:$0xff] %v4354_v51  ;;  %v1657_v48 = vmul.f32 %v4269_v0, %v1506_v44  ;;  %6103 = vst [vmem:[#allocation46_spill] sm:$0xff] %v4359_v22  ;;  %v1651_v42 = vmul.f32 %v4269_v0, %v1491_v47  ;;  %v4374_v12 = vadd.f32 %v1652_v6, %v1388_v28 }
  0xd3   : > { %v605_v51 = vpop.f32.mrf.mxu0  ;;  %v701_v36 = vpop.f32.mrf.mxu1  ;;  %v4376_v46 = vadd.f32 %v1653_v30, %v1389_v41  ;;  %v4388_v30 = vadd.f32 %v1650_v63, %v1386_v33  ;;  %v1656_v41 = vmul.f32 %v4266_v20, %v1506_v44 }
  0xd4   : > { %v4372_v45 = vadd.f32 %v1657_v48, %v4105_v50  ;;  %6105 = vst [vmem:[#allocation48_spill] sm:$0xff] %v4374_v12  ;;  %v4379_v18 = vadd.f32 %v605_v51, %v4271_v25  ;;  %v4382_v24 = vadd.f32 %v701_v36, %v4271_v25 }
  0xd5   : > { %6106 = vst [vmem:[#allocation49_spill] sm:$0xff] %v4376_v46  ;;  %v1516_v23 = vpop.permute.xlu1 %1515  ;;  %v1511_v27 = vpop.permute.xlu0 %1510 }
  0xd6   : > { %6104 = vst [vmem:[#allocation47_spill] sm:$0xff] %v4372_v45  ;;  %v1660_v29 = vmul.f32 %v4266_v20, %v1516_v23  ;;  %v1661_v47 = vmul.f32 %v4269_v0, %v1516_v23  ;;  %v1658_v50 = vmul.f32 %v4266_v20, %v1511_v27  ;;  %v1659_v32 = vmul.f32 %v4269_v0, %v1511_v27  ;;  %v607_v28 = vpop.f32.mrf.mxu0  ;;  %v703_v11 = vpop.f32.mrf.mxu1 }
  0xd7   : > { %v3265_v38 = vmul.f32 -1.442695, %v4379_v18  ;;  %v3297_v36 = vmul.f32 -1.442695, %v4382_v24  ;;  %v4406_v44 = vadd.f32 %v607_v28, %v4283_v58  ;;  %v4409_v23 = vadd.f32 %v703_v11, %v4283_v58 }
  0xd8   : > { %v4394_v39 = vadd.f32 %v1660_v29, %v4108_v53  ;;  %v4397_v6 = vadd.f32 %v1661_v47, %v4111_v54  ;;  %v4400_v51 = vadd.f32 %v1658_v50, %v4114_v55  ;;  %v4403_v48 = vadd.f32 %v1659_v32, %v4117_v56  ;;  %v611_v33 = vpop.f32.mrf.mxu0  ;;  %v707_v63 = vpop.f32.mrf.mxu1 }
  0xd9   : > { %3429 = vpow2.f32 %v3265_v38  ;;  %v4412_v53 = vadd.f32 %v611_v33, %v4271_v25  ;;  %v1526_v54 = vpop.permute.xlu1 %1525  ;;  %v1521_v27 = vpop.permute.xlu0 %1520  ;;  %v4415_v55 = vadd.f32 %v707_v63, %v4271_v25  ;;  %v4420_v32 = vadd.f32 %v1651_v42, %v4313_v26 }
  0xda   : > { %6107 = vst [vmem:[#allocation50_spill] sm:$0xff] %v4394_v39  ;;  %6108 = vst [vmem:[#allocation51_spill] sm:$0xff] %v4397_v6  ;;  %3431 = vpow2.f32 %v3297_v36  ;;  %v1664_v56 = vmul.f32 %v4266_v20, %v1526_v54  ;;  %v1665_v29 = vmul.f32 %v4269_v0, %v1526_v54  ;;  %v613_v47 = vpop.f32.mrf.mxu0  ;;  %v709_v50 = vpop.f32.mrf.mxu1  ;;  %v1654_v28 = vmul.f32 %v4266_v20, %v1501_v5 }
  0xdb   : > { %6109 = vst [vmem:[#allocation52_spill] sm:$0xff] %v4400_v51  ;;  %6110 = vst [vmem:[#allocation53_spill] sm:$0xff] %v4403_v48  ;;  %v3266_v11 = vmul.f32 -1.442695, %v4406_v44  ;;  %v3298_v38 = vmul.f32 -1.442695, %v4409_v23  ;;  %v4426_v36 = vadd.f32 %v1656_v41, %v4102_v49  ;;  %v1655_v33 = vmul.f32 %v4269_v0, %v1501_v5 }
  0xdc   : > { %v3267_v63 = vmul.f32 -1.442695, %v4412_v53  ;;  %v3299_v54 = vmul.f32 -1.442695, %v4415_v55  ;;  %v617_v6 = vpop.f32.mrf.mxu0  ;;  %v713_v39 = vpop.f32.mrf.mxu1  ;;  %v4432_v26 = vadd.f32 %v1664_v56, %v4120_v59  ;;  %v4435_v42 = vadd.f32 %v1665_v29, %v4123_v60 }
  0xdd   : > { %6111 = vst [vmem:[#allocation54_spill] sm:$0xff] %v4426_v36  ;;  %3433 = vpow2.f32 %v3266_v11  ;;  %v1662_v48 = vmul.f32 %v4266_v20, %v1521_v27  ;;  %v1663_v49 = vmul.f32 %v4269_v0, %v1521_v27  ;;  %v4440_v5 = vadd.f32 %v613_v47, %v4283_v58  ;;  %v1536_v51 = vpop.permute.xlu1 %1535  ;;  %v1531_v56 = vpop.permute.xlu0 %1530 }
  0xde   : > { %6112 = vst [vmem:[#allocation55_spill] sm:$0xff] %v4432_v26  ;;  %6113 = vst [vmem:[#allocation56_spill] sm:$0xff] %v4435_v42  ;;  %3435 = vpow2.f32 %v3298_v38  ;;  %v4443_v41 = vadd.f32 %v709_v50, %v4283_v58  ;;  %v4449_v59 = vadd.f32 %v617_v6, %v4271_v25  ;;  %v4452_v60 = vadd.f32 %v713_v39, %v4271_v25  ;;  %v619_v50 = vpop.f32.mrf.mxu0 }
  0xdf   : > { %3437 = vpow2.f32 %v3267_v63  ;;  %v4446_v11 = vadd.f32 %v1662_v48, %v4126_v61  ;;  %v4455_v27 = vadd.f32 %v1654_v28, %v4336_v43  ;;  %v4458_v29 = vadd.f32 %v1663_v49, %v4129_v62  ;;  %v715_v43 = vpop.f32.mrf.mxu1 }
  0xe0   : > { %3439 = vpow2.f32 %v3299_v54  ;;  %v3268_v47 = vmul.f32 -1.442695, %v4440_v5  ;;  %v4462_v61 = vadd.f32 %v1655_v33, %v4340_v21  ;;  %v4466_v6 = vmul.f32 %v4274_v31, %v4379_v18  ;;  %v623_v42 = vpop.f32.mrf.mxu0 }
  0xe1   : > { %6114 = vst [vmem:[#allocation57_spill] sm:$0xff] %v4446_v11  ;;  %6115 = vst [vmem:[#allocation58_spill] sm:$0xff] %v4455_v27  ;;  %v3300_v39 = vmul.f32 -1.442695, %v4443_v41  ;;  %v3269_v48 = vmul.f32 -1.442695, %v4449_v59  ;;  %v4472_v28 = vmul.f32 %v4274_v31, %v4382_v24  ;;  %v1668_v38 = vmul.f32 %v4266_v20, %v1536_v51  ;;  %v1546_v26 = vpop.permute.xlu1 %1545 }
  0xe2   : > { %6116 = vst [vmem:[#allocation59_spill] sm:$0xff] %v4458_v29  ;;  %6117 = vst [vmem:[#allocation60_spill] sm:$0xff] %v4462_v61  ;;  %3441 = vpow2.f32 %v3268_v47  ;;  %v3301_v62 = vmul.f32 -1.442695, %v4452_v60  ;;  %v1669_v21 = vmul.f32 %v4269_v0, %v1536_v51  ;;  %v1666_v33 = vmul.f32 %v4266_v20, %v1531_v56  ;;  %v625_v29 = vpop.f32.mrf.mxu0 }
  0xe3   : > { %6118 = vst [vmem:[#allocation61_spill] sm:$0xff] %v4472_v28  ;;  %3443 = vpow2.f32 %v3300_v39  ;;  %v1667_v63 = vmul.f32 %v4269_v0, %v1531_v56  ;;  %v4480_v54 = vadd.f32 %v1668_v38, %v4132_v1  ;;  %v4483_v49 = vadd.f32 %v619_v50, %v4283_v58  ;;  %v1541_v1 = vpop.permute.xlu0 %1540 }
  0xe4   : > { %3445 = vpow2.f32 %v3269_v48  ;;  %v4486_v47 = vadd.f32 %v715_v43, %v4283_v58  ;;  %v4489_v39 = vadd.f32 %v1669_v21, %v4135_v2  ;;  %v4492_v51 = vadd.f32 %v1666_v33, %v4138_v3  ;;  %v719_v33 = vpop.f32.mrf.mxu1 }
  0xe5   : > { %6119 = vst [vmem:[#allocation62_spill] sm:$0xff] %v4480_v54  ;;  %3447 = vpow2.f32 %v3301_v62  ;;  %v4495_v56 = vadd.f32 %v1667_v63, %v4141_v4  ;;  %v4499_v50 = vmul.f32 %v4286_v35, %v4406_v44  ;;  %v4503_v43 = vmul.f32 %v4286_v35, %v4409_v23 }
  0xe6   : > { %6120 = vst [vmem:[#allocation63_spill] sm:$0xff] %v4489_v39  ;;  %6121 = vst [vmem:[#allocation64_spill] sm:$0xff] %v4492_v51  ;;  %v3430_v48 = vpop.eup %3429  ;;  %v4507_v2 = vmul.f32 %v4274_v31, %v4412_v53  ;;  %v3270_v3 = vmul.f32 -1.442695, %v4483_v49  ;;  %v3302_v4 = vmul.f32 -1.442695, %v4486_v47  ;;  %v4512_v21 = vadd.f32 %v623_v42, %v4271_v25  ;;  %v721_v28 = vpop.f32.mrf.mxu1 }
  0xe7   : > { %6122 = vst [vmem:[#allocation65_spill] sm:$0xff] %v4495_v56  ;;  %6123 = vst [vmem:[#allocation66_spill] sm:$0xff] %v4503_v43  ;;  %v3432_v62 = vpop.eup %3431  ;;  %v988_v38 = vadd.f32 1.0, %v3430_v48  ;;  %v1672_v63 = vmul.f32 %v4266_v20, %v1546_v26  ;;  %v1673_v54 = vmul.f32 %v4269_v0, %v1546_v26  ;;  %v1670_v56 = vmul.f32 %v4266_v20, %v1541_v1 }
  0xe8   : > { %v1020_v39 = vadd.f32 1.0, %v3432_v62  ;;  %3449 = vpow2.f32 %v3270_v3  ;;  %v4519_v51 = vmul.f32 %v4274_v31, %v4415_v55  ;;  %v4523_v48 = vmul.f32 %v4286_v35, %v4440_v5 }
  0xe9   : > { %3451 = vrcp.f32 %v988_v38  ;;  %v3271_v42 = vmul.f32 -1.442695, %v4512_v21  ;;  %v4528_v3 = vmul.f32 %v4286_v35, %v4443_v41  ;;  %v4531_v26 = vadd.f32 %v1672_v63, %v4144_v8  ;;  %v1556_v63 = vpop.permute.xlu1 %1555 }
  0xea   : > { %6124 = vst [vmem:[#allocation67_spill] sm:$0xff] %v4519_v51  ;;  %v3434_v11 = vpop.eup %3433  ;;  %3453 = vrcp.f32 %v1020_v39  ;;  %v4534_v62 = vadd.f32 %v1673_v54, %v4147_v7  ;;  %v1671_v36 = vmul.f32 %v4269_v0, %v1541_v1  ;;  %v4538_v43 = vadd.f32 %v1670_v56, %v4150_v9  ;;  %v629_v56 = vpop.f32.mrf.mxu0 }
  0xeb   : > { %6125 = vst [vmem:[#allocation68_spill] sm:$0xff] %v4528_v3  ;;  %6126 = vst [vmem:[#allocation69_spill] sm:$0xff] %v4531_v26  ;;  %v3436_v38 = vpop.eup %3435  ;;  %v989_v45 = vadd.f32 1.0, %v3434_v11  ;;  %3455 = vpow2.f32 %v3302_v4  ;;  %v4542_v3 = vmul.f32 %v4274_v31, %v4449_v59  ;;  %v4545_v8 = vadd.f32 %v719_v33, %v4271_v25 }
  0xec   : > { %6127 = vst [vmem:[#allocation70_spill] sm:$0xff] %v4534_v62  ;;  %6128 = vst [vmem:[#allocation71_spill] sm:$0xff] %v4538_v43  ;;  %v3438_v39 = vpop.eup %3437  ;;  %v1021_v61 = vadd.f32 1.0, %v3436_v38  ;;  %3457 = vpow2.f32 %v3271_v42  ;;  %v4548_v54 = vadd.f32 %v1671_v36, %v4153_v10  ;;  %v4551_v9 = vadd.f32 %v625_v29, %v4283_v58  ;;  %v1551_v43 = vpop.permute.xlu0 %1550 }
  0xed   : > { %6129 = vst [vmem:[#allocation72_spill] sm:$0xff] %v4545_v8  ;;  %v3440_v7 = vpop.eup %3439  ;;  %3459 = vrcp.f32 %v989_v45  ;;  %v990_v11 = vadd.f32 1.0, %v3438_v39  ;;  %v4555_v4 = vmul.f32 %v4274_v31, %v4452_v60  ;;  %v4559_v33 = vmul.f32 %v4286_v35, %v4483_v49 }
  0xee   : > { %6130 = vst [vmem:[#allocation73_spill] sm:$0xff] %v4548_v54  ;;  %6131 = vst [vmem:[#allocation74_spill] sm:$0xff] %v4551_v9  ;;  %3461 = vrcp.f32 %v1021_v61  ;;  %v1022_v1 = vadd.f32 1.0, %v3440_v7  ;;  %v4563_v10 = vmul.f32 %v4286_v35, %v4486_v47  ;;  %v4567_v36 = vmul.f32 %v4274_v31, %v4512_v21  ;;  %v725_v61 = vpop.f32.mrf.mxu1 }
  0xef   : > { %6132 = vst [vmem:[#allocation75_spill] sm:$0xff] %v4555_v4  ;;  %6133 = vst [vmem:[#allocation76_spill] sm:$0xff] %v4559_v33  ;;  %v3442_v45 = vpop.eup %3441  ;;  %3463 = vrcp.f32 %v990_v11  ;;  %v4570_v29 = vadd.f32 %v721_v28, %v4283_v58  ;;  %v3303_v39 = vmul.f32 -1.442695, %v4545_v8  ;;  %v4575_v7 = vmul.f32 %v4274_v31, %v4545_v8 }
  0xf0   : > { %6134 = vst [vmem:[#allocation77_spill] sm:$0xff] %v4563_v10  ;;  %6135 = vst [vmem:[#allocation78_spill] sm:$0xff] %v4567_v36  ;;  %v3444_v42 = vpop.eup %3443  ;;  %v991_v38 = vadd.f32 1.0, %v3442_v45  ;;  %v4578_v11 = vadd.f32 %v629_v56, %v4271_v25  ;;  %3465 = vrcp.f32 %v1022_v1  ;;  %v3272_v26 = vmul.f32 -1.442695, %v4551_v9 }
  0xf1   : > { %6136 = vst [vmem:[#allocation79_spill] sm:$0xff] %v4570_v29  ;;  %6137 = vst [vmem:[#allocation80_spill] sm:$0xff] %v4575_v7  ;;  %v3446_v62 = vpop.eup %3445  ;;  %v1676_v54 = vmul.f32 %v4266_v20, %v1556_v63  ;;  %v1677_v28 = vmul.f32 %v4269_v0, %v1556_v63  ;;  %v1023_v45 = vadd.f32 1.0, %v3444_v42  ;;  %v4585_v36 = vmul.f32 %v4286_v35, %v4551_v9  ;;  %v631_v7 = vpop.f32.mrf.mxu0 }
  0xf2   : > { %6138 = vst [vmem:[#allocation81_spill] sm:$0xff] %v4578_v11  ;;  %v3448_v10 = vpop.eup %3447  ;;  %3467 = vrcp.f32 %v991_v38  ;;  %v992_v4 = vadd.f32 1.0, %v3446_v62  ;;  %v3304_v51 = vmul.f32 -1.442695, %v4570_v29  ;;  %v727_v63 = vpop.f32.mrf.mxu1  ;;  %v4595_v38 = vadd.f32 %v725_v61, %v4271_v25 }
  0xf3   : > { %6139 = vst [vmem:[#allocation82_spill] sm:$0xff] %v4585_v36  ;;  %v1024_v56 = vadd.f32 1.0, %v3448_v10  ;;  %v4589_v1 = vadd.f32 %v1676_v54, %v4156_v13  ;;  %v4592_v27 = vadd.f32 %v1677_v28, %v4159_v14  ;;  %v1674_v62 = vmul.f32 %v4266_v20, %v1551_v43 }
  0xf4   : > { %3469 = vrcp.f32 %v992_v4  ;;  %6142 = vst [vmem:[#allocation85_spill] sm:$0xff] %v4595_v38  ;;  %v1675_v42 = vmul.f32 %v4269_v0, %v1551_v43  ;;  %v4601_v10 = vmul.f32 %v4286_v35, %v4570_v29  ;;  %v3273_v13 = vmul.f32 -1.442695, %v4578_v11 }
  0xf5   : > { %6140 = vst [vmem:[#allocation83_spill] sm:$0xff] %v4589_v1  ;;  %6141 = vst [vmem:[#allocation84_spill] sm:$0xff] %v4592_v27  ;;  %v3450_v36 = vpop.eup %3449  ;;  %3471 = vpow2.f32 %v3303_v39  ;;  %v4606_v14 = vmul.f32 %v4274_v31, %v4578_v11  ;;  %v4609_v61 = vadd.f32 %v1674_v62, %v4162_v15  ;;  %v635_v39 = vpop.f32.mrf.mxu0  ;;  %v3305_v15 = vmul.f32 -1.442695, %v4595_v38 }
  0xf6   : > { %6143 = vst [vmem:[#allocation86_spill] sm:$0xff] %v4601_v10  ;;  %v3452_v54 = vpop.eup %3451  ;;  %3473 = vrcp.f32 %v1023_v45  ;;  %v993_v4 = vadd.f32 1.0, %v3450_v36  ;;  %v4612_v43 = vadd.f32 %v1675_v42, %v4165_v16  ;;  %v4618_v10 = vadd.f32 %v631_v7, %v4283_v58 }
  0xf7   : > { %6144 = vst [vmem:[#allocation87_spill] sm:$0xff] %v4606_v14  ;;  %6145 = vst [vmem:[#allocation88_spill] sm:$0xff] %v4609_v61  ;;  %v4614_v28 = vpop.eup %3453  ;;  %v1774_v27 = vsub.f32 %v4379_v18, %v3452_v54  ;;  %v2230_v1 = vmul.f32 2.0, %v3452_v54  ;;  %3475 = vrcp.f32 %v1024_v56  ;;  %v731_v14 = vpop.f32.mrf.mxu1  ;;  %v4625_v16 = vmul.f32 %v4274_v31, %v4595_v38 }
  0xf8   : > { %6146 = vst [vmem:[#allocation89_spill] sm:$0xff] %v4612_v43  ;;  %6147 = vst [vmem:[#allocation90_spill] sm:$0xff] %v4614_v28  ;;  %v3456_v22 = vpop.eup %3455  ;;  %v1806_v36 = vsub.f32 %v4382_v24, %v4614_v28  ;;  %3477 = vrcp.f32 %v993_v4  ;;  %v4629_v56 = vadd.f32 %v727_v63, %v4283_v58  ;;  %v4632_v7 = vadd.f32 %v635_v39, %v4271_v25  ;;  %v6154_v58 = vld [vmem:[#allocation36_spill] sm:$0xff] }
  0xf9   : > { %6148 = vst [vmem:[#allocation91_spill] sm:$0xff] %v4618_v10  ;;  %6149 = vst [vmem:[#allocation92_spill] sm:$0xff] %v4625_v16  ;;  %v3458_v45 = vpop.eup %3457  ;;  %v1846_v18 = vmul.f32 %v4277_v57, %v1774_v27  ;;  %3479 = vpow2.f32 %v3272_v26  ;;  %v2294_v42 = vmul.f32 %v2230_v1, %v2230_v1  ;;  %v4635_v24 = vmul.f32 %v3452_v54, %v4280_v52 }
  0xfa   : > { %6150 = vst [vmem:[#allocation93_spill] sm:$0xff] %v4629_v56  ;;  %v3460_v62 = vpop.eup %3459  ;;  %3481 = vpow2.f32 %v3304_v51  ;;  %v4638_v4 = vadd.f32 %v731_v14, %v4271_v25  ;;  %v4644_v26 = vmul.f32 -1.442695, %v4618_v10  ;;  %v4648_v63 = vmul.f32 %v4286_v35, %v4618_v10  ;;  %v6155_v10 = vld [vmem:[#allocation38_spill] sm:$0xff] }
  0xfb   : > { %v4640_v43 = vpop.eup %3461  ;;  %v1910_v61 = vadd.f32 %v3452_v54, %v1846_v18  ;;  %v1775_v27 = vsub.f32 %v4406_v44, %v3460_v62  ;;  %v4651_v39 = vmul.f32 %v4277_v57, %v1806_v36  ;;  %v2231_v51 = vmul.f32 2.0, %v3460_v62 }
  0xfc   : > { %6151 = vst [vmem:[#allocation94_spill] sm:$0xff] %v4640_v43  ;;  %6152 = vst [vmem:[#allocation95_spill] sm:$0xff] %v4648_v63  ;;  %v3464_v1 = vpop.eup %3463  ;;  %v1025_v16 = vadd.f32 1.0, %v3456_v22  ;;  %3483 = vpow2.f32 %v3273_v13  ;;  %v4655_v44 = vadd.f32 1.0, %v3458_v45  ;;  %v2366_v38 = vmul.f32 %v6154_v58, %v2294_v42 }
  0xfd   : > { %6153 = vst [vmem:[#allocation96_spill] sm:$0xff] %v4651_v39  ;;  %v1974_v14 = vmul.f32 2.0, %v1910_v61  ;;  %v1847_v25 = vmul.f32 %v4292_v34, %v1775_v27  ;;  %v1776_v54 = vsub.f32 %v4412_v53, %v3464_v1  ;;  %v4657_v18 = vpop.eup %3465  ;;  %v1807_v63 = vsub.f32 %v4409_v23, %v4640_v43 }
  0xfe   : > { %3485 = vpow2.f32 %v3305_v15  ;;  %v4663_v36 = vmul.f32 -1.442695, %v4629_v56  ;;  %v4666_v27 = vmul.f32 %v3460_v62, %v6155_v10  ;;  %v2295_v45 = vmul.f32 %v2231_v51, %v2231_v51 }
  0xff   : > { %v3468_v22 = vpop.eup %3467  ;;  %v3329_v13 = vadd.f32 -0.5, %v1974_v14  ;;  %v1911_v61 = vadd.f32 %v3460_v62, %v1847_v25  ;;  %v1848_v53 = vmul.f32 %v4277_v57, %v1776_v54  ;;  %v2232_v28 = vmul.f32 2.0, %v3464_v1 }
 0x100   : > { %v1777_v39 = vsub.f32 %v4440_v5, %v3468_v22  ;;  %3487 = vrcp.f32 %v1025_v16  ;;  %v4675_v14 = vmul.f32 %v4286_v35, %v4629_v56  ;;  %v4680_v62 = vmul.f32 %v4292_v34, %v1807_v63  ;;  %v6158_v63 = vld [vmem:[#allocation37_spill] sm:$0xff] }
 0x101   : > { %v4670_v42 = vpop.eup %3469  ;;  %v2102_v23 = vadd.f32 %v3329_v13, %v4366_v37  ;;  %v1975_v15 = vmul.f32 2.0, %v1911_v61  ;;  %v1912_v43 = vadd.f32 %v3464_v1, %v1848_v53  ;;  %v4683_v51 = vmul.f32 %v3464_v1, %v4280_v52 }
 0x102   : > { %6156 = vst [vmem:[#allocation36_spill] sm:$0xff] %v4675_v14  ;;  %v4677_v25 = vpop.eup %3471  ;;  %6157 = vst [vmem:[#allocation38_spill] sm:$0xff] %v4680_v62  ;;  %v1808_v5 = vsub.f32 %v4415_v55, %v4657_v18  ;;  %v1849_v37 = vmul.f32 %v4292_v34, %v1777_v39  ;;  %v1778_v53 = vsub.f32 %v4449_v59, %v4670_v42  ;;  %v2233_v62 = vmul.f32 2.0, %v3468_v22  ;;  %v6159_v55 = vld [vmem:[#allocation39_spill] sm:$0xff] }
 0x103   : > { %v4688_v16 = vpop.eup %3473  ;;  %v2166_v54 = vmul.f32 8.0, %v2102_v23  ;;  %v3330_v13 = vadd.f32 -0.5, %v1975_v15  ;;  %v1976_v61 = vmul.f32 2.0, %v1912_v43  ;;  %v2367_v35 = vmul.f32 %v6158_v63, %v2295_v45 }
 0x104   : > { %v4692_v14 = vpop.eup %3475  ;;  %v2296_v1 = vmul.f32 %v2232_v28, %v2232_v28  ;;  %v1913_v56 = vadd.f32 %v3468_v22, %v1849_v37  ;;  %v1850_v15 = vmul.f32 %v4277_v57, %v1778_v53  ;;  %v4702_v29 = vmul.f32 %v4277_v57, %v1808_v5 }
 0x105   : > { %v4695_v46 = vpop.eup %3477  ;;  %v2438_v39 = vmul.f32 %v6159_v55, %v2166_v54  ;;  %v2103_v23 = vadd.f32 %v3330_v13, %v4368_v17  ;;  %v3331_v43 = vadd.f32 -0.5, %v1976_v61  ;;  %v2577_v28 = vmul.f32 %v3468_v22, %v6155_v10  ;;  %v6160_v13 = vld [vmem:[#allocation41_spill] sm:$0xff] }
 0x106   : > { %v3480_v59 = vpop.eup %3479  ;;  %v1977_v45 = vmul.f32 2.0, %v1913_v56  ;;  %v2234_v37 = vmul.f32 2.0, %v4670_v42  ;;  %v1914_v54 = vadd.f32 %v4670_v42, %v1850_v15  ;;  %v2368_v17 = vmul.f32 %v6154_v58, %v2296_v1 }
 0x107   : > { %v3482_v12 = vpop.eup %3481  ;;  %v2502_v11 = vadd.f32 %v2438_v39, %v2366_v38  ;;  %v2167_v8 = vmul.f32 8.0, %v2103_v23  ;;  %v2104_v9 = vadd.f32 %v3331_v43, %v4361_v40  ;;  %v2297_v22 = vmul.f32 %v2233_v62, %v2233_v62  ;;  %v6161_v62 = vld [vmem:[#allocation40_spill] sm:$0xff] }
 0x108   : > { %v3332_v56 = vadd.f32 -0.5, %v1977_v45  ;;  %v1779_v5 = vsub.f32 %v4483_v49, %v4695_v46  ;;  %v1978_v39 = vmul.f32 2.0, %v1914_v54  ;;  %v2298_v43 = vmul.f32 %v2234_v37, %v2234_v37 }
 0x109   : > { %v3484_v38 = vpop.eup %3483  ;;  %v2638_v40 = vadd.f32 %v4635_v24, %v2502_v11  ;;  %v2439_v61 = vmul.f32 %v6160_v13, %v2167_v8  ;;  %v2168_v53 = vmul.f32 8.0, %v2104_v9  ;;  %v2235_v1 = vmul.f32 2.0, %v4695_v46 }
 0x10a   : > { %v2105_v23 = vadd.f32 %v3332_v56, %v4363_v19  ;;  %v1851_v15 = vmul.f32 %v4292_v34, %v1779_v5  ;;  %v3333_v11 = vadd.f32 -0.5, %v1978_v39  ;;  %v2369_v8 = vmul.f32 %v6158_v63, %v2297_v22 }
 0x10b   : > { %v4723_v45 = vpop.eup %3485  ;;  %v2782_v33 = vmul.f32 %v6161_v62, %v2638_v40  ;;  %2910 = vst [vmem:[%s4713_s17] sm:$0xff] %v2638_v40  ;;  %v2503_v49 = vadd.f32 %v2439_v61, %v2367_v35  ;;  %v2440_v31 = vmul.f32 %v6159_v55, %v2168_v53  ;;  %v1809_v9 = vsub.f32 %v4443_v41, %v4688_v16  ;;  %v6162_v41 = vld [vmem:[#allocation42_spill] sm:$0xff] }
 0x10c   : > { %v2169_v19 = vmul.f32 8.0, %v2105_v23  ;;  %v1915_v24 = vadd.f32 %v4695_v46, %v1851_v15  ;;  %v2106_v5 = vadd.f32 %v3333_v11, %v4388_v30  ;;  %v2370_v61 = vmul.f32 %v6154_v58, %v2298_v43 }
 0x10d   : > { %v4739_v35 = vpop.eup %3487  ;;  %v2846_v37 = vadd.f32 %v2782_v33, %v4466_v6  ;;  %v2639_v54 = vadd.f32 %v4666_v27, %v2503_v49  ;;  %v2504_v56 = vadd.f32 %v2440_v31, %v2368_v17  ;;  %v2299_v53 = vmul.f32 %v2235_v1, %v2235_v1 }
 0x10e   : > { %v2441_v40 = vmul.f32 %v6160_v13, %v2169_v19  ;;  %v1979_v22 = vmul.f32 2.0, %v1915_v24  ;;  %v2170_v6 = vmul.f32 8.0, %v2106_v5  ;;  %3489 = vrcp.f32 %v4655_v44 }
 0x10f   : > { %2975 = vst [vmem:[%s4733_s21] sm:$0xff] %v2846_v37  ;;  %v2783_v39 = vmul.f32 %v6162_v41, %v2639_v54  ;;  %2912 = vst.msk [vmem:[%s4713_s17 + $0x8] sm:$0xff] %vm2911_vm2, %v2639_v54  ;;  %v2640_v23 = vadd.f32 %v4683_v51, %v2504_v56  ;;  %v1026_v33 = vadd.f32 1.0, %v4677_v25  ;;  %v995_v27 = vadd.f32 1.0, %v3480_v59 }
 0x110   : > { %v2505_v31 = vadd.f32 %v2441_v40, %v2369_v8  ;;  %v3334_v30 = vadd.f32 -0.5, %v1979_v22  ;;  %v2442_v15 = vmul.f32 %v6159_v55, %v2170_v6  ;;  %v1027_v1 = vadd.f32 1.0, %v3482_v12 }
 0x111   : > { %v2847_v17 = vadd.f32 %v2783_v39, %v4499_v50  ;;  %v2784_v43 = vmul.f32 %v6161_v62, %v2640_v23  ;;  %2913 = vst [vmem:[%s4713_s17 + $0x10] sm:$0xff] %v2640_v23  ;;  %3491 = vrcp.f32 %v1026_v33  ;;  %v996_v44 = vadd.f32 1.0, %v3484_v38  ;;  %v1566_v38 = vpop.permute.xlu1 %1565  ;;  %v6163_v39 = vld [vmem:[#allocation43_spill] sm:$0xff] }
 0x112   : > { %v2641_v51 = vadd.f32 %v2577_v28, %v2505_v31  ;;  %v2107_v49 = vadd.f32 %v3334_v30, %v4420_v32  ;;  %v2506_v59 = vadd.f32 %v2442_v15, %v2370_v61  ;;  %v2578_v50 = vmul.f32 %v4670_v42, %v4280_v52 }
 0x113   : > { %2976 = vst.msk [vmem:[%s4733_s21 + $0x8] sm:$0xff] %vm2911_vm2, %v2847_v17  ;;  %v2848_v25 = vadd.f32 %v2784_v43, %v4507_v2  ;;  %3493 = vrcp.f32 %v995_v27  ;;  %v1881_v12 = vmul.f32 %v4292_v34, %v1809_v9  ;;  %v1810_v32 = vsub.f32 %v4452_v60, %v4692_v14  ;;  %v6164_v43 = vld [vmem:[#allocation33_spill] sm:$0xff] }
 0x114   : > { %v2785_v11 = vmul.f32 %v6162_v41, %v2641_v51  ;;  %2914 = vst.msk [vmem:[%s4713_s17 + $0x18] sm:$0xff] %vm2911_vm2, %v2641_v51  ;;  %v2171_v28 = vmul.f32 8.0, %v2107_v49  ;;  %v2642_v2 = vadd.f32 %v2578_v50, %v2506_v59  ;;  %v2579_v19 = vmul.f32 %v4695_v46, %v6155_v10  ;;  %v1561_v49 = vpop.permute.xlu0 %1560 }
 0x115   : > { %2977 = vst [vmem:[%s4733_s21 + $0x10] sm:$0xff] %v2848_v25  ;;  %3495 = vrcp.f32 %v996_v44  ;;  %v3275_v42 = vmul.f32 -1.442695, %v4632_v7  ;;  %v2371_v24 = vmul.f32 %v6158_v63, %v2299_v53  ;;  %v1811_v37 = vsub.f32 %v4486_v47, %v4739_v35  ;;  %v6166_v44 = vld [vmem:[#allocation76_spill] sm:$0xff] }
 0x116   : > { %v2849_v8 = vadd.f32 %v2785_v11, %v4523_v48  ;;  %v2443_v9 = vmul.f32 %v6160_v13, %v2171_v28  ;;  %3497 = vrcp.f32 %v1027_v1  ;;  %v2786_v60 = vmul.f32 %v6161_v62, %v2642_v2  ;;  %2915 = vst [vmem:[%s4713_s17 + $0x20] sm:$0xff] %v2642_v2  ;;  %v6165_v1 = vld [vmem:[#allocation44_spill] sm:$0xff] }
 0x117   : > { %3499 = vpow2.f32 %v4644_v26  ;;  %v1680_v46 = vmul.f32 %v4266_v20, %v1566_v38  ;;  %v1944_v48 = vadd.f32 %v4657_v18, %v4702_v29  ;;  %v1945_v56 = vadd.f32 %v4688_v16, %v1881_v12 }
 0x118   : > { %2978 = vst.msk [vmem:[%s4733_s21 + $0x18] sm:$0xff] %vm2911_vm2, %v2849_v8  ;;  %v2507_v54 = vadd.f32 %v2443_v9, %v2371_v24  ;;  %3501 = vpow2.f32 %v4663_v36  ;;  %v2850_v5 = vadd.f32 %v2786_v60, %v4542_v3  ;;  %v4790_v47 = vmul.f32 %v4277_v57, %v1810_v32  ;;  %v6167_v9 = vld [vmem:[#allocation74_spill] sm:$0xff] }
 0x119   : > { %3503 = vpow2.f32 %v3275_v42  ;;  %v1681_v26 = vmul.f32 %v4269_v0, %v1566_v38  ;;  %v1028_v61 = vadd.f32 1.0, %v4723_v45  ;;  %v2008_v22 = vmul.f32 2.0, %v1944_v48 }
 0x11a   : > { %v2643_v40 = vadd.f32 %v2579_v19, %v2507_v54  ;;  %v2009_v53 = vmul.f32 2.0, %v1945_v56  ;;  %2979 = vst [vmem:[%s4733_s21 + $0x20] sm:$0xff] %v2850_v5  ;;  %v4796_v36 = vmul.f32 %v4292_v34, %v1811_v37  ;;  %v3307_v29 = vmul.f32 -1.442695, %v4638_v4 }
 0x11b   : > { %v1744_v23 = vadd.f32 %v1680_v46, %v6163_v39  ;;  %v2264_v3 = vmul.f32 2.0, %v4657_v18  ;;  %v3490_v6 = vpop.eup %3489  ;;  %v3363_v30 = vadd.f32 -0.5, %v2008_v22  ;;  %v2265_v45 = vmul.f32 2.0, %v4688_v16 }
 0x11c   : > { %v2787_v31 = vmul.f32 %v6162_v41, %v2643_v40  ;;  %2916 = vst.msk [vmem:[%s4713_s17 + $0x28] sm:$0xff] %vm2911_vm2, %v2643_v40  ;;  %v3364_v33 = vadd.f32 -0.5, %v2009_v53  ;;  %v1780_v27 = vsub.f32 %v4512_v21, %v3490_v6  ;;  %v2236_v17 = vmul.f32 2.0, %v3490_v6 }
 0x11d   : > { %v4808_v15 = vmul.f32 %v6164_v43, %v4632_v7  ;;  %v1745_v51 = vadd.f32 %v1681_v26, %v6165_v1  ;;  %3505 = vrcp.f32 %v1028_v61  ;;  %v2136_v59 = vadd.f32 %v3363_v30, %v1744_v23  ;;  %v6169_v61 = vld [vmem:[#allocation81_spill] sm:$0xff] }
 0x11e   : > { %v2851_v25 = vadd.f32 %v2787_v31, %v6166_v44  ;;  %v2328_v50 = vmul.f32 %v2264_v3, %v2264_v3  ;;  %v4812_v11 = vpop.eup %3491  ;;  %v1852_v12 = vmul.f32 %v4277_v57, %v1780_v27  ;;  %3507 = vpow2.f32 %v3307_v29 }
 0x11f   : > { %v2137_v32 = vadd.f32 %v3364_v33, %v1745_v51  ;;  %v2608_v21 = vmul.f32 %v4657_v18, %v4280_v52  ;;  %v2300_v38 = vmul.f32 %v2236_v17, %v2236_v17  ;;  %v2329_v2 = vmul.f32 %v2265_v45, %v2265_v45  ;;  %v6168_v18 = vld [vmem:[#allocation72_spill] sm:$0xff] }
 0x120   : > { %v3494_v28 = vpop.eup %3493  ;;  %2980 = vst.msk [vmem:[%s4733_s21 + $0x28] sm:$0xff] %vm2911_vm2, %v2851_v25  ;;  %v2609_v19 = vmul.f32 %v4688_v16, %v6155_v10  ;;  %v1678_v42 = vmul.f32 %v4266_v20, %v1561_v49  ;;  %v1916_v8 = vadd.f32 %v3490_v6, %v1852_v12  ;;  %v4823_v24 = vmul.f32 %v3490_v6, %v4280_v52  ;;  %v6170_v25 = vld [vmem:[#allocation48_spill] sm:$0xff] }
 0x121   : > { %v1781_v60 = vsub.f32 %v6167_v9, %v3494_v28  ;;  %v2237_v37 = vmul.f32 2.0, %v3494_v28  ;;  %v1812_v54 = vsub.f32 %v6168_v18, %v4812_v11  ;;  %v2200_v48 = vmul.f32 8.0, %v2136_v59  ;;  %v6183_v18 = vld [vmem:[#allocation85_spill] sm:$0xff] }
 0x122   : > { %v4826_v46 = vpop.eup %3495  ;;  %v2400_v56 = vmul.f32 %v6154_v58, %v2328_v50  ;;  %v1679_v5 = vmul.f32 %v4269_v0, %v1561_v49  ;;  %v1980_v26 = vmul.f32 2.0, %v1916_v8  ;;  %v2201_v53 = vmul.f32 8.0, %v2137_v32 }
 0x123   : > { %v4832_v16 = vpop.eup %3497  ;;  %v1853_v40 = vmul.f32 %v4292_v34, %v1781_v60  ;;  %v1782_v22 = vsub.f32 %v6169_v61, %v4826_v46  ;;  %v2372_v39 = vmul.f32 %v6154_v58, %v2300_v38  ;;  %v2301_v23 = vmul.f32 %v2237_v37, %v2237_v37 }
 0x124   : > { %v3500_v29 = vpop.eup %3499  ;;  %v2238_v3 = vmul.f32 2.0, %v4826_v46  ;;  %v2401_v6 = vmul.f32 %v6158_v63, %v2329_v2  ;;  %v3335_v30 = vadd.f32 -0.5, %v1980_v26  ;;  %v4841_v45 = vmul.f32 %v3494_v28, %v6155_v10  ;;  %v6171_v2 = vld [vmem:[#allocation79_spill] sm:$0xff] }
 0x125   : > { %v3502_v31 = vpop.eup %3501  ;;  %v1917_v33 = vadd.f32 %v3494_v28, %v1853_v40  ;;  %v1854_v27 = vmul.f32 %v4277_v57, %v1782_v22  ;;  %v997_v51 = vadd.f32 1.0, %v3500_v29  ;;  %v2472_v44 = vmul.f32 %v6159_v55, %v2200_v48  ;;  %v6172_v29 = vld [vmem:[#allocation49_spill] sm:$0xff] }
 0x126   : > { %v3504_v17 = vpop.eup %3503  ;;  %v2302_v1 = vmul.f32 %v2238_v3, %v2238_v3  ;;  %v1029_v49 = vadd.f32 1.0, %v3502_v31  ;;  %v2108_v59 = vadd.f32 %v3335_v30, %v6170_v25  ;;  %v2373_v38 = vmul.f32 %v6158_v63, %v2301_v23  ;;  %v6173_v31 = vld [vmem:[#allocation45_spill] sm:$0xff]  ;;  %v6177_v25 = vld [vmem:[#allocation58_spill] sm:$0xff] }
 0x127   : > { %v1981_v50 = vmul.f32 2.0, %v1917_v33  ;;  %v1918_v12 = vadd.f32 %v4826_v46, %v1854_v27  ;;  %v998_v32 = vadd.f32 1.0, %v3504_v17  ;;  %v1813_v28 = vsub.f32 %v6171_v2, %v4832_v16  ;;  %v6174_v17 = vld [vmem:[#allocation46_spill] sm:$0xff] }
 0x128   : > { %3509 = vrcp.f32 %v997_v51  ;;  %v2473_v8 = vmul.f32 %v6160_v13, %v2201_v53  ;;  %v2172_v9 = vmul.f32 8.0, %v2108_v59  ;;  %v2374_v48 = vmul.f32 %v6154_v58, %v2302_v1  ;;  %v6175_v1 = vld [vmem:[#allocation96_spill] sm:$0xff] }
 0x129   : > { %v3336_v60 = vadd.f32 -0.5, %v1981_v50  ;;  %v1982_v37 = vmul.f32 2.0, %v1918_v12  ;;  %3511 = vrcp.f32 %v1029_v49  ;;  %v2536_v26 = vadd.f32 %v2472_v44, %v2400_v56  ;;  %v6176_v49 = vld [vmem:[#allocation90_spill] sm:$0xff] }
 0x12a   : > { %3513 = vrcp.f32 %v998_v32  ;;  %v2537_v40 = vadd.f32 %v2473_v8, %v2401_v6  ;;  %v4852_v61 = vpop.eup %3505  ;;  %v2444_v22 = vmul.f32 %v6159_v55, %v2172_v9  ;;  %v1742_v53 = vadd.f32 %v1678_v42, %v6173_v31  ;;  %v6178_v50 = vld [vmem:[#allocation38_spill] sm:$0xff] }
 0x12b   : > { %v2109_v23 = vadd.f32 %v3336_v60, %v6172_v29  ;;  %v3337_v3 = vadd.f32 -0.5, %v1982_v37  ;;  %v3508_v30 = vpop.eup %3507  ;;  %v2672_v33 = vadd.f32 %v2608_v21, %v2536_v26  ;;  %v1743_v51 = vadd.f32 %v1679_v5, %v6174_v17  ;;  %v6179_v12 = vld [vmem:[#allocation94_spill] sm:$0xff]  ;;  %v6180_v60 = vld [vmem:[#allocation67_spill] sm:$0xff]  ;;  %v6181_v26 = vld [vmem:[#allocation68_spill] sm:$0xff] }
 0x12c   : > { %v2673_v27 = vadd.f32 %v2609_v19, %v2537_v40  ;;  %v1942_v56 = vadd.f32 %v6176_v49, %v6175_v1  ;;  %v2508_v6 = vadd.f32 %v2444_v22, %v2372_v39  ;;  %v1943_v32 = vadd.f32 %v6179_v12, %v6178_v50 }
 0x12d   : > { %v2173_v44 = vmul.f32 8.0, %v2109_v23  ;;  %v2110_v59 = vadd.f32 %v3337_v3, %v6177_v25  ;;  %v2816_v2 = vmul.f32 %v6161_v62, %v2672_v33  ;;  %2945 = vst [vmem:[%s4713_s17 + $0x110] sm:$0xff] %v2672_v33  ;;  %v2262_v19 = vmul.f32 2.0, %v6176_v49 }
 0x12e   : > { %v2817_v42 = vmul.f32 %v6162_v41, %v2673_v27  ;;  %2946 = vst.msk [vmem:[%s4713_s17 + $0x118] sm:$0xff] %vm2911_vm2, %v2673_v27  ;;  %v2006_v21 = vmul.f32 2.0, %v1942_v56  ;;  %v2644_v5 = vadd.f32 %v4823_v24, %v2508_v6  ;;  %v2007_v9 = vmul.f32 2.0, %v1943_v32  ;;  %v6182_v56 = vld [vmem:[#allocation78_spill] sm:$0xff] }
 0x12f   : > { %v2445_v39 = vmul.f32 %v6160_v13, %v2173_v44  ;;  %v2174_v8 = vmul.f32 8.0, %v2110_v59  ;;  %v2880_v37 = vadd.f32 %v2816_v2, %v6180_v60  ;;  %v2263_v29 = vmul.f32 2.0, %v6179_v12  ;;  %v637_v59 = vpop.f32.mrf.mxu0 }
 0x130   : > { %v2881_v40 = vadd.f32 %v2817_v42, %v6181_v26  ;;  %v3361_v22 = vadd.f32 -0.5, %v2006_v21  ;;  %v2788_v23 = vmul.f32 %v6161_v62, %v2644_v5  ;;  %2917 = vst [vmem:[%s4713_s17 + $0x30] sm:$0xff] %v2644_v5  ;;  %v3362_v24 = vadd.f32 -0.5, %v2007_v9 }
 0x131   : > { %v2509_v3 = vadd.f32 %v2445_v39, %v2373_v38  ;;  %v2446_v31 = vmul.f32 %v6159_v55, %v2174_v8  ;;  %v2582_v33 = vmul.f32 %v4826_v46, %v4280_v52  ;;  %v1030_v27 = vadd.f32 1.0, %v3508_v30  ;;  %3009 = vst [vmem:[%s4733_s21 + $0x110] sm:$0xff] %v2880_v37  ;;  %v6186_v8 = vld [vmem:[#allocation82_spill] sm:$0xff] }
 0x132   : > { %v4881_v17 = vmul.f32 %v6164_v43, %v4638_v4  ;;  %3010 = vst.msk [vmem:[%s4733_s21 + $0x118] sm:$0xff] %vm2911_vm2, %v2881_v40  ;;  %v2134_v1 = vadd.f32 %v3361_v22, %v1742_v53  ;;  %v2852_v6 = vadd.f32 %v2788_v23, %v6182_v56  ;;  %v2135_v25 = vadd.f32 %v3362_v24, %v1743_v51  ;;  %v733_v40 = vpop.f32.mrf.mxu1 }
 0x133   : > { %v2645_v38 = vadd.f32 %v4841_v45, %v2509_v3  ;;  %v2510_v44 = vadd.f32 %v2446_v31, %v2374_v48  ;;  %v4892_v46 = vmul.f32 %v4277_v57, %v1812_v54  ;;  %v4895_v30 = vmul.f32 %v4292_v34, %v1813_v28  ;;  %v6184_v28 = vld [vmem:[#allocation91_spill] sm:$0xff] }
 0x134   : > { %v2198_v50 = vmul.f32 8.0, %v2134_v1  ;;  %v2326_v32 = vmul.f32 %v2262_v19, %v2262_v19  ;;  %2981 = vst [vmem:[%s4733_s21 + $0x30] sm:$0xff] %v2852_v6  ;;  %v2199_v48 = vmul.f32 8.0, %v2135_v25  ;;  %v2327_v51 = vmul.f32 %v2263_v29, %v2263_v29  ;;  %v6185_v19 = vld [vmem:[#allocation34_spill] sm:$0xff]  ;;  %v6187_v31 = vld [vmem:[#allocation87_spill] sm:$0xff] }
 0x135   : > { %v3510_v53 = vpop.eup %3509  ;;  %v2789_v2 = vmul.f32 %v6162_v41, %v2645_v38  ;;  %2918 = vst.msk [vmem:[%s4713_s17 + $0x38] sm:$0xff] %vm2911_vm2, %v2645_v38  ;;  %v2646_v45 = vadd.f32 %v2582_v33, %v2510_v44  ;;  %v1814_v54 = vsub.f32 %v6183_v18, %v4852_v61  ;;  %3515 = vrcp.f32 %v1030_v27  ;;  %v6188_v44 = vld [vmem:[#allocation93_spill] sm:$0xff] }
 0x136   : > { %v4901_v42 = vpop.eup %3511  ;;  %v1783_v21 = vsub.f32 %v6184_v28, %v3510_v53  ;;  %v4907_v5 = vadd.f32 %v637_v59, %v6185_v19  ;;  %v2470_v37 = vmul.f32 %v6159_v55, %v2198_v50  ;;  %v2471_v26 = vmul.f32 %v6160_v13, %v2199_v48 }
 0x137   : > { %v3514_v39 = vpop.eup %3513  ;;  %v2853_v9 = vadd.f32 %v2789_v2, %v6186_v8  ;;  %v2790_v60 = vmul.f32 %v6161_v62, %v2646_v45  ;;  %2919 = vst [vmem:[%s4713_s17 + $0x40] sm:$0xff] %v2646_v45  ;;  %v2239_v29 = vmul.f32 2.0, %v3510_v53  ;;  %v2398_v33 = vmul.f32 %v6154_v58, %v2326_v32  ;;  %v641_v2 = vpop.f32.mrf.mxu0 }
 0x138   : > { %v1855_v22 = vmul.f32 %v4292_v34, %v1783_v21  ;;  %v1784_v23 = vsub.f32 %v4632_v7, %v3514_v39  ;;  %v2240_v3 = vmul.f32 2.0, %v3514_v39  ;;  %v2399_v27 = vmul.f32 %v6158_v63, %v2327_v51  ;;  %v737_v45 = vpop.f32.mrf.mxu1 }
 0x139   : > { %2982 = vst.msk [vmem:[%s4733_s21 + $0x38] sm:$0xff] %vm2911_vm2, %v2853_v9  ;;  %v2854_v24 = vadd.f32 %v2790_v60, %v6187_v31  ;;  %v2606_v1 = vmul.f32 %v6176_v49, %v4280_v52  ;;  %v4924_v6 = vmul.f32 %v3510_v53, %v6155_v10  ;;  %v2607_v7 = vmul.f32 %v6179_v12, %v6155_v10  ;;  %v6189_v60 = vld [vmem:[#allocation32_spill] sm:$0xff] }
 0x13a   : > { %v1919_v56 = vadd.f32 %v3510_v53, %v1855_v22  ;;  %v1856_v38 = vmul.f32 %v4277_v57, %v1784_v23  ;;  %v1815_v25 = vsub.f32 %v6188_v44, %v4901_v42  ;;  %v2534_v59 = vadd.f32 %v2470_v37, %v2398_v33 }
 0x13b   : > { %2983 = vst [vmem:[%s4733_s21 + $0x40] sm:$0xff] %v2854_v24  ;;  %v2535_v50 = vadd.f32 %v2471_v26, %v2399_v27  ;;  %v3276_v32 = vmul.f32 -1.442695, %v4907_v5  ;;  %v2303_v53 = vmul.f32 %v2239_v29, %v2239_v29  ;;  %v2304_v51 = vmul.f32 %v2240_v3, %v2240_v3  ;;  %v6190_v3 = vld [vmem:[#allocation60_spill] sm:$0xff] }
 0x13c   : > { %v1983_v49 = vmul.f32 2.0, %v1919_v56  ;;  %v1920_v48 = vadd.f32 %v3514_v39, %v1856_v38  ;;  %v2670_v28 = vadd.f32 %v2606_v1, %v2534_v59  ;;  %v4934_v12 = vadd.f32 %v733_v40, %v6185_v19  ;;  %v1576_v1 = vpop.permute.xlu1 %1575  ;;  %v6192_v38 = vld [vmem:[#allocation66_spill] sm:$0xff] }
 0x13d   : > { %v2671_v21 = vadd.f32 %v2607_v7, %v2535_v50  ;;  %3517 = vpow2.f32 %v3276_v32  ;;  %v4937_v37 = vadd.f32 %v641_v2, %v6189_v60  ;;  %v4940_v26 = vadd.f32 %v737_v45, %v6189_v60  ;;  %v6193_v32 = vld [vmem:[#allocation54_spill] sm:$0xff] }
 0x13e   : > { %v3338_v8 = vadd.f32 -0.5, %v1983_v49  ;;  %v1984_v9 = vmul.f32 2.0, %v1920_v48  ;;  %v2584_v22 = vmul.f32 %v3514_v39, %v4280_v52  ;;  %v2814_v29 = vmul.f32 %v6161_v62, %v2670_v28  ;;  %2943 = vst [vmem:[%s4713_s17 + $0x100] sm:$0xff] %v2670_v28  ;;  %v6191_v39 = vld [vmem:[#allocation61_spill] sm:$0xff] }
 0x13f   : > { %v2815_v23 = vmul.f32 %v6162_v41, %v2671_v21  ;;  %2944 = vst.msk [vmem:[%s4713_s17 + $0x108] sm:$0xff] %vm2911_vm2, %v2671_v21  ;;  %v3308_v40 = vmul.f32 -1.442695, %v4934_v12  ;;  %v2375_v24 = vmul.f32 %v6158_v63, %v2303_v53  ;;  %v3277_v27 = vmul.f32 -1.442695, %v4937_v37 }
 0x140   : > { %v2111_v31 = vadd.f32 %v3338_v8, %v6190_v3  ;;  %v3339_v33 = vadd.f32 -0.5, %v1984_v9  ;;  %v2878_v56 = vadd.f32 %v2814_v29, %v6191_v39  ;;  %v3309_v59 = vmul.f32 -1.442695, %v4940_v26  ;;  %v6194_v29 = vld [vmem:[#allocation2_spill] sm:$0xff] }
 0x141   : > { %v2879_v7 = vadd.f32 %v2815_v23, %v6192_v38  ;;  %3519 = vpow2.f32 %v3308_v40  ;;  %v2376_v45 = vmul.f32 %v6154_v58, %v2304_v51  ;;  %v1684_v53 = vmul.f32 %v4266_v20, %v1576_v1  ;;  %v6195_v40 = vld [vmem:[#allocation3_spill] sm:$0xff] }
 0x142   : > { %v2175_v50 = vmul.f32 8.0, %v2111_v31  ;;  %v2112_v2 = vadd.f32 %v3339_v33, %v6193_v32  ;;  %3521 = vpow2.f32 %v3277_v27  ;;  %v4957_v49 = vpop.eup %3515  ;;  %3007 = vst [vmem:[%s4733_s21 + $0x100] sm:$0xff] %v2878_v56  ;;  %v1685_v48 = vmul.f32 %v4269_v0, %v1576_v1  ;;  %v1571_v56 = vpop.permute.xlu0 %1570 }
 0x143   : > { %3008 = vst.msk [vmem:[%s4733_s21 + $0x108] sm:$0xff] %vm2911_vm2, %v2879_v7  ;;  %3523 = vpow2.f32 %v3309_v59  ;;  %v1948_v28 = vadd.f32 %v4812_v11, %v4892_v46  ;;  %v1949_v51 = vadd.f32 %v4832_v16, %v4895_v30  ;;  %v2268_v9 = vmul.f32 2.0, %v4812_v11 }
 0x144   : > { %v2447_v21 = vmul.f32 %v6160_v13, %v2175_v50  ;;  %v2176_v8 = vmul.f32 8.0, %v2112_v2  ;;  %v1748_v23 = vadd.f32 %v1684_v53, %v6194_v29  ;;  %v1749_v3 = vadd.f32 %v1685_v48, %v6195_v40  ;;  %v6196_v29 = vld [vmem:[#allocation4_spill] sm:$0xff]  ;;  %v6197_v40 = vld [vmem:[#allocation5_spill] sm:$0xff] }
 0x145   : > { %v2012_v31 = vmul.f32 2.0, %v1948_v28  ;;  %v2269_v33 = vmul.f32 2.0, %v4832_v16  ;;  %v2013_v39 = vmul.f32 2.0, %v1949_v51  ;;  %v2332_v46 = vmul.f32 %v2268_v9, %v2268_v9 }
 0x146   : > { %v2511_v27 = vadd.f32 %v2447_v21, %v2375_v24  ;;  %v2448_v1 = vmul.f32 %v6159_v55, %v2176_v8  ;;  %v2612_v30 = vmul.f32 %v4812_v11, %v4280_v52  ;;  %v2613_v59 = vmul.f32 %v4832_v16, %v6155_v10 }
 0x147   : > { %v3367_v38 = vadd.f32 -0.5, %v2012_v31  ;;  %v2333_v7 = vmul.f32 %v2269_v33, %v2269_v33  ;;  %v3368_v2 = vadd.f32 -0.5, %v2013_v39  ;;  %v2404_v24 = vmul.f32 %v6154_v58, %v2332_v46  ;;  %v6198_v33 = vld [vmem:[#allocation95_spill] sm:$0xff] }
 0x148   : > { %v2647_v50 = vadd.f32 %v4924_v6, %v2511_v27  ;;  %v2512_v32 = vadd.f32 %v2448_v1, %v2376_v45  ;;  %v1682_v28 = vmul.f32 %v4266_v20, %v1571_v56  ;;  %v1683_v21 = vmul.f32 %v4269_v0, %v1571_v56 }
 0x149   : > { %v2140_v53 = vadd.f32 %v3367_v38, %v1748_v23  ;;  %v2405_v48 = vmul.f32 %v6158_v63, %v2333_v7  ;;  %v2141_v51 = vadd.f32 %v3368_v2, %v1749_v3  ;;  %v1946_v6 = vadd.f32 %v4692_v14, %v4790_v47 }
 0x14a   : > { %v3518_v8 = vpop.eup %3517  ;;  %v2791_v11 = vmul.f32 %v6162_v41, %v2647_v50  ;;  %2920 = vst.msk [vmem:[%s4713_s17 + $0x48] sm:$0xff] %vm2911_vm2, %v2647_v50  ;;  %v2648_v16 = vadd.f32 %v2584_v22, %v2512_v32  ;;  %v1746_v23 = vadd.f32 %v1682_v28, %v6196_v29  ;;  %v1747_v31 = vadd.f32 %v1683_v21, %v6197_v40 }
 0x14b   : > { %v999_v45 = vadd.f32 1.0, %v3518_v8  ;;  %v2204_v9 = vmul.f32 8.0, %v2140_v53  ;;  %v2205_v39 = vmul.f32 8.0, %v2141_v51  ;;  %v1947_v22 = vadd.f32 %v4739_v35, %v4796_v36  ;;  %v643_v8 = vpop.f32.mrf.mxu0 }
 0x14c   : > { %v2855_v27 = vadd.f32 %v2791_v11, %v6198_v33  ;;  %v2792_v1 = vmul.f32 %v6161_v62, %v2648_v16  ;;  %2921 = vst [vmem:[%s4713_s17 + $0x50] sm:$0xff] %v2648_v16  ;;  %v2010_v46 = vmul.f32 2.0, %v1946_v6  ;;  %v2266_v47 = vmul.f32 2.0, %v4692_v14  ;;  %v739_v11 = vpop.f32.mrf.mxu1 }
 0x14d   : > { %3525 = vrcp.f32 %v999_v45  ;;  %v2476_v3 = vmul.f32 %v6159_v55, %v2204_v9  ;;  %v2477_v7 = vmul.f32 %v6160_v13, %v2205_v39  ;;  %v2011_v50 = vmul.f32 2.0, %v1947_v22 }
 0x14e   : > { %v3520_v56 = vpop.eup %3519  ;;  %2984 = vst.msk [vmem:[%s4733_s21 + $0x48] sm:$0xff] %vm2911_vm2, %v2855_v27  ;;  %v2856_v38 = vadd.f32 %v2792_v1, %v4808_v15  ;;  %v2267_v32 = vmul.f32 2.0, %v4739_v35  ;;  %v3365_v28 = vadd.f32 -0.5, %v2010_v46  ;;  %v2330_v21 = vmul.f32 %v2266_v47, %v2266_v47  ;;  %v6200_v47 = vld [vmem:[#allocation86_spill] sm:$0xff] }
 0x14f   : > { %v3522_v2 = vpop.eup %3521  ;;  %v1031_v53 = vadd.f32 1.0, %v3520_v56  ;;  %v2540_v36 = vadd.f32 %v2476_v3, %v2404_v24  ;;  %v2541_v6 = vadd.f32 %v2477_v7, %v2405_v48  ;;  %v3366_v45 = vadd.f32 -0.5, %v2011_v50 }
 0x150   : > { %v3524_v16 = vpop.eup %3523  ;;  %2985 = vst [vmem:[%s4733_s21 + $0x50] sm:$0xff] %v2856_v38  ;;  %v1000_v51 = vadd.f32 1.0, %v3522_v2  ;;  %v2331_v9 = vmul.f32 %v2267_v32, %v2267_v32  ;;  %v5007_v15 = vmul.f32 %v4277_v57, %v1814_v54  ;;  %v2138_v29 = vadd.f32 %v3365_v28, %v1746_v23  ;;  %v743_v23 = vpop.f32.mrf.mxu1 }
 0x151   : > { %3527 = vrcp.f32 %v1031_v53  ;;  %v2676_v24 = vadd.f32 %v2612_v30, %v2540_v36  ;;  %v5013_v40 = vmul.f32 %v4292_v34, %v1815_v25  ;;  %v2677_v48 = vadd.f32 %v2613_v59, %v2541_v6  ;;  %v647_v30 = vpop.f32.mrf.mxu0  ;;  %v1586_v28 = vpop.permute.xlu1 %1585 }
 0x152   : > { %3529 = vrcp.f32 %v1000_v51  ;;  %v2139_v33 = vadd.f32 %v3366_v45, %v1747_v31  ;;  %v1816_v27 = vsub.f32 %v4638_v4, %v4957_v49  ;;  %v1032_v18 = vadd.f32 1.0, %v3524_v16  ;;  %v6199_v31 = vld [vmem:[#allocation80_spill] sm:$0xff]  ;;  %v6201_v45 = vld [vmem:[#allocation35_spill] sm:$0xff] }
 0x153   : > { %v2820_v54 = vmul.f32 %v6161_v62, %v2676_v24  ;;  %2949 = vst [vmem:[%s4713_s17 + $0x130] sm:$0xff] %v2676_v24  ;;  %v2202_v1 = vmul.f32 8.0, %v2138_v29  ;;  %v2821_v39 = vmul.f32 %v6162_v41, %v2677_v48  ;;  %2950 = vst.msk [vmem:[%s4713_s17 + $0x138] sm:$0xff] %vm2911_vm2, %v2677_v48  ;;  %v2402_v25 = vmul.f32 %v6154_v58, %v2330_v21 }
 0x154   : > { %v2203_v44 = vmul.f32 8.0, %v2139_v33  ;;  %v2403_v59 = vmul.f32 %v6158_v63, %v2331_v9  ;;  %v5027_v3 = vadd.f32 %v643_v8, %v6185_v19  ;;  %v5030_v46 = vadd.f32 %v739_v11, %v6185_v19 }
 0x155   : > { %v2884_v4 = vadd.f32 %v2820_v54, %v6199_v31  ;;  %v2474_v22 = vmul.f32 %v6159_v55, %v2202_v1  ;;  %v2885_v56 = vadd.f32 %v2821_v39, %v6200_v47  ;;  %v5035_v7 = vadd.f32 %v647_v30, %v6189_v60  ;;  %v6204_v31 = vld [vmem:[#allocation6_spill] sm:$0xff] }
 0x156   : > { %v2475_v38 = vmul.f32 %v6160_v13, %v2203_v44  ;;  %v5038_v50 = vadd.f32 %v743_v23, %v6189_v60  ;;  %v2610_v2 = vmul.f32 %v4692_v14, %v4280_v52  ;;  %v3278_v53 = vmul.f32 -1.442695, %v5027_v3  ;;  %v6202_v23 = vld [vmem:[#allocation75_spill] sm:$0xff] }
 0x157   : > { %3013 = vst [vmem:[%s4733_s21 + $0x130] sm:$0xff] %v2884_v4  ;;  %v2538_v32 = vadd.f32 %v2474_v22, %v2402_v25  ;;  %v3310_v36 = vmul.f32 -1.442695, %v5030_v46  ;;  %3531 = vrcp.f32 %v1032_v18  ;;  %3014 = vst.msk [vmem:[%s4733_s21 + $0x138] sm:$0xff] %vm2911_vm2, %v2885_v56  ;;  %v2611_v8 = vmul.f32 %v4739_v35, %v6155_v10  ;;  %v6203_v25 = vld [vmem:[#allocation77_spill] sm:$0xff] }
 0x158   : > { %v2539_v21 = vadd.f32 %v2475_v38, %v2403_v59  ;;  %v3279_v11 = vmul.f32 -1.442695, %v5035_v7  ;;  %v1888_v16 = vmul.f32 %v4277_v57, %v1816_v27  ;;  %3533 = vpow2.f32 %v3278_v53 }
 0x159   : > { %v2674_v51 = vadd.f32 %v2610_v2, %v2538_v32  ;;  %v3311_v14 = vmul.f32 -1.442695, %v5038_v50  ;;  %v5054_v9 = vmul.f32 %v6201_v45, %v4907_v5  ;;  %3535 = vpow2.f32 %v3310_v36  ;;  %v6205_v2 = vld [vmem:[#allocation7_spill] sm:$0xff] }
 0x15a   : > { %v3526_v6 = vpop.eup %3525  ;;  %v2675_v24 = vadd.f32 %v2611_v8, %v2539_v21  ;;  %v1688_v29 = vmul.f32 %v4266_v20, %v1586_v28  ;;  %v1689_v27 = vmul.f32 %v4269_v0, %v1586_v28  ;;  %v5066_v54 = vmul.f32 %v6201_v45, %v4934_v12 }
 0x15b   : > { %v1785_v35 = vsub.f32 %v4907_v5, %v3526_v6  ;;  %v2241_v48 = vmul.f32 2.0, %v3526_v6  ;;  %v2818_v33 = vmul.f32 %v6161_v62, %v2674_v51  ;;  %2947 = vst [vmem:[%s4713_s17 + $0x120] sm:$0xff] %v2674_v51  ;;  %v5062_v18 = vmul.f32 %v3526_v6, %v6155_v10 }
 0x15c   : > { %v2819_v1 = vmul.f32 %v6162_v41, %v2675_v24  ;;  %2948 = vst.msk [vmem:[%s4713_s17 + $0x128] sm:$0xff] %vm2911_vm2, %v2675_v24  ;;  %3537 = vpow2.f32 %v3279_v11  ;;  %v1752_v4 = vadd.f32 %v1688_v29, %v6204_v31  ;;  %v1952_v22 = vadd.f32 %v4957_v49, %v1888_v16 }
 0x15d   : > { %v1857_v5 = vmul.f32 %v4292_v34, %v1785_v35  ;;  %v2305_v30 = vmul.f32 %v2241_v48, %v2241_v48  ;;  %v2882_v39 = vadd.f32 %v2818_v33, %v6202_v23  ;;  %3539 = vpow2.f32 %v3311_v14  ;;  %v1581_v48 = vpop.permute.xlu0 %1580 }
 0x15e   : > { %v3528_v44 = vpop.eup %3527  ;;  %v2883_v59 = vadd.f32 %v2819_v1, %v6203_v25  ;;  %v2272_v47 = vmul.f32 2.0, %v4957_v49  ;;  %v1753_v53 = vadd.f32 %v1689_v27, %v6205_v2  ;;  %v2016_v8 = vmul.f32 2.0, %v1952_v22 }
 0x15f   : > { %v3530_v56 = vpop.eup %3529  ;;  %v1921_v38 = vadd.f32 %v3526_v6, %v1857_v5  ;;  %v1817_v32 = vsub.f32 %v4934_v12, %v3528_v44  ;;  %3011 = vst [vmem:[%s4733_s21 + $0x120] sm:$0xff] %v2882_v39  ;;  %v2273_v36 = vmul.f32 2.0, %v3528_v44  ;;  %v2616_v11 = vmul.f32 %v4957_v49, %v4280_v52 }
 0x160   : > { %v1786_v28 = vsub.f32 %v4937_v37, %v3530_v56  ;;  %v2242_v21 = vmul.f32 2.0, %v3530_v56  ;;  %3012 = vst.msk [vmem:[%s4733_s21 + $0x128] sm:$0xff] %vm2911_vm2, %v2883_v59  ;;  %v2377_v51 = vmul.f32 %v6158_v63, %v2305_v30  ;;  %v2336_v6 = vmul.f32 %v2272_v47, %v2272_v47  ;;  %v6206_v59 = vld [vmem:[#allocation47_spill] sm:$0xff] }
 0x161   : > { %v1985_v16 = vmul.f32 2.0, %v1921_v38  ;;  %v1889_v14 = vmul.f32 %v4292_v34, %v1817_v32  ;;  %v3371_v29 = vadd.f32 -0.5, %v2016_v8  ;;  %v2337_v35 = vmul.f32 %v2273_v36, %v2273_v36 }
 0x162   : > { %v1858_v12 = vmul.f32 %v4277_v57, %v1786_v28  ;;  %v2306_v24 = vmul.f32 %v2242_v21, %v2242_v21  ;;  %v5089_v27 = vmul.f32 %v3530_v56, %v4280_v52  ;;  %v2408_v5 = vmul.f32 %v6154_v58, %v2336_v6 }
 0x163   : > { %v3340_v33 = vadd.f32 -0.5, %v1985_v16  ;;  %v1953_v1 = vadd.f32 %v3528_v44, %v1889_v14  ;;  %v2144_v30 = vadd.f32 %v3371_v29, %v1752_v4  ;;  %v2409_v39 = vmul.f32 %v6158_v63, %v2337_v35  ;;  %v6207_v14 = vld [vmem:[#allocation8_spill] sm:$0xff]  ;;  %v6208_v29 = vld [vmem:[#allocation9_spill] sm:$0xff] }
 0x164   : > { %v1922_v49 = vadd.f32 %v3530_v56, %v1858_v12  ;;  %v2378_v23 = vmul.f32 %v6154_v58, %v2306_v24  ;;  %v5094_v25 = vpop.eup %3531  ;;  %v2617_v47 = vmul.f32 %v3528_v44, %v6155_v10  ;;  %v1686_v38 = vmul.f32 %v4266_v20, %v1581_v48 }
 0x165   : > { %v2113_v31 = vadd.f32 %v3340_v33, %v6206_v59  ;;  %v2017_v22 = vmul.f32 2.0, %v1953_v1  ;;  %v3534_v32 = vpop.eup %3533  ;;  %v2208_v36 = vmul.f32 8.0, %v2144_v30  ;;  %v1687_v28 = vmul.f32 %v4269_v0, %v1581_v48  ;;  %v6209_v30 = vld [vmem:[#allocation52_spill] sm:$0xff] }
 0x166   : > { %v1986_v2 = vmul.f32 2.0, %v1922_v49  ;;  %v1950_v56 = vadd.f32 %v4852_v61, %v5007_v15  ;;  %v3536_v4 = vpop.eup %3535  ;;  %v1001_v8 = vadd.f32 1.0, %v3534_v32  ;;  %v1750_v6 = vadd.f32 %v1686_v38, %v6207_v14 }
 0x167   : > { %v2177_v21 = vmul.f32 8.0, %v2113_v31  ;;  %v3372_v16 = vadd.f32 -0.5, %v2017_v22  ;;  %v1033_v24 = vadd.f32 1.0, %v3536_v4  ;;  %v2480_v44 = vmul.f32 %v6159_v55, %v2208_v36 }
 0x168   : > { %v3341_v12 = vadd.f32 -0.5, %v1986_v2  ;;  %v1751_v35 = vadd.f32 %v1687_v28, %v6208_v29  ;;  %3541 = vrcp.f32 %v1001_v8  ;;  %v1951_v15 = vadd.f32 %v4901_v42, %v5013_v40 }
 0x169   : > { %v3538_v33 = vpop.eup %3537  ;;  %v2449_v1 = vmul.f32 %v6160_v13, %v2177_v21  ;;  %v2145_v48 = vadd.f32 %v3372_v16, %v1753_v53  ;;  %3543 = vrcp.f32 %v1033_v24  ;;  %v2544_v22 = vadd.f32 %v2480_v44, %v2408_v5 }
 0x16a   : > { %v3540_v49 = vpop.eup %3539  ;;  %v2114_v59 = vadd.f32 %v3341_v12, %v6209_v30  ;;  %v1002_v31 = vadd.f32 1.0, %v3538_v33  ;;  %v2014_v36 = vmul.f32 2.0, %v1950_v56  ;;  %v2015_v21 = vmul.f32 2.0, %v1951_v15  ;;  %v649_v30 = vpop.f32.mrf.mxu0 }
 0x16b   : > { %v2513_v38 = vadd.f32 %v2449_v1, %v2377_v51  ;;  %v1034_v32 = vadd.f32 1.0, %v3540_v49  ;;  %v2209_v2 = vmul.f32 8.0, %v2145_v48  ;;  %v2680_v4 = vadd.f32 %v2616_v11, %v2544_v22 }
 0x16c   : > { %v2178_v28 = vmul.f32 8.0, %v2114_v59  ;;  %3545 = vrcp.f32 %v1002_v31  ;;  %v3369_v8 = vadd.f32 -0.5, %v2014_v36  ;;  %v3370_v51 = vadd.f32 -0.5, %v2015_v21  ;;  %v745_v59 = vpop.f32.mrf.mxu1 }
 0x16d   : > { %v2649_v53 = vadd.f32 %v5062_v18, %v2513_v38  ;;  %3547 = vrcp.f32 %v1034_v32  ;;  %v2481_v40 = vmul.f32 %v6160_v13, %v2209_v2  ;;  %v2824_v14 = vmul.f32 %v6161_v62, %v2680_v4  ;;  %2953 = vst [vmem:[%s4713_s17 + $0x150] sm:$0xff] %v2680_v4 }
 0x16e   : > { %v2450_v16 = vmul.f32 %v6159_v55, %v2178_v28  ;;  %v2270_v5 = vmul.f32 2.0, %v4852_v61  ;;  %v2142_v12 = vadd.f32 %v3369_v8, %v1750_v6  ;;  %v2271_v18 = vmul.f32 2.0, %v4901_v42 }
 0x16f   : > { %v2793_v56 = vmul.f32 %v6162_v41, %v2649_v53  ;;  %2922 = vst.msk [vmem:[%s4713_s17 + $0x58] sm:$0xff] %vm2911_vm2, %v2649_v53  ;;  %v2545_v11 = vadd.f32 %v2481_v40, %v2409_v39  ;;  %v2888_v44 = vadd.f32 %v2824_v14, %v4881_v17  ;;  %v2143_v29 = vadd.f32 %v3370_v51, %v1751_v35 }
 0x170   : > { %v2514_v24 = vadd.f32 %v2450_v16, %v2378_v23  ;;  %v2334_v33 = vmul.f32 %v2270_v5, %v2270_v5  ;;  %v2206_v15 = vmul.f32 8.0, %v2142_v12  ;;  %v2335_v49 = vmul.f32 %v2271_v18, %v2271_v18  ;;  %v653_v16 = vpop.f32.mrf.mxu0 }
 0x171   : > { %v2857_v1 = vadd.f32 %v2793_v56, %v5054_v9  ;;  %v2681_v48 = vadd.f32 %v2617_v47, %v2545_v11  ;;  %v2722_v6 = vmul.f32 %v6164_v43, %v4937_v37  ;;  %v5126_v23 = vmul.f32 %v6201_v45, %v5027_v3  ;;  %3017 = vst [vmem:[%s4733_s21 + $0x150] sm:$0xff] %v2888_v44  ;;  %v749_v56 = vpop.f32.mrf.mxu1 }
 0x172   : > { %v2650_v39 = vadd.f32 %v5089_v27, %v2514_v24  ;;  %v2207_v17 = vmul.f32 8.0, %v2143_v29  ;;  %v2406_v47 = vmul.f32 %v6154_v58, %v2334_v33  ;;  %v2407_v35 = vmul.f32 %v6158_v63, %v2335_v49 }
 0x173   : > { %2986 = vst.msk [vmem:[%s4733_s21 + $0x58] sm:$0xff] %vm2911_vm2, %v2857_v1  ;;  %v2825_v9 = vmul.f32 %v6162_v41, %v2681_v48  ;;  %2954 = vst.msk [vmem:[%s4713_s17 + $0x158] sm:$0xff] %vm2911_vm2, %v2681_v48  ;;  %v2478_v27 = vmul.f32 %v6159_v55, %v2206_v15  ;;  %v5141_v22 = vadd.f32 %v649_v30, %v6185_v19 }
 0x174   : > { %v2794_v37 = vmul.f32 %v6161_v62, %v2650_v39  ;;  %2923 = vst [vmem:[%s4713_s17 + $0x60] sm:$0xff] %v2650_v39  ;;  %v2479_v31 = vmul.f32 %v6160_v13, %v2207_v17  ;;  %v5144_v38 = vadd.f32 %v745_v59, %v6185_v19  ;;  %v1818_v32 = vsub.f32 %v4940_v26, %v5094_v25 }
 0x175   : > { %v2889_v2 = vadd.f32 %v2825_v9, %v5066_v54  ;;  %v2542_v36 = vadd.f32 %v2478_v27, %v2406_v47  ;;  %v2614_v28 = vmul.f32 %v4852_v61, %v4280_v52  ;;  %v3542_v4 = vpop.eup %3541  ;;  %v2615_v40 = vmul.f32 %v4901_v42, %v6155_v10  ;;  %v6210_v47 = vld [vmem:[#allocation92_spill] sm:$0xff] }
 0x176   : > { %v2858_v21 = vadd.f32 %v2794_v37, %v2722_v6  ;;  %v2543_v53 = vadd.f32 %v2479_v31, %v2407_v35  ;;  %v3280_v8 = vmul.f32 -1.442695, %v5141_v22  ;;  %v5154_v14 = vpop.eup %3543  ;;  %v1787_v51 = vsub.f32 %v5027_v3, %v3542_v4  ;;  %v6211_v31 = vld [vmem:[#allocation36_spill] sm:$0xff] }
 0x177   : > { %v2243_v54 = vmul.f32 2.0, %v3542_v4  ;;  %v5159_v5 = vmul.f32 %v6164_v43, %v5035_v7  ;;  %3018 = vst.msk [vmem:[%s4733_s21 + $0x158] sm:$0xff] %vm2911_vm2, %v2889_v2  ;;  %v2678_v61 = vadd.f32 %v2614_v28, %v2542_v36  ;;  %v5166_v42 = vmul.f32 %v6164_v43, %v5038_v50 }
 0x178   : > { %2987 = vst [vmem:[%s4733_s21 + $0x60] sm:$0xff] %v2858_v21  ;;  %v2679_v11 = vadd.f32 %v2615_v40, %v2543_v53  ;;  %3549 = vpow2.f32 %v3280_v8  ;;  %v3312_v12 = vmul.f32 -1.442695, %v5144_v38  ;;  %v1890_v18 = vmul.f32 %v4277_v57, %v1818_v32 }
 0x179   : > { %v3546_v3 = vpop.eup %3545  ;;  %v1859_v24 = vmul.f32 %v4292_v34, %v1787_v51  ;;  %v2822_v44 = vmul.f32 %v6161_v62, %v2678_v61  ;;  %2951 = vst [vmem:[%s4713_s17 + $0x140] sm:$0xff] %v2678_v61  ;;  %v5174_v29 = vadd.f32 %v653_v16, %v6189_v60  ;;  %v1819_v1 = vsub.f32 %v5030_v46, %v5154_v14  ;;  %v1591_v16 = vpop.permute.xlu0 %1590  ;;  %v6212_v61 = vld [vmem:[#allocation53_spill] sm:$0xff] }
 0x17a   : > { %v3548_v33 = vpop.eup %3547  ;;  %v1788_v48 = vsub.f32 %v5035_v7, %v3546_v3  ;;  %v2244_v15 = vmul.f32 2.0, %v3546_v3  ;;  %2952 = vst.msk [vmem:[%s4713_s17 + $0x148] sm:$0xff] %vm2911_vm2, %v2679_v11  ;;  %v5182_v49 = vadd.f32 %v749_v56, %v6189_v60  ;;  %v2307_v59 = vmul.f32 %v2243_v54, %v2243_v54  ;;  %v5188_v7 = vpop.permute.xlu1 %1595 }
 0x17b   : > { %v1923_v30 = vadd.f32 %v3542_v4, %v1859_v24  ;;  %v1820_v39 = vsub.f32 %v5038_v50, %v3548_v33  ;;  %v2823_v6 = vmul.f32 %v6162_v41, %v2679_v11  ;;  %v2886_v35 = vadd.f32 %v2822_v44, %v6210_v47 }
 0x17c   : > { %v1860_v17 = vmul.f32 %v4277_v57, %v1788_v48  ;;  %v2308_v9 = vmul.f32 %v2244_v15, %v2244_v15  ;;  %3551 = vpow2.f32 %v3312_v12  ;;  %v3281_v2 = vmul.f32 -1.442695, %v5174_v29  ;;  %v6213_v12 = vld [vmem:[#allocation10_spill] sm:$0xff] }
 0x17d   : > { %v1987_v27 = vmul.f32 2.0, %v1923_v30  ;;  %v1892_v37 = vmul.f32 %v4277_v57, %v1820_v39  ;;  %v2887_v32 = vadd.f32 %v2823_v6, %v6211_v31  ;;  %v2587_v50 = vmul.f32 %v3542_v4, %v6155_v10  ;;  %3015 = vst [vmem:[%s4733_s21 + $0x140] sm:$0xff] %v2886_v35 }
 0x17e   : > { %v1891_v36 = vmul.f32 %v4292_v34, %v1819_v1  ;;  %v1924_v28 = vadd.f32 %v3546_v3, %v1860_v17  ;;  %v3313_v21 = vmul.f32 -1.442695, %v5182_v49  ;;  %v2588_v40 = vmul.f32 %v3546_v3, %v4280_v52  ;;  %v6214_v17 = vld [vmem:[#allocation50_spill] sm:$0xff] }
 0x17f   : > { %v3342_v53 = vadd.f32 -0.5, %v1987_v27  ;;  %3016 = vst.msk [vmem:[%s4733_s21 + $0x148] sm:$0xff] %vm2911_vm2, %v2887_v32  ;;  %3553 = vpow2.f32 %v3281_v2  ;;  %v1692_v8 = vmul.f32 %v4266_v20, %v5188_v7  ;;  %v2379_v51 = vmul.f32 %v6158_v63, %v2307_v59  ;;  %v6215_v27 = vld [vmem:[#allocation12_spill] sm:$0xff]  ;;  %v6216_v2 = vld [vmem:[#allocation13_spill] sm:$0xff] }
 0x180   : > { %v1988_v54 = vmul.f32 2.0, %v1924_v28  ;;  %3555 = vpow2.f32 %v3313_v21  ;;  %v1956_v4 = vadd.f32 %v3548_v33, %v1892_v37  ;;  %v2380_v11 = vmul.f32 %v6154_v58, %v2308_v9 }
 0x181   : > { %v2115_v56 = vadd.f32 %v3342_v53, %v6212_v61  ;;  %v1756_v24 = vadd.f32 %v1692_v8, %v6213_v12  ;;  %v2276_v44 = vmul.f32 2.0, %v3548_v33  ;;  %v2620_v48 = vmul.f32 %v3548_v33, %v4280_v52 }
 0x182   : > { %v3343_v3 = vadd.f32 -0.5, %v1988_v54  ;;  %v2020_v1 = vmul.f32 2.0, %v1956_v4  ;;  %v1690_v15 = vmul.f32 %v4266_v20, %v1591_v16  ;;  %v1691_v59 = vmul.f32 %v4269_v0, %v1591_v16 }
 0x183   : > { %v2179_v30 = vmul.f32 8.0, %v2115_v56  ;;  %v2340_v39 = vmul.f32 %v2276_v44, %v2276_v44  ;;  %v1954_v6 = vadd.f32 %v5094_v25, %v1890_v18  ;;  %v1955_v37 = vadd.f32 %v5154_v14, %v1891_v36 }
 0x184   : > { %v2116_v47 = vadd.f32 %v3343_v3, %v6214_v17  ;;  %v3375_v35 = vadd.f32 -0.5, %v2020_v1  ;;  %v1754_v9 = vadd.f32 %v1690_v15, %v6215_v27  ;;  %v1755_v28 = vadd.f32 %v1691_v59, %v6216_v2 }
 0x185   : > { %v3550_v31 = vpop.eup %3549  ;;  %v2451_v32 = vmul.f32 %v6160_v13, %v2179_v30  ;;  %v2412_v33 = vmul.f32 %v6154_v58, %v2340_v39  ;;  %v2018_v21 = vmul.f32 2.0, %v1954_v6  ;;  %v2019_v54 = vmul.f32 2.0, %v1955_v37  ;;  %v655_v37 = vpop.f32.mrf.mxu0 }
 0x186   : > { %v2180_v53 = vmul.f32 8.0, %v2116_v47  ;;  %v1003_v8 = vadd.f32 1.0, %v3550_v31  ;;  %v2148_v16 = vadd.f32 %v3375_v35, %v1756_v24  ;;  %v2274_v61 = vmul.f32 2.0, %v5094_v25 }
 0x187   : > { %v2515_v18 = vadd.f32 %v2451_v32, %v2379_v51  ;;  %v3373_v4 = vadd.f32 -0.5, %v2018_v21  ;;  %v2275_v56 = vmul.f32 2.0, %v5154_v14  ;;  %v3374_v44 = vadd.f32 -0.5, %v2019_v54 }
 0x188   : > { %v2452_v36 = vmul.f32 %v6159_v55, %v2180_v53  ;;  %3557 = vrcp.f32 %v1003_v8  ;;  %v2212_v12 = vmul.f32 8.0, %v2148_v16  ;;  %v2338_v30 = vmul.f32 %v2274_v61, %v2274_v61 }
 0x189   : > { %v3552_v3 = vpop.eup %3551  ;;  %v2651_v1 = vadd.f32 %v2587_v50, %v2515_v18  ;;  %v2146_v15 = vadd.f32 %v3373_v4, %v1754_v9  ;;  %v2339_v39 = vmul.f32 %v2275_v56, %v2275_v56  ;;  %v2147_v6 = vadd.f32 %v3374_v44, %v1755_v28  ;;  %v751_v50 = vpop.f32.mrf.mxu1 }
 0x18a   : > { %v2516_v59 = vadd.f32 %v2452_v36, %v2380_v11  ;;  %v1035_v24 = vadd.f32 1.0, %v3552_v3  ;;  %v2484_v51 = vmul.f32 %v6159_v55, %v2212_v12  ;;  %v2410_v35 = vmul.f32 %v6154_v58, %v2338_v30 }
 0x18b   : > { %v2795_v17 = vmul.f32 %v6162_v41, %v2651_v1  ;;  %2924 = vst.msk [vmem:[%s4713_s17 + $0x68] sm:$0xff] %vm2911_vm2, %v2651_v1  ;;  %v2210_v47 = vmul.f32 8.0, %v2146_v15  ;;  %v2411_v27 = vmul.f32 %v6158_v63, %v2339_v39  ;;  %v2211_v32 = vmul.f32 8.0, %v2147_v6  ;;  %v755_v61 = vpop.f32.mrf.mxu1 }
 0x18c   : > { %v3554_v9 = vpop.eup %3553  ;;  %v2652_v31 = vadd.f32 %v2588_v40, %v2516_v59  ;;  %3559 = vrcp.f32 %v1035_v24  ;;  %v2548_v11 = vadd.f32 %v2484_v51, %v2412_v33  ;;  %v2618_v8 = vmul.f32 %v5094_v25, %v4280_v52  ;;  %v659_v25 = vpop.f32.mrf.mxu0 }
 0x18d   : > { %v3556_v2 = vpop.eup %3555  ;;  %v2859_v28 = vadd.f32 %v2795_v17, %v5126_v23  ;;  %v1004_v21 = vadd.f32 1.0, %v3554_v9  ;;  %v2482_v53 = vmul.f32 %v6159_v55, %v2210_v47  ;;  %v2483_v40 = vmul.f32 %v6160_v13, %v2211_v32 }
 0x18e   : > { %v2796_v16 = vmul.f32 %v6161_v62, %v2652_v31  ;;  %2925 = vst [vmem:[%s4713_s17 + $0x70] sm:$0xff] %v2652_v31  ;;  %v1036_v54 = vadd.f32 1.0, %v3556_v2  ;;  %v2684_v18 = vadd.f32 %v2620_v48, %v2548_v11  ;;  %v2619_v23 = vmul.f32 %v5154_v14, %v6155_v10 }
 0x18f   : > { %2988 = vst.msk [vmem:[%s4733_s21 + $0x68] sm:$0xff] %vm2911_vm2, %v2859_v28  ;;  %3561 = vrcp.f32 %v1004_v21  ;;  %v2546_v33 = vadd.f32 %v2482_v53, %v2410_v35  ;;  %v5237_v4 = vadd.f32 %v655_v37, %v6185_v19  ;;  %v2547_v36 = vadd.f32 %v2483_v40, %v2411_v27  ;;  %v661_v27 = vpop.f32.mrf.mxu0  ;;  %v757_v37 = vpop.f32.mrf.mxu1 }
 0x190   : > { %v2860_v56 = vadd.f32 %v2796_v16, %v5159_v5  ;;  %3563 = vrcp.f32 %v1036_v54  ;;  %v2828_v48 = vmul.f32 %v6161_v62, %v2684_v18  ;;  %2957 = vst [vmem:[%s4713_s17 + $0x170] sm:$0xff] %v2684_v18  ;;  %v5244_v14 = vadd.f32 %v751_v50, %v6185_v19  ;;  %v5272_v50 = vpop.permute.xlu0 %1600 }
 0x191   : > { %v2682_v12 = vadd.f32 %v2618_v8, %v2546_v33  ;;  %v3282_v44 = vmul.f32 -1.442695, %v5237_v4  ;;  %v2683_v1 = vadd.f32 %v2619_v23, %v2547_v36  ;;  %v5249_v15 = vadd.f32 %v659_v25, %v6189_v60 }
 0x192   : > { %2989 = vst [vmem:[%s4733_s21 + $0x70] sm:$0xff] %v2860_v56  ;;  %v2892_v3 = vadd.f32 %v2828_v48, %v5166_v42  ;;  %v5252_v5 = vadd.f32 %v755_v61, %v6189_v60  ;;  %v2754_v30 = vmul.f32 %v6164_v43, %v4940_v26  ;;  %v3314_v59 = vmul.f32 -1.442695, %v5244_v14  ;;  %v6217_v48 = vld [vmem:[#allocation11_spill] sm:$0xff] }
 0x193   : > { %v2826_v39 = vmul.f32 %v6161_v62, %v2682_v12  ;;  %2955 = vst [vmem:[%s4713_s17 + $0x160] sm:$0xff] %v2682_v12  ;;  %3565 = vpow2.f32 %v3282_v44  ;;  %v2755_v42 = vmul.f32 %v6201_v45, %v5030_v46  ;;  %v2827_v24 = vmul.f32 %v6162_v41, %v2683_v1  ;;  %2956 = vst.msk [vmem:[%s4713_s17 + $0x168] sm:$0xff] %vm2911_vm2, %v2683_v1 }
 0x194   : > { %3021 = vst [vmem:[%s4733_s21 + $0x170] sm:$0xff] %v2892_v3  ;;  %v3283_v51 = vmul.f32 -1.442695, %v5249_v15  ;;  %v3315_v26 = vmul.f32 -1.442695, %v5252_v5  ;;  %3567 = vpow2.f32 %v3314_v59  ;;  %v1693_v11 = vmul.f32 %v4269_v0, %v5188_v7 }
 0x195   : > { %v3558_v6 = vpop.eup %3557  ;;  %v2890_v17 = vadd.f32 %v2826_v39, %v2754_v30  ;;  %v2891_v35 = vadd.f32 %v2827_v24, %v2755_v42  ;;  %v5279_v32 = vadd.f32 %v661_v27, %v6185_v19  ;;  %v5282_v2 = vadd.f32 %v757_v37, %v6185_v19  ;;  %v6218_v42 = vld [vmem:[#allocation16_spill] sm:$0xff]  ;;  %v665_v37 = vpop.f32.mrf.mxu0 }
 0x196   : > { %v1789_v47 = vsub.f32 %v5141_v22, %v3558_v6  ;;  %3569 = vpow2.f32 %v3283_v51  ;;  %v2245_v31 = vmul.f32 2.0, %v3558_v6  ;;  %v5286_v21 = vmul.f32 %v6201_v45, %v5141_v22  ;;  %v6219_v51 = vld [vmem:[#allocation51_spill] sm:$0xff] }
 0x197   : > { %3019 = vst [vmem:[%s4733_s21 + $0x160] sm:$0xff] %v2890_v17  ;;  %3020 = vst.msk [vmem:[%s4733_s21 + $0x168] sm:$0xff] %vm2911_vm2, %v2891_v35  ;;  %3571 = vpow2.f32 %v3315_v26  ;;  %v5293_v16 = vmul.f32 %v6201_v45, %v5144_v38  ;;  %v5297_v7 = vmul.f32 %v6164_v43, %v5174_v29  ;;  %v1694_v54 = vmul.f32 %v4266_v20, %v5272_v50 }
 0x198   : > { %v1861_v46 = vmul.f32 %v4292_v34, %v1789_v47  ;;  %v3284_v18 = vmul.f32 -1.442695, %v5279_v32  ;;  %v5307_v23 = vmul.f32 %v6164_v43, %v5182_v49  ;;  %v2309_v61 = vmul.f32 %v2245_v31, %v2245_v31 }
 0x199   : > { %v5274_v9 = vpop.eup %3559  ;;  %v1757_v36 = vadd.f32 %v1693_v11, %v6217_v48  ;;  %v2589_v30 = vmul.f32 %v3558_v6, %v6155_v10  ;;  %v5322_v59 = vmul.f32 %v6201_v45, %v5237_v4 }
 0x19a   : > { %v1925_v28 = vadd.f32 %v3558_v6, %v1861_v46  ;;  %v1821_v53 = vsub.f32 %v5144_v38, %v5274_v9  ;;  %v2277_v8 = vmul.f32 2.0, %v5274_v9  ;;  %v3316_v38 = vmul.f32 -1.442695, %v5282_v2 }
 0x19b   : > { %3573 = vpow2.f32 %v3284_v18 }
 0x19c   : > { %v5302_v22 = vpop.eup %3561  ;;  %v1989_v40 = vmul.f32 2.0, %v1925_v28  ;;  %v1893_v33 = vmul.f32 %v4292_v34, %v1821_v53  ;;  %v2341_v1 = vmul.f32 %v2277_v8, %v2277_v8  ;;  %3575 = vpow2.f32 %v3316_v38 }
 0x19d   : > { %v5310_v25 = vpop.eup %3563  ;;  %v1790_v56 = vsub.f32 %v5174_v29, %v5302_v22  ;;  %v1758_v29 = vadd.f32 %v1694_v54, %v6218_v42  ;;  %v2246_v6 = vmul.f32 2.0, %v5302_v22 }
 0x19e   : > { %v3344_v12 = vadd.f32 -0.5, %v1989_v40  ;;  %v1822_v44 = vsub.f32 %v5182_v49, %v5310_v25  ;;  %v1957_v3 = vadd.f32 %v5274_v9, %v1893_v33  ;;  %v2381_v49 = vmul.f32 %v6158_v63, %v2309_v61 }
 0x19f   : > { %v1862_v39 = vmul.f32 %v4277_v57, %v1790_v56  ;;  %v2413_v28 = vmul.f32 %v6158_v63, %v2341_v1  ;;  %v2278_v18 = vmul.f32 2.0, %v5310_v25  ;;  %v5335_v56 = vadd.f32 %v665_v37, %v6189_v60 }
 0x1a0   : > { %v3566_v24 = vpop.eup %3565  ;;  %v2117_v26 = vadd.f32 %v3344_v12, %v6219_v51  ;;  %v1894_v17 = vmul.f32 %v4277_v57, %v1822_v44  ;;  %v2021_v47 = vmul.f32 2.0, %v1957_v3  ;;  %v2310_v44 = vmul.f32 %v2246_v6, %v2246_v6  ;;  %v761_v6 = vpop.f32.mrf.mxu1 }
 0x1a1   : > { %v1926_v35 = vadd.f32 %v5302_v22, %v1862_v39  ;;  %v1005_v27 = vadd.f32 1.0, %v3566_v24  ;;  %v3568_v46 = vpop.eup %3567  ;;  %v1606_v24 = vpop.permute.xlu1 %1605 }
 0x1a2   : > { %v2181_v31 = vmul.f32 8.0, %v2117_v26  ;;  %v3376_v11 = vadd.f32 -0.5, %v2021_v47  ;;  %v1958_v53 = vadd.f32 %v5310_v25, %v1894_v17  ;;  %v1037_v54 = vadd.f32 1.0, %v3568_v46  ;;  %v6220_v26 = vld [vmem:[#allocation57_spill] sm:$0xff] }
 0x1a3   : > { %v1990_v8 = vmul.f32 2.0, %v1926_v35  ;;  %3577 = vrcp.f32 %v1005_v27  ;;  %v3570_v40 = vpop.eup %3569  ;;  %v2342_v47 = vmul.f32 %v2278_v18, %v2278_v18 }
 0x1a4   : > { %v2453_v33 = vmul.f32 %v6160_v13, %v2181_v31  ;;  %v2149_v38 = vadd.f32 %v3376_v11, %v1757_v36  ;;  %v2022_v61 = vmul.f32 2.0, %v1958_v53  ;;  %v3572_v48 = vpop.eup %3571  ;;  %3579 = vrcp.f32 %v1037_v54 }
 0x1a5   : > { %v3345_v12 = vadd.f32 -0.5, %v1990_v8  ;;  %v1006_v3 = vadd.f32 1.0, %v3570_v40  ;;  %v1038_v42 = vadd.f32 1.0, %v3572_v48  ;;  %v3285_v36 = vmul.f32 -1.442695, %v5335_v56 }
 0x1a6   : > { %v2517_v1 = vadd.f32 %v2453_v33, %v2381_v49  ;;  %v2213_v39 = vmul.f32 8.0, %v2149_v38  ;;  %v3377_v51 = vadd.f32 -0.5, %v2022_v61  ;;  %v5342_v49 = vmul.f32 %v6201_v45, %v5244_v14 }
 0x1a7   : > { %v2118_v17 = vadd.f32 %v3345_v12, %v6220_v26  ;;  %3581 = vrcp.f32 %v1006_v3  ;;  %v1696_v31 = vmul.f32 %v4266_v20, %v1606_v24  ;;  %v2382_v54 = vmul.f32 %v6154_v58, %v2310_v44  ;;  %v667_v12 = vpop.f32.mrf.mxu0 }
 0x1a8   : > { %v2653_v35 = vadd.f32 %v2589_v30, %v2517_v1  ;;  %v2485_v27 = vmul.f32 %v6160_v13, %v2213_v39  ;;  %3583 = vrcp.f32 %v1038_v42  ;;  %v2150_v37 = vadd.f32 %v3377_v51, %v1758_v29  ;;  %v3574_v11 = vpop.eup %3573 }
 0x1a9   : > { %v2182_v46 = vmul.f32 8.0, %v2118_v17  ;;  %3585 = vpow2.f32 %v3285_v36  ;;  %v2621_v30 = vmul.f32 %v5274_v9, %v6155_v10  ;;  %v1007_v40 = vadd.f32 1.0, %v3574_v11  ;;  %v3576_v9 = vpop.eup %3575  ;;  %v6221_v11 = vld [vmem:[#allocation14_spill] sm:$0xff] }
 0x1aa   : > { %v2797_v53 = vmul.f32 %v6162_v41, %v2653_v35  ;;  %2926 = vst.msk [vmem:[%s4713_s17 + $0x78] sm:$0xff] %vm2911_vm2, %v2653_v35  ;;  %v2549_v8 = vadd.f32 %v2485_v27, %v2413_v28  ;;  %v2214_v29 = vmul.f32 8.0, %v2150_v37  ;;  %v5353_v33 = vadd.f32 %v761_v6, %v6189_v60 }
 0x1ab   : > { %v2454_v18 = vmul.f32 %v6159_v55, %v2182_v46  ;;  %v2414_v48 = vmul.f32 %v6154_v58, %v2342_v47  ;;  %v2590_v44 = vmul.f32 %v5302_v22, %v4280_v52  ;;  %v1697_v1 = vmul.f32 %v4269_v0, %v1606_v24  ;;  %v763_v47 = vpop.f32.mrf.mxu1 }
 0x1ac   : > { %v2861_v38 = vadd.f32 %v2797_v53, %v5286_v21  ;;  %v2685_v61 = vadd.f32 %v2621_v30, %v2549_v8  ;;  %v2486_v28 = vmul.f32 %v6159_v55, %v2214_v29  ;;  %3587 = vrcp.f32 %v1007_v40  ;;  %v6222_v30 = vld [vmem:[#allocation15_spill] sm:$0xff] }
 0x1ad   : > { %v2518_v3 = vadd.f32 %v2454_v18, %v2382_v54  ;;  %v2622_v42 = vmul.f32 %v5310_v25, %v4280_v52  ;;  %v1039_v51 = vadd.f32 1.0, %v3576_v9  ;;  %v5370_v22 = vmul.f32 %v6164_v43, %v5249_v15 }
 0x1ae   : > { %2990 = vst.msk [vmem:[%s4733_s21 + $0x78] sm:$0xff] %vm2911_vm2, %v2861_v38  ;;  %v2829_v39 = vmul.f32 %v6162_v41, %v2685_v61  ;;  %2958 = vst.msk [vmem:[%s4713_s17 + $0x178] sm:$0xff] %vm2911_vm2, %v2685_v61  ;;  %v2550_v21 = vadd.f32 %v2486_v28, %v2414_v48  ;;  %v3317_v24 = vmul.f32 -1.442695, %v5353_v33  ;;  %v5374_v17 = vadd.f32 %v667_v12, %v6185_v19  ;;  %v6223_v61 = vld [vmem:[#allocation17_spill] sm:$0xff] }
 0x1af   : > { %v2654_v26 = vadd.f32 %v2590_v44, %v2518_v3  ;;  %v1695_v25 = vmul.f32 %v4269_v0, %v5272_v50  ;;  %3589 = vrcp.f32 %v1039_v51  ;;  %v5383_v53 = vadd.f32 %v1696_v31, %v6221_v11 }
 0x1b0   : > { %v3578_v36 = vpop.eup %3577  ;;  %v2893_v35 = vadd.f32 %v2829_v39, %v5293_v16  ;;  %v2686_v27 = vadd.f32 %v2622_v42, %v2550_v21  ;;  %v5388_v16 = vadd.f32 %v1697_v1, %v6222_v30  ;;  %v3286_v29 = vmul.f32 -1.442695, %v5374_v17 }
 0x1b1   : > { %v2798_v37 = vmul.f32 %v6161_v62, %v2654_v26  ;;  %2927 = vst [vmem:[%s4713_s17 + $0x80] sm:$0xff] %v2654_v26  ;;  %v1791_v6 = vsub.f32 %v5237_v4, %v3578_v36  ;;  %v2247_v46 = vmul.f32 2.0, %v3578_v36  ;;  %v3580_v8 = vpop.eup %3579  ;;  %v5394_v54 = vadd.f32 %v763_v47, %v6185_v19 }
 0x1b2   : > { %3022 = vst.msk [vmem:[%s4733_s21 + $0x178] sm:$0xff] %vm2911_vm2, %v2893_v35  ;;  %v2830_v50 = vmul.f32 %v6161_v62, %v2686_v27  ;;  %2959 = vst [vmem:[%s4713_s17 + $0x180] sm:$0xff] %v2686_v27  ;;  %v1823_v18 = vsub.f32 %v5244_v14, %v3580_v8  ;;  %3591 = vpow2.f32 %v3317_v24  ;;  %v1759_v48 = vadd.f32 %v1695_v25, %v6223_v61 }
 0x1b3   : > { %v2862_v4 = vadd.f32 %v2798_v37, %v5297_v7  ;;  %v1863_v31 = vmul.f32 %v4292_v34, %v1791_v6  ;;  %v2311_v38 = vmul.f32 %v2247_v46, %v2247_v46  ;;  %3593 = vpow2.f32 %v3286_v29 }
 0x1b4   : > { %v3582_v40 = vpop.eup %3581  ;;  %v2894_v28 = vadd.f32 %v2830_v50, %v5307_v23  ;;  %v2591_v3 = vmul.f32 %v3578_v36, %v6155_v10  ;;  %v1895_v7 = vmul.f32 %v4292_v34, %v1823_v18  ;;  %v5408_v42 = vmul.f32 -1.442695, %v5394_v54 }
 0x1b5   : > { %v3584_v12 = vpop.eup %3583  ;;  %2991 = vst [vmem:[%s4733_s21 + $0x80] sm:$0xff] %v2862_v4  ;;  %v1927_v9 = vadd.f32 %v3578_v36, %v1863_v31  ;;  %v1792_v44 = vsub.f32 %v5249_v15, %v3582_v40  ;;  %v2248_v14 = vmul.f32 2.0, %v3582_v40  ;;  %v2279_v24 = vmul.f32 2.0, %v3580_v8  ;;  %v6224_v4 = vld [vmem:[#allocation59_spill] sm:$0xff] }
 0x1b6   : > { %v3586_v1 = vpop.eup %3585  ;;  %v1824_v39 = vsub.f32 %v5252_v5, %v3584_v12  ;;  %v2280_v21 = vmul.f32 2.0, %v3584_v12  ;;  %3023 = vst [vmem:[%s4733_s21 + $0x180] sm:$0xff] %v2894_v28  ;;  %v1959_v26 = vadd.f32 %v3580_v8, %v1895_v7  ;;  %v2383_v47 = vmul.f32 %v6158_v63, %v2311_v38 }
 0x1b7   : > { %v1991_v23 = vmul.f32 2.0, %v1927_v9  ;;  %v1864_v51 = vmul.f32 %v4277_v57, %v1792_v44  ;;  %v5413_v36 = vmul.f32 %v3582_v40, %v4280_v52  ;;  %v2623_v35 = vmul.f32 %v3580_v8, %v6155_v10 }
 0x1b8   : > { %v1896_v15 = vmul.f32 %v4277_v57, %v1824_v39  ;;  %v2023_v37 = vmul.f32 2.0, %v1959_v26  ;;  %v1008_v6 = vadd.f32 1.0, %v3586_v1  ;;  %v2312_v11 = vmul.f32 %v2248_v14, %v2248_v14  ;;  %v6225_v26 = vld [vmem:[#allocation55_spill] sm:$0xff] }
 0x1b9   : > { %v3346_v25 = vadd.f32 -0.5, %v1991_v23  ;;  %v1928_v27 = vadd.f32 %v3582_v40, %v1864_v51  ;;  %v5417_v46 = vpop.eup %3587  ;;  %v2344_v50 = vmul.f32 %v2280_v21, %v2280_v21  ;;  %v2624_v29 = vmul.f32 %v3584_v12, %v4280_v52 }
 0x1ba   : > { %v1960_v30 = vadd.f32 %v3584_v12, %v1896_v15  ;;  %v3378_v38 = vadd.f32 -0.5, %v2023_v37  ;;  %v1793_v61 = vsub.f32 %v5279_v32, %v5417_v46  ;;  %v2343_v8 = vmul.f32 %v2279_v24, %v2279_v24 }
 0x1bb   : > { %v2119_v31 = vadd.f32 %v3346_v25, %v6224_v4  ;;  %v1992_v18 = vmul.f32 2.0, %v1928_v27  ;;  %v2249_v40 = vmul.f32 2.0, %v5417_v46  ;;  %3595 = vrcp.f32 %v1008_v6 }
 0x1bc   : > { %v2024_v28 = vmul.f32 2.0, %v1960_v30  ;;  %v5424_v9 = vpop.eup %3589  ;;  %v2151_v1 = vadd.f32 %v3378_v38, %v1759_v48  ;;  %v1865_v14 = vmul.f32 %v4292_v34, %v1793_v61  ;;  %v2384_v12 = vmul.f32 %v6154_v58, %v2312_v11 }
 0x1bd   : > { %v2183_v7 = vmul.f32 8.0, %v2119_v31  ;;  %v3347_v44 = vadd.f32 -0.5, %v1992_v18  ;;  %v2313_v21 = vmul.f32 %v2249_v40, %v2249_v40  ;;  %v1825_v23 = vsub.f32 %v5282_v2, %v5424_v9 }
 0x1be   : > { %v3379_v39 = vadd.f32 -0.5, %v2024_v28  ;;  %v2215_v15 = vmul.f32 8.0, %v2151_v1  ;;  %v1929_v25 = vadd.f32 %v5417_v46, %v1865_v14  ;;  %v2416_v48 = vmul.f32 %v6154_v58, %v2344_v50 }
 0x1bf   : > { %v2455_v51 = vmul.f32 %v6160_v13, %v2183_v7  ;;  %v2120_v24 = vadd.f32 %v3347_v44, %v6225_v26  ;;  %v3592_v27 = vpop.eup %3591  ;;  %v2415_v6 = vmul.f32 %v6158_v63, %v2343_v8  ;;  %v1897_v11 = vmul.f32 %v4292_v34, %v1825_v23  ;;  %v6226_v26 = vld [vmem:[#allocation56_spill] sm:$0xff] }
 0x1c0   : > { %v2152_v37 = vadd.f32 %v3379_v39, %v5383_v53  ;;  %v3594_v30 = vpop.eup %3593  ;;  %v2487_v18 = vmul.f32 %v6160_v13, %v2215_v15  ;;  %v1993_v38 = vmul.f32 2.0, %v1929_v25  ;;  %v2385_v28 = vmul.f32 %v6158_v63, %v2313_v21 }
 0x1c1   : > { %v2519_v4 = vadd.f32 %v2455_v51, %v2383_v47  ;;  %v2184_v31 = vmul.f32 8.0, %v2120_v24  ;;  %v1961_v40 = vadd.f32 %v5424_v9, %v1897_v11  ;;  %v2281_v53 = vmul.f32 2.0, %v5424_v9 }
 0x1c2   : > { %v2216_v61 = vmul.f32 8.0, %v2152_v37  ;;  %v2551_v8 = vadd.f32 %v2487_v18, %v2415_v6  ;;  %v3348_v44 = vadd.f32 -0.5, %v1993_v38  ;;  %v1040_v14 = vadd.f32 1.0, %v3592_v27 }
 0x1c3   : > { %v2655_v7 = vadd.f32 %v2591_v3, %v2519_v4  ;;  %v2456_v50 = vmul.f32 %v6159_v55, %v2184_v31  ;;  %v2025_v47 = vmul.f32 2.0, %v1961_v40  ;;  %v1009_v39 = vadd.f32 1.0, %v3594_v30  ;;  %v671_v3 = vpop.f32.mrf.mxu0 }
 0x1c4   : > { %v2488_v1 = vmul.f32 %v6159_v55, %v2216_v61  ;;  %v2687_v51 = vadd.f32 %v2623_v35, %v2551_v8  ;;  %v2121_v24 = vadd.f32 %v3348_v44, %v6226_v26  ;;  %v2345_v37 = vmul.f32 %v2281_v53, %v2281_v53  ;;  %v767_v61 = vpop.f32.mrf.mxu1 }
 0x1c5   : > { %v2799_v23 = vmul.f32 %v6162_v41, %v2655_v7  ;;  %2928 = vst.msk [vmem:[%s4713_s17 + $0x88] sm:$0xff] %vm2911_vm2, %v2655_v7  ;;  %v2520_v21 = vadd.f32 %v2456_v50, %v2384_v12  ;;  %v3380_v25 = vadd.f32 -0.5, %v2025_v47  ;;  %3597 = vrcp.f32 %v1040_v14  ;;  %v673_v14 = vpop.f32.mrf.mxu0 }
 0x1c6   : > { %v2552_v15 = vadd.f32 %v2488_v1, %v2416_v48  ;;  %v2831_v11 = vmul.f32 %v6162_v41, %v2687_v51  ;;  %2960 = vst.msk [vmem:[%s4713_s17 + $0x188] sm:$0xff] %vm2911_vm2, %v2687_v51  ;;  %v2185_v12 = vmul.f32 8.0, %v2121_v24  ;;  %3599 = vrcp.f32 %v1009_v39  ;;  %v1616_v1 = vpop.permute.xlu1 %1615 }
 0x1c7   : > { %v2863_v6 = vadd.f32 %v2799_v23, %v5322_v59  ;;  %v2656_v27 = vadd.f32 %v5413_v36, %v2520_v21  ;;  %v2153_v30 = vadd.f32 %v3380_v25, %v5388_v16  ;;  %v5454_v48 = vadd.f32 %v671_v3, %v6189_v60  ;;  %v1611_v3 = vpop.permute.xlu0 %1610 }
 0x1c8   : > { %v2688_v35 = vadd.f32 %v2624_v29, %v2552_v15  ;;  %v5456_v4 = vpop.eup %3595  ;;  %v2895_v36 = vadd.f32 %v2831_v11, %v5342_v49  ;;  %v2457_v31 = vmul.f32 %v6160_v13, %v2185_v12  ;;  %3601 = vpow2.f32 %v5408_v42  ;;  %v769_v15 = vpop.f32.mrf.mxu1 }
 0x1c9   : > { %2992 = vst.msk [vmem:[%s4733_s21 + $0x88] sm:$0xff] %vm2911_vm2, %v2863_v6  ;;  %v2800_v59 = vmul.f32 %v6161_v62, %v2656_v27  ;;  %2929 = vst [vmem:[%s4713_s17 + $0x90] sm:$0xff] %v2656_v27  ;;  %v2760_v16 = vmul.f32 %v6164_v43, %v5252_v5  ;;  %v2217_v18 = vmul.f32 8.0, %v2153_v30  ;;  %v1794_v38 = vsub.f32 %v5335_v56, %v5456_v4 }
 0x1ca   : > { %v2832_v29 = vmul.f32 %v6161_v62, %v2688_v35  ;;  %2961 = vst [vmem:[%s4713_s17 + $0x190] sm:$0xff] %v2688_v35  ;;  %3024 = vst.msk [vmem:[%s4733_s21 + $0x188] sm:$0xff] %vm2911_vm2, %v2895_v36  ;;  %v2521_v49 = vadd.f32 %v2457_v31, %v2385_v28  ;;  %v2593_v42 = vmul.f32 %v5417_v46, %v6155_v10  ;;  %v3287_v53 = vmul.f32 -1.442695, %v5454_v48  ;;  %v677_v35 = vpop.f32.mrf.mxu0 }
 0x1cb   : > { %v2864_v40 = vadd.f32 %v2800_v59, %v5370_v22  ;;  %v2417_v7 = vmul.f32 %v6158_v63, %v2345_v37  ;;  %v2489_v50 = vmul.f32 %v6160_v13, %v2217_v18  ;;  %v1866_v8 = vmul.f32 %v4277_v57, %v1794_v38  ;;  %v6228_v38 = vld [vmem:[#allocation18_spill] sm:$0xff] }
 0x1cc   : > { %v2896_v5 = vadd.f32 %v2832_v29, %v2760_v16  ;;  %v2657_v44 = vadd.f32 %v2593_v42, %v2521_v49  ;;  %3603 = vpow2.f32 %v3287_v53  ;;  %v5482_v22 = vadd.f32 %v767_v61, %v6189_v60  ;;  %v6227_v16 = vld [vmem:[#allocation64_spill] sm:$0xff]  ;;  %v6229_v49 = vld [vmem:[#allocation19_spill] sm:$0xff] }
 0x1cd   : > { %2993 = vst [vmem:[%s4733_s21 + $0x90] sm:$0xff] %v2864_v40  ;;  %v2553_v28 = vadd.f32 %v2489_v50, %v2417_v7  ;;  %v2625_v46 = vmul.f32 %v5424_v9, %v6155_v10  ;;  %v1930_v47 = vadd.f32 %v5456_v4, %v1866_v8  ;;  %v2729_v39 = vmul.f32 %v6201_v45, %v5279_v32  ;;  %v773_v50 = vpop.f32.mrf.mxu1 }
 0x1ce   : > { %3025 = vst [vmem:[%s4733_s21 + $0x190] sm:$0xff] %v2896_v5  ;;  %v2801_v23 = vmul.f32 %v6162_v41, %v2657_v44  ;;  %2930 = vst.msk [vmem:[%s4713_s17 + $0x98] sm:$0xff] %vm2911_vm2, %v2657_v44  ;;  %v2250_v21 = vmul.f32 2.0, %v5456_v4  ;;  %v3319_v51 = vmul.f32 -1.442695, %v5482_v22  ;;  %v1700_v9 = vmul.f32 %v4266_v20, %v1616_v1 }
 0x1cf   : > { %v2689_v26 = vadd.f32 %v2625_v46, %v2553_v28  ;;  %v1994_v24 = vmul.f32 2.0, %v1930_v47  ;;  %v2761_v37 = vmul.f32 %v6201_v45, %v5282_v2  ;;  %v1701_v32 = vmul.f32 %v4269_v0, %v1616_v1  ;;  %v6230_v47 = vld [vmem:[#allocation20_spill] sm:$0xff] }
 0x1d0   : > { %v2865_v25 = vadd.f32 %v2801_v23, %v2729_v39  ;;  %3605 = vpow2.f32 %v3319_v51  ;;  %v5504_v11 = vmul.f32 %v6164_v43, %v5335_v56  ;;  %v5507_v12 = vadd.f32 %v673_v14, %v6185_v19 }
 0x1d1   : > { %v2833_v6 = vmul.f32 %v6162_v41, %v2689_v26  ;;  %2962 = vst.msk [vmem:[%s4713_s17 + $0x198] sm:$0xff] %vm2911_vm2, %v2689_v26  ;;  %v3349_v27 = vadd.f32 -0.5, %v1994_v24  ;;  %v2314_v2 = vmul.f32 %v2250_v21, %v2250_v21  ;;  %v5515_v59 = vmul.f32 %v6164_v43, %v5353_v33 }
 0x1d2   : > { %v5509_v30 = vpop.eup %3597  ;;  %2994 = vst.msk [vmem:[%s4733_s21 + $0x98] sm:$0xff] %vm2911_vm2, %v2865_v25  ;;  %v1698_v36 = vmul.f32 %v4266_v20, %v1611_v3  ;;  %v5519_v31 = vadd.f32 %v769_v15, %v6185_v19  ;;  %v5525_v61 = vadd.f32 %v1700_v9, %v6228_v38  ;;  %v5530_v42 = vadd.f32 %v1701_v32, %v6229_v49 }
 0x1d3   : > { %v2897_v56 = vadd.f32 %v2833_v6, %v2761_v37  ;;  %v2122_v29 = vadd.f32 %v3349_v27, %v6227_v16  ;;  %v1826_v18 = vsub.f32 %v5353_v33, %v5509_v30  ;;  %v5527_v40 = vpop.eup %3599  ;;  %v1699_v53 = vmul.f32 %v4269_v0, %v1611_v3  ;;  %v6231_v6 = vld [vmem:[#allocation21_spill] sm:$0xff] }
 0x1d4   : > { %v3288_v5 = vmul.f32 -1.442695, %v5507_v12  ;;  %v5535_v7 = vadd.f32 %v677_v35, %v6189_v60  ;;  %v1795_v1 = vsub.f32 %v5374_v17, %v5527_v40  ;;  %v3320_v28 = vmul.f32 -1.442695, %v5519_v31 }
 0x1d5   : > { %v3602_v8 = vpop.eup %3601  ;;  %3026 = vst.msk [vmem:[%s4733_s21 + $0x198] sm:$0xff] %vm2911_vm2, %v2897_v56  ;;  %v2186_v33 = vmul.f32 8.0, %v2122_v29  ;;  %v1898_v44 = vmul.f32 %v4277_v57, %v1826_v18  ;;  %v2386_v46 = vmul.f32 %v6154_v58, %v2314_v2  ;;  %v1762_v14 = vadd.f32 %v1698_v36, %v6230_v47  ;;  %v1626_v29 = vpop.permute.xlu1 %1625 }
 0x1d6   : > { %v1041_v39 = vadd.f32 1.0, %v3602_v8  ;;  %3607 = vpow2.f32 %v3288_v5  ;;  %v1867_v51 = vmul.f32 %v4292_v34, %v1795_v1  ;;  %v5549_v26 = vadd.f32 %v773_v50, %v6189_v60 }
 0x1d7   : > { %v2458_v23 = vmul.f32 %v6159_v55, %v2186_v33  ;;  %v1962_v21 = vadd.f32 %v5509_v30, %v1898_v44  ;;  %v2594_v24 = vmul.f32 %v5456_v4, %v4280_v52  ;;  %v2282_v9 = vmul.f32 2.0, %v5509_v30  ;;  %v679_v4 = vpop.f32.mrf.mxu0  ;;  %v775_v44 = vpop.f32.mrf.mxu1 }
 0x1d8   : > { %3609 = vrcp.f32 %v1041_v39  ;;  %v3289_v3 = vmul.f32 -1.442695, %v5535_v7  ;;  %v1931_v32 = vadd.f32 %v5527_v40, %v1867_v51  ;;  %v5557_v27 = vadd.f32 %v1699_v53, %v6231_v6 }
 0x1d9   : > { %v3604_v15 = vpop.eup %3603  ;;  %v2522_v25 = vadd.f32 %v2458_v23, %v2386_v46  ;;  %v2026_v37 = vmul.f32 2.0, %v1962_v21  ;;  %3611 = vpow2.f32 %v3320_v28  ;;  %v2251_v35 = vmul.f32 2.0, %v5527_v40  ;;  %v683_v47 = vpop.f32.mrf.mxu0 }
 0x1da   : > { %v1010_v2 = vadd.f32 1.0, %v3604_v15  ;;  %3613 = vpow2.f32 %v3289_v3  ;;  %v1995_v16 = vmul.f32 2.0, %v1931_v32  ;;  %v3321_v18 = vmul.f32 -1.442695, %v5549_v26 }
 0x1db   : > { %v2658_v36 = vadd.f32 %v2594_v24, %v2522_v25  ;;  %v3381_v56 = vadd.f32 -0.5, %v2026_v37  ;;  %v2346_v38 = vmul.f32 %v2282_v9, %v2282_v9  ;;  %v5563_v49 = vmul.f32 %v6201_v45, %v5374_v17  ;;  %v1621_v24 = vpop.permute.xlu0 %1620 }
 0x1dc   : > { %v5567_v53 = vmul.f32 %v6201_v45, %v5394_v54  ;;  %3615 = vrcp.f32 %v1010_v2  ;;  %v3350_v33 = vadd.f32 -0.5, %v1995_v16  ;;  %v5573_v1 = vmul.f32 %v6164_v43, %v5454_v48 }
 0x1dd   : > { %v3606_v5 = vpop.eup %3605  ;;  %v2802_v50 = vmul.f32 %v6161_v62, %v2658_v36  ;;  %2931 = vst [vmem:[%s4713_s17 + $0xa0] sm:$0xff] %v2658_v36  ;;  %v2154_v8 = vadd.f32 %v3381_v56, %v1762_v14  ;;  %3617 = vpow2.f32 %v3321_v18  ;;  %v5577_v28 = vmul.f32 %v6164_v43, %v5482_v22  ;;  %v6232_v14 = vld [vmem:[#allocation65_spill] sm:$0xff] }
 0x1de   : > { %v1042_v17 = vadd.f32 1.0, %v3606_v5  ;;  %v1704_v46 = vmul.f32 %v4266_v20, %v1626_v29  ;;  %v2123_v21 = vadd.f32 %v3350_v33, %v6232_v14  ;;  %v2315_v51 = vmul.f32 %v2251_v35, %v2251_v35  ;;  %v6233_v35 = vld [vmem:[#allocation22_spill] sm:$0xff]  ;;  %v779_v5 = vpop.f32.mrf.mxu1 }
 0x1df   : > { %v2866_v39 = vadd.f32 %v2802_v50, %v5504_v11  ;;  %v2218_v23 = vmul.f32 8.0, %v2154_v8  ;;  %v1705_v9 = vmul.f32 %v4269_v0, %v1626_v29  ;;  %v5584_v3 = vadd.f32 %v679_v4, %v6185_v19  ;;  %v6235_v50 = vld [vmem:[#allocation23_spill] sm:$0xff] }
 0x1e0   : > { %3619 = vrcp.f32 %v1042_v17  ;;  %v5587_v15 = vadd.f32 %v775_v44, %v6185_v19  ;;  %v2418_v25 = vmul.f32 %v6154_v58, %v2346_v38  ;;  %v2187_v11 = vmul.f32 8.0, %v2123_v21 }
 0x1e1   : > { %2995 = vst [vmem:[%s4733_s21 + $0xa0] sm:$0xff] %v2866_v39  ;;  %v2490_v37 = vmul.f32 %v6159_v55, %v2218_v23  ;;  %v5593_v32 = vadd.f32 %v683_v47, %v6189_v60  ;;  %v2626_v6 = vmul.f32 %v5509_v30, %v4280_v52  ;;  %v5598_v2 = vadd.f32 %v1704_v46, %v6233_v35  ;;  %v685_v23 = vpop.f32.mrf.mxu0 }
 0x1e2   : > { %v1702_v4 = vmul.f32 %v4266_v20, %v1621_v24  ;;  %v3290_v36 = vmul.f32 -1.442695, %v5584_v3  ;;  %v2387_v29 = vmul.f32 %v6158_v63, %v2315_v51  ;;  %v2459_v18 = vmul.f32 %v6160_v13, %v2187_v11  ;;  %v6237_v51 = vld [vmem:[#allocation24_spill] sm:$0xff] }
 0x1e3   : > { %6234 = vst [vmem:[#allocation37_spill] sm:$0xff] %v5598_v2  ;;  %v3608_v56 = vpop.eup %3607  ;;  %v2554_v16 = vadd.f32 %v2490_v37, %v2418_v25  ;;  %v3322_v38 = vmul.f32 -1.442695, %v5587_v15  ;;  %v5606_v8 = vadd.f32 %v1705_v9, %v6235_v50  ;;  %v3291_v33 = vmul.f32 -1.442695, %v5593_v32  ;;  %v6238_v50 = vld [vmem:[#allocation25_spill] sm:$0xff] }
 0x1e4   : > { %v1011_v30 = vadd.f32 1.0, %v3608_v56  ;;  %3621 = vpow2.f32 %v3290_v36  ;;  %v2523_v46 = vadd.f32 %v2459_v18, %v2387_v29  ;;  %v2595_v47 = vmul.f32 %v5527_v40, %v6155_v10 }
 0x1e5   : > { %6236 = vst [vmem:[#allocation39_spill] sm:$0xff] %v5606_v8  ;;  %v5609_v44 = vpop.eup %3609  ;;  %v2690_v17 = vadd.f32 %v2626_v6, %v2554_v16  ;;  %v1703_v39 = vmul.f32 %v4269_v0, %v1621_v24  ;;  %v5617_v9 = vadd.f32 %v1702_v4, %v6237_v51  ;;  %v5620_v25 = vadd.f32 %v779_v5, %v6189_v60  ;;  %v781_v24 = vpop.f32.mrf.mxu1 }
 0x1e6   : > { %v3612_v14 = vpop.eup %3611  ;;  %v1827_v21 = vsub.f32 %v5394_v54, %v5609_v44  ;;  %3623 = vrcp.f32 %v1011_v30  ;;  %v2659_v40 = vadd.f32 %v2595_v47, %v2523_v46  ;;  %v5626_v4 = vadd.f32 %v685_v23, %v6185_v19 }
 0x1e7   : > { %v3614_v37 = vpop.eup %3613  ;;  %v2834_v11 = vmul.f32 %v6161_v62, %v2690_v17  ;;  %2963 = vst [vmem:[%s4713_s17 + $0x1a0] sm:$0xff] %v2690_v17  ;;  %v1043_v6 = vadd.f32 1.0, %v3612_v14  ;;  %3625 = vpow2.f32 %v3322_v38  ;;  %v2283_v29 = vmul.f32 2.0, %v5609_v44  ;;  %v785_v0 = vpop.f32.mrf.mxu1 }
 0x1e8   : > { %v1899_v35 = vmul.f32 %v4292_v34, %v1827_v21  ;;  %v1012_v54 = vadd.f32 1.0, %v3614_v37  ;;  %3627 = vpow2.f32 %v3291_v33  ;;  %v2803_v16 = vmul.f32 %v6162_v41, %v2659_v40  ;;  %2932 = vst.msk [vmem:[%s4713_s17 + $0xa8] sm:$0xff] %vm2911_vm2, %v2659_v40 }
 0x1e9   : > { %v3616_v36 = vpop.eup %3615  ;;  %v2898_v56 = vadd.f32 %v2834_v11, %v5515_v59  ;;  %3629 = vrcp.f32 %v1043_v6  ;;  %v5636_v30 = vadd.f32 %v1703_v39, %v6238_v50  ;;  %v5639_v33 = vadd.f32 %v781_v24, %v6185_v19  ;;  %v689_v24 = vpop.f32.mrf.mxu0 }
 0x1ea   : > { %v3618_v18 = vpop.eup %3617  ;;  %v1963_v38 = vadd.f32 %v5609_v44, %v1899_v35  ;;  %v1796_v5 = vsub.f32 %v5454_v48, %v3616_v36  ;;  %v2867_v59 = vadd.f32 %v2803_v16, %v5563_v49  ;;  %v2252_v17 = vmul.f32 2.0, %v3616_v36 }
 0x1eb   : > { %6239 = vst [vmem:[#allocation41_spill] sm:$0xff] %v5639_v33  ;;  %3027 = vst [vmem:[%s4733_s21 + $0x1a0] sm:$0xff] %v2898_v56  ;;  %3631 = vrcp.f32 %v1012_v54  ;;  %v1044_v46 = vadd.f32 1.0, %v3618_v18  ;;  %v5646_v14 = vmul.f32 %v6201_v45, %v5507_v12  ;;  %v3323_v48 = vmul.f32 -1.442695, %v5620_v25  ;;  %v691_v20 = vpop.f32.mrf.mxu0 }
 0x1ec   : > { %v2027_v47 = vmul.f32 2.0, %v1963_v38  ;;  %v1868_v23 = vmul.f32 %v4277_v57, %v1796_v5  ;;  %2996 = vst.msk [vmem:[%s4733_s21 + $0xa8] sm:$0xff] %vm2911_vm2, %v2867_v59  ;;  %v2347_v21 = vmul.f32 %v2283_v29, %v2283_v29  ;;  %v5653_v51 = vmul.f32 %v6201_v45, %v5519_v31 }
 0x1ed   : > { %v3620_v39 = vpop.eup %3619  ;;  %v5657_v49 = vmul.f32 %v6164_v43, %v5535_v7  ;;  %v3292_v37 = vmul.f32 -1.442695, %v5626_v4  ;;  %3633 = vrcp.f32 %v1044_v46  ;;  %v2316_v35 = vmul.f32 %v2252_v17, %v2252_v17 }
 0x1ee   : > { %v3382_v11 = vadd.f32 -0.5, %v2027_v47  ;;  %v1932_v40 = vadd.f32 %v3616_v36, %v1868_v23  ;;  %v1828_v6 = vsub.f32 %v5482_v22, %v3620_v39  ;;  %v2284_v54 = vmul.f32 2.0, %v3620_v39 }
 0x1ef   : > { %v5663_v56 = vmul.f32 %v6164_v43, %v5549_v26  ;;  %v3324_v16 = vmul.f32 -1.442695, %v5639_v33  ;;  %3635 = vpow2.f32 %v3323_v48  ;;  %v2419_v50 = vmul.f32 %v6158_v63, %v2347_v21 }
 0x1f0   : > { %v2155_v29 = vadd.f32 %v3382_v11, %v5557_v27  ;;  %v1996_v18 = vmul.f32 2.0, %v1932_v40  ;;  %v1900_v38 = vmul.f32 %v4277_v57, %v1828_v6  ;;  %v2627_v22 = vmul.f32 %v5609_v44, %v6155_v10  ;;  %v6240_v44 = vld [vmem:[#allocation62_spill] sm:$0xff] }
 0x1f1   : > { %v3622_v5 = vpop.eup %3621  ;;  %v2596_v59 = vmul.f32 %v3616_v36, %v4280_v52  ;;  %3637 = vpow2.f32 %v3292_v37  ;;  %v2388_v11 = vmul.f32 %v6154_v58, %v2316_v35  ;;  %v2348_v40 = vmul.f32 %v2284_v54, %v2284_v54 }
 0x1f2   : > { %v2219_v17 = vmul.f32 8.0, %v2155_v29  ;;  %v3351_v46 = vadd.f32 -0.5, %v1996_v18  ;;  %v1964_v47 = vadd.f32 %v3620_v39, %v1900_v38  ;;  %v1013_v23 = vadd.f32 1.0, %v3622_v5 }
 0x1f3   : > { %v3624_v27 = vpop.eup %3623  ;;  %v2628_v48 = vmul.f32 %v3620_v39, %v4280_v52  ;;  %3639 = vpow2.f32 %v3324_v16  ;;  %v5678_v18 = vadd.f32 %v689_v24, %v6189_v60  ;;  %v5681_v38 = vadd.f32 %v785_v0, %v6189_v60 }
 0x1f4   : > { %v3626_v21 = vpop.eup %3625  ;;  %v2491_v6 = vmul.f32 %v6160_v13, %v2219_v17  ;;  %v2124_v8 = vadd.f32 %v3351_v46, %v6240_v44  ;;  %v2028_v36 = vmul.f32 2.0, %v1964_v47  ;;  %v1797_v37 = vsub.f32 %v5507_v12, %v3624_v27 }
 0x1f5   : > { %v3628_v29 = vpop.eup %3627  ;;  %3641 = vrcp.f32 %v1013_v23  ;;  %v5684_v35 = vadd.f32 %v691_v20, %v6185_v19  ;;  %v2420_v12 = vmul.f32 %v6154_v58, %v2348_v40  ;;  %v2253_v46 = vmul.f32 2.0, %v3624_v27 }
 0x1f6   : > { %v3630_v39 = vpop.eup %3629  ;;  %v2555_v54 = vadd.f32 %v2491_v6, %v2419_v50  ;;  %v2188_v16 = vmul.f32 8.0, %v2124_v8  ;;  %v3383_v5 = vadd.f32 -0.5, %v2028_v36  ;;  %v1869_v17 = vmul.f32 %v4292_v34, %v1797_v37 }
 0x1f7   : > { %v1829_v47 = vsub.f32 %v5519_v31, %v3630_v39  ;;  %v1045_v24 = vadd.f32 1.0, %v3626_v21  ;;  %v5692_v50 = vmul.f32 %v3624_v27, %v6155_v10  ;;  %v5696_v36 = vadd.f32 1.0, %v3628_v29 }
 0x1f8   : > { %v3632_v23 = vpop.eup %3631  ;;  %v2691_v44 = vadd.f32 %v2627_v22, %v2555_v54  ;;  %v2460_v0 = vmul.f32 %v6159_v55, %v2188_v16  ;;  %v2156_v20 = vadd.f32 %v3383_v5, %v5525_v61  ;;  %v1933_v2 = vadd.f32 %v3624_v27, %v1869_v17 }
 0x1f9   : > { %v1901_v8 = vmul.f32 %v4292_v34, %v1829_v47  ;;  %v1798_v6 = vsub.f32 %v5535_v7, %v3632_v23  ;;  %v2317_v61 = vmul.f32 %v2253_v46, %v2253_v46  ;;  %v2285_v54 = vmul.f32 2.0, %v3630_v39 }
 0x1fa   : > { %v2835_v40 = vmul.f32 %v6162_v41, %v2691_v44  ;;  %2964 = vst.msk [vmem:[%s4713_s17 + $0x1a8] sm:$0xff] %vm2911_vm2, %v2691_v44  ;;  %v2524_v31 = vadd.f32 %v2460_v0, %v2388_v11  ;;  %v2220_v22 = vmul.f32 8.0, %v2156_v20  ;;  %v1997_v21 = vmul.f32 2.0, %v1933_v2  ;;  %v5701_v37 = vpop.eup %3633 }
 0x1fb   : > { %v1965_v27 = vadd.f32 %v3630_v39, %v1901_v8  ;;  %v1870_v16 = vmul.f32 %v4277_v57, %v1798_v6  ;;  %v2629_v11 = vmul.f32 %v3630_v39, %v6155_v10  ;;  %v2254_v0 = vmul.f32 2.0, %v3632_v23  ;;  %v6241_v6 = vld [vmem:[#allocation63_spill] sm:$0xff] }
 0x1fc   : > { %v2899_v7 = vadd.f32 %v2835_v40, %v5567_v53  ;;  %v2660_v29 = vadd.f32 %v2596_v59, %v2524_v31  ;;  %v2492_v5 = vmul.f32 %v6159_v55, %v2220_v22  ;;  %v3352_v17 = vadd.f32 -0.5, %v1997_v21  ;;  %v3636_v47 = vpop.eup %3635 }
 0x1fd   : > { %v2029_v44 = vmul.f32 2.0, %v1965_v27  ;;  %v1934_v2 = vadd.f32 %v3632_v23, %v1870_v16  ;;  %v1830_v53 = vsub.f32 %v5549_v26, %v5701_v37  ;;  %v2389_v59 = vmul.f32 %v6158_v63, %v2317_v61 }
 0x1fe   : > { %v3638_v20 = vpop.eup %3637  ;;  %3028 = vst.msk [vmem:[%s4733_s21 + $0x1a8] sm:$0xff] %vm2911_vm2, %v2899_v7  ;;  %v2804_v46 = vmul.f32 %v6161_v62, %v2660_v29  ;;  %2933 = vst [vmem:[%s4713_s17 + $0xb0] sm:$0xff] %v2660_v29  ;;  %v2556_v8 = vadd.f32 %v2492_v5, %v2420_v12  ;;  %v2125_v33 = vadd.f32 %v3352_v17, %v6241_v6  ;;  %v2286_v17 = vmul.f32 2.0, %v5701_v37 }
 0x1ff   : > { %v3384_v40 = vadd.f32 -0.5, %v2029_v44  ;;  %v2349_v39 = vmul.f32 %v2285_v54, %v2285_v54  ;;  %v1998_v31 = vmul.f32 2.0, %v1934_v2  ;;  %v1902_v7 = vmul.f32 %v4277_v57, %v1830_v53 }
 0x200   : > { %v3640_v22 = vpop.eup %3639  ;;  %v2868_v21 = vadd.f32 %v2804_v46, %v5573_v1  ;;  %v2692_v27 = vadd.f32 %v2628_v48, %v2556_v8  ;;  %v2189_v16 = vmul.f32 8.0, %v2125_v33  ;;  %v2318_v5 = vmul.f32 %v2254_v0, %v2254_v0 }
 0x201   : > { %v2157_v12 = vadd.f32 %v3384_v40, %v5530_v42  ;;  %v3353_v29 = vadd.f32 -0.5, %v1998_v31  ;;  %v1966_v1 = vadd.f32 %v5701_v37, %v1902_v7  ;;  %3643 = vrcp.f32 %v1045_v24  ;;  %v6242_v42 = vld [vmem:[#allocation71_spill] sm:$0xff] }
 0x202   : > { %v5719_v26 = vpop.eup %3641  ;;  %2997 = vst [vmem:[%s4733_s21 + $0xb0] sm:$0xff] %v2868_v21  ;;  %v2836_v61 = vmul.f32 %v6161_v62, %v2692_v27  ;;  %2965 = vst [vmem:[%s4713_s17 + $0x1b0] sm:$0xff] %v2692_v27  ;;  %v2461_v54 = vmul.f32 %v6160_v13, %v2189_v16  ;;  %v2421_v48 = vmul.f32 %v6158_v63, %v2349_v39  ;;  %3645 = vrcp.f32 %v5696_v36 }
 0x203   : > { %v2221_v33 = vmul.f32 8.0, %v2157_v12  ;;  %v2126_v44 = vadd.f32 %v3353_v29, %v6242_v42  ;;  %v1799_v2 = vsub.f32 %v5584_v3, %v5719_v26  ;;  %v2598_v8 = vmul.f32 %v3632_v23, %v4280_v52  ;;  %v787_v42 = vpop.f32.mrf.mxu1 }
 0x204   : > { %v2900_v0 = vadd.f32 %v2836_v61, %v5577_v28  ;;  %v2525_v46 = vadd.f32 %v2461_v54, %v2389_v59  ;;  %v2030_v6 = vmul.f32 2.0, %v1966_v1  ;;  %v2390_v24 = vmul.f32 %v6154_v58, %v2318_v5 }
 0x205   : > { %v2493_v53 = vmul.f32 %v6160_v13, %v2221_v33  ;;  %v2190_v40 = vmul.f32 8.0, %v2126_v44  ;;  %v1871_v31 = vmul.f32 %v4292_v34, %v1799_v2  ;;  %v2350_v27 = vmul.f32 %v2286_v17, %v2286_v17 }
 0x206   : > { %3029 = vst [vmem:[%s4733_s21 + $0x1b0] sm:$0xff] %v2900_v0  ;;  %v2661_v39 = vadd.f32 %v5692_v50, %v2525_v46  ;;  %v3385_v21 = vadd.f32 -0.5, %v2030_v6  ;;  %v1046_v16 = vadd.f32 1.0, %v3636_v47  ;;  %v2255_v29 = vmul.f32 2.0, %v5719_v26  ;;  %v6243_v0 = vld [vmem:[#allocation73_spill] sm:$0xff] }
 0x207   : > { %v2557_v28 = vadd.f32 %v2493_v53, %v2421_v48  ;;  %v2462_v59 = vmul.f32 %v6159_v55, %v2190_v40  ;;  %v1935_v23 = vadd.f32 %v5719_v26, %v1871_v31  ;;  %v1015_v50 = vadd.f32 1.0, %v3638_v20 }
 0x208   : > { %v2805_v7 = vmul.f32 %v6162_v41, %v2661_v39  ;;  %2934 = vst.msk [vmem:[%s4713_s17 + $0xb8] sm:$0xff] %vm2911_vm2, %v2661_v39  ;;  %v2158_v12 = vadd.f32 %v3385_v21, %v5617_v9  ;;  %3647 = vrcp.f32 %v1046_v16  ;;  %v1047_v47 = vadd.f32 1.0, %v3640_v22  ;;  %v695_v22 = vpop.f32.mrf.mxu0 }
 0x209   : > { %v2693_v5 = vadd.f32 %v2629_v11, %v2557_v28  ;;  %v2526_v17 = vadd.f32 %v2462_v59, %v2390_v24  ;;  %v1999_v36 = vmul.f32 2.0, %v1935_v23  ;;  %3649 = vrcp.f32 %v1015_v50 }
 0x20a   : > { %v2869_v61 = vadd.f32 %v2805_v7, %v5646_v14  ;;  %v2222_v54 = vmul.f32 8.0, %v2158_v12  ;;  %v3293_v48 = vmul.f32 -1.442695, %v5678_v18  ;;  %v2422_v11 = vmul.f32 %v6154_v58, %v2350_v27 }
 0x20b   : > { %v2837_v1 = vmul.f32 %v6162_v41, %v2693_v5  ;;  %2966 = vst.msk [vmem:[%s4713_s17 + $0x1b8] sm:$0xff] %vm2911_vm2, %v2693_v5  ;;  %v2662_v33 = vadd.f32 %v2598_v8, %v2526_v17  ;;  %v3354_v9 = vadd.f32 -0.5, %v1999_v36  ;;  %3651 = vrcp.f32 %v1047_v47 }
 0x20c   : > { %2998 = vst.msk [vmem:[%s4733_s21 + $0xb8] sm:$0xff] %vm2911_vm2, %v2869_v61  ;;  %v2494_v14 = vmul.f32 %v6159_v55, %v2222_v54  ;;  %v3325_v20 = vmul.f32 -1.442695, %v5681_v38  ;;  %v2319_v8 = vmul.f32 %v2255_v29, %v2255_v29  ;;  %v2630_v53 = vmul.f32 %v5701_v37, %v4280_v52  ;;  %v791_v61 = vpop.f32.mrf.mxu1 }
 0x20d   : > { %v2901_v44 = vadd.f32 %v2837_v1, %v5653_v51  ;;  %v2806_v2 = vmul.f32 %v6161_v62, %v2662_v33  ;;  %2935 = vst [vmem:[%s4713_s17 + $0xc0] sm:$0xff] %v2662_v33  ;;  %v2127_v46 = vadd.f32 %v3354_v9, %v6243_v0  ;;  %v3294_v40 = vmul.f32 -1.442695, %v5684_v35  ;;  %v697_v33 = vpop.f32.mrf.mxu0 }
 0x20e   : > { %v2558_v6 = vadd.f32 %v2494_v14, %v2422_v11  ;;  %v5763_v24 = vadd.f32 %v787_v42, %v6185_v19  ;;  %v3644_v31 = vpop.eup %3643  ;;  %3653 = vpow2.f32 %v3293_v48  ;;  %v5769_v21 = vadd.f32 %v695_v22, %v6189_v60 }
 0x20f   : > { %3030 = vst.msk [vmem:[%s4733_s21 + $0x1b8] sm:$0xff] %vm2911_vm2, %v2901_v44  ;;  %v2870_v51 = vadd.f32 %v2806_v2, %v5657_v49  ;;  %v2191_v39 = vmul.f32 8.0, %v2127_v46  ;;  %v1831_v28 = vsub.f32 %v5587_v15, %v3644_v31  ;;  %v2287_v37 = vmul.f32 2.0, %v3644_v31  ;;  %v3646_v50 = vpop.eup %3645 }
 0x210   : > { %v2694_v27 = vadd.f32 %v2630_v53, %v2558_v6  ;;  %3655 = vpow2.f32 %v3325_v20  ;;  %v2391_v59 = vmul.f32 %v6158_v63, %v2319_v8  ;;  %v3326_v16 = vmul.f32 -1.442695, %v5763_v24 }
 0x211   : > { %2999 = vst [vmem:[%s4733_s21 + $0xc0] sm:$0xff] %v2870_v51  ;;  %v2463_v23 = vmul.f32 %v6160_v13, %v2191_v39  ;;  %v3295_v7 = vmul.f32 -1.442695, %v5769_v21  ;;  %v2735_v12 = vmul.f32 %v6201_v45, %v5584_v3  ;;  %v1903_v29 = vmul.f32 %v4292_v34, %v1831_v28 }
 0x212   : > { %v2838_v49 = vmul.f32 %v6161_v62, %v2694_v27  ;;  %2967 = vst [vmem:[%s4713_s17 + $0x1c0] sm:$0xff] %v2694_v27  ;;  %3657 = vpow2.f32 %v3294_v40  ;;  %v2599_v17 = vmul.f32 %v5719_v26, %v6155_v10  ;;  %v5786_v36 = vmul.f32 %v6201_v45, %v5587_v15 }
 0x213   : > { %v2527_v5 = vadd.f32 %v2463_v23, %v2391_v59  ;;  %3659 = vpow2.f32 %v3326_v16  ;;  %v1967_v47 = vadd.f32 %v3644_v31, %v1903_v29  ;;  %v2351_v3 = vmul.f32 %v2287_v37, %v2287_v37  ;;  %v6244_v16 = vld [vmem:[#allocation41_spill] sm:$0xff] }
 0x214   : > { %v2902_v54 = vadd.f32 %v2838_v49, %v5663_v56  ;;  %v1800_v1 = vsub.f32 %v5593_v32, %v3646_v50  ;;  %v2256_v48 = vmul.f32 2.0, %v3646_v50  ;;  %v5792_v42 = vmul.f32 %v6164_v43, %v5593_v32 }
 0x215   : > { %v2663_v9 = vadd.f32 %v2599_v17, %v2527_v5  ;;  %3661 = vpow2.f32 %v3295_v7  ;;  %v3648_v26 = vpop.eup %3647  ;;  %v2031_v15 = vmul.f32 2.0, %v1967_v47  ;;  %v2631_v11 = vmul.f32 %v3644_v31, %v6155_v10 }
 0x216   : > { %3031 = vst [vmem:[%s4733_s21 + $0x1c0] sm:$0xff] %v2902_v54  ;;  %v1872_v56 = vmul.f32 %v4277_v57, %v1800_v1  ;;  %v5798_v14 = vadd.f32 %v791_v61, %v6189_v60  ;;  %v5800_v20 = vpop.eup %3649  ;;  %v1832_v32 = vsub.f32 %v5620_v25, %v3648_v26  ;;  %v2288_v44 = vmul.f32 2.0, %v3648_v26 }
 0x217   : > { %v2807_v22 = vmul.f32 %v6162_v41, %v2663_v9  ;;  %2936 = vst.msk [vmem:[%s4713_s17 + $0xc8] sm:$0xff] %vm2911_vm2, %v2663_v9  ;;  %v5807_v2 = vadd.f32 %v697_v33, %v6185_v19  ;;  %v3386_v0 = vadd.f32 -0.5, %v2031_v15  ;;  %v2423_v46 = vmul.f32 %v6158_v63, %v2351_v3  ;;  %v6245_v33 = vld [vmem:[#allocation69_spill] sm:$0xff] }
 0x218   : > { %v1936_v8 = vadd.f32 %v3646_v50, %v1872_v56  ;;  %v1801_v60 = vsub.f32 %v5626_v4, %v5800_v20  ;;  %v5812_v6 = vpop.eup %3651  ;;  %v2320_v40 = vmul.f32 %v2256_v48, %v2256_v48  ;;  %v1904_v31 = vmul.f32 %v4277_v57, %v1832_v32 }
 0x219   : > { %v2871_v53 = vadd.f32 %v2807_v22, %v2735_v12  ;;  %v2352_v51 = vmul.f32 %v2288_v44, %v2288_v44  ;;  %v2159_v39 = vadd.f32 %v3386_v0, %v5636_v30  ;;  %v2257_v37 = vmul.f32 2.0, %v5800_v20 }
 0x21a   : > { %v2000_v27 = vmul.f32 2.0, %v1936_v8  ;;  %v1873_v28 = vmul.f32 %v4292_v34, %v1801_v60  ;;  %v2600_v59 = vmul.f32 %v3646_v50, %v4280_v52  ;;  %v1968_v23 = vadd.f32 %v3648_v26, %v1904_v31  ;;  %v6246_v31 = vld [vmem:[#allocation37_spill] sm:$0xff] }
 0x21b   : > { %3000 = vst.msk [vmem:[%s4733_s21 + $0xc8] sm:$0xff] %vm2911_vm2, %v2871_v53  ;;  %v1833_v7 = vsub.f32 %v6244_v16, %v5812_v6  ;;  %v5824_v49 = vmul.f32 -1.442695, %v5798_v14  ;;  %v3654_v12 = vpop.eup %3653  ;;  %v2223_v29 = vmul.f32 8.0, %v2159_v39  ;;  %v2632_v30 = vmul.f32 %v3648_v26, %v4280_v52 }
 0x21c   : > { %v3355_v5 = vadd.f32 -0.5, %v2000_v27  ;;  %v1937_v17 = vadd.f32 %v5800_v20, %v1873_v28  ;;  %v2392_v54 = vmul.f32 %v6154_v58, %v2320_v40  ;;  %v2032_v47 = vmul.f32 2.0, %v1968_v23 }
 0x21d   : > { %v3656_v61 = vpop.eup %3655  ;;  %v2321_v3 = vmul.f32 %v2257_v37, %v2257_v37  ;;  %v1905_v50 = vmul.f32 %v4292_v34, %v1833_v7  ;;  %v2495_v1 = vmul.f32 %v6160_v13, %v2223_v29  ;;  %v2424_v48 = vmul.f32 %v6154_v58, %v2352_v51  ;;  %v6247_v7 = vld [vmem:[#allocation70_spill] sm:$0xff] }
 0x21e   : > { %v2128_v9 = vadd.f32 %v3355_v5, %v6245_v33  ;;  %v2001_v15 = vmul.f32 2.0, %v1937_v17  ;;  %v3387_v22 = vadd.f32 -0.5, %v2032_v47  ;;  %v2289_v32 = vmul.f32 2.0, %v5812_v6 }
 0x21f   : > { %v3658_v56 = vpop.eup %3657  ;;  %v1969_v26 = vadd.f32 %v5812_v6, %v1905_v50  ;;  %v1016_v44 = vadd.f32 1.0, %v3654_v12  ;;  %v2559_v8 = vadd.f32 %v2495_v1, %v2423_v46  ;;  %v1048_v40 = vadd.f32 1.0, %v3656_v61  ;;  %v6248_v1 = vld [vmem:[#allocation39_spill] sm:$0xff] }
 0x220   : > { %v3660_v0 = vpop.eup %3659  ;;  %v2192_v60 = vmul.f32 8.0, %v2128_v9  ;;  %v3356_v53 = vadd.f32 -0.5, %v2001_v15  ;;  %v2160_v39 = vadd.f32 %v3387_v22, %v6246_v31  ;;  %v2393_v27 = vmul.f32 %v6158_v63, %v2321_v3  ;;  %v793_v15 = vpop.f32.mrf.mxu1 }
 0x221   : > { %v2033_v28 = vmul.f32 2.0, %v1969_v26  ;;  %3663 = vrcp.f32 %v1016_v44  ;;  %v2695_v37 = vadd.f32 %v2631_v11, %v2559_v8  ;;  %v1017_v46 = vadd.f32 1.0, %v3658_v56 }
 0x222   : > { %v3662_v51 = vpop.eup %3661  ;;  %v2464_v23 = vmul.f32 %v6159_v55, %v2192_v60  ;;  %v2129_v29 = vadd.f32 %v3356_v53, %v6247_v7  ;;  %3665 = vrcp.f32 %v1048_v40  ;;  %v2224_v12 = vmul.f32 8.0, %v2160_v39 }
 0x223   : > { %v3388_v5 = vadd.f32 -0.5, %v2033_v28  ;;  %v1049_v17 = vadd.f32 1.0, %v3660_v0  ;;  %v2839_v47 = vmul.f32 %v6162_v41, %v2695_v37  ;;  %2968 = vst.msk [vmem:[%s4713_s17 + $0x1c8] sm:$0xff] %vm2911_vm2, %v2695_v37  ;;  %v1018_v50 = vadd.f32 1.0, %v3662_v51 }
 0x224   : > { %v2528_v61 = vadd.f32 %v2464_v23, %v2392_v54  ;;  %v2193_v3 = vmul.f32 8.0, %v2129_v29  ;;  %v2496_v11 = vmul.f32 %v6159_v55, %v2224_v12  ;;  %v2353_v9 = vmul.f32 %v2289_v32, %v2289_v32 }
 0x225   : > { %v2161_v33 = vadd.f32 %v3388_v5, %v6248_v1  ;;  %3667 = vrcp.f32 %v1017_v46  ;;  %v2903_v22 = vadd.f32 %v2839_v47, %v5786_v36  ;;  %v3296_v54 = vmul.f32 -1.442695, %v5807_v2  ;;  %v6250_v46 = vld [vmem:[#allocation31_spill] sm:$0xff] }
 0x226   : > { %v2664_v56 = vadd.f32 %v2600_v59, %v2528_v61  ;;  %v2465_v26 = vmul.f32 %v6160_v13, %v2193_v3  ;;  %3669 = vrcp.f32 %v1049_v17  ;;  %v2560_v44 = vadd.f32 %v2496_v11, %v2424_v48 }
 0x227   : > { %v2225_v0 = vmul.f32 8.0, %v2161_v33  ;;  %3671 = vrcp.f32 %v1018_v50  ;;  %3032 = vst.msk [vmem:[%s4733_s21 + $0x1c8] sm:$0xff] %vm2911_vm2, %v2903_v22  ;;  %v2601_v60 = vmul.f32 %v5800_v20, %v6155_v10  ;;  %v5854_v36 = vadd.f32 %v793_v15, %v6185_v19 }
 0x228   : > { %v2808_v8 = vmul.f32 %v6161_v62, %v2664_v56  ;;  %2937 = vst [vmem:[%s4713_s17 + $0xd0] sm:$0xff] %v2664_v56  ;;  %v2529_v32 = vadd.f32 %v2465_v26, %v2393_v27  ;;  %v2696_v59 = vadd.f32 %v2632_v30, %v2560_v44  ;;  %v2768_v48 = vmul.f32 %v6164_v43, %v5620_v25  ;;  %v1631_v30 = vpop.permute.xlu0 %1630  ;;  %v6252_v44 = vld [vmem:[#allocation29_spill] sm:$0xff] }
 0x229   : > { %v2425_v53 = vmul.f32 %v6158_v63, %v2353_v9  ;;  %v2497_v40 = vmul.f32 %v6160_v13, %v2225_v0  ;;  %3673 = vpow2.f32 %v5824_v49  ;;  %v3328_v20 = vmul.f32 -1.442695, %v5854_v36  ;;  %v6251_v9 = vld [vmem:[#allocation28_spill] sm:$0xff] }
 0x22a   : > { %v2872_v31 = vadd.f32 %v2808_v8, %v5792_v42  ;;  %v2665_v39 = vadd.f32 %v2601_v60, %v2529_v32  ;;  %v2840_v27 = vmul.f32 %v6161_v62, %v2696_v59  ;;  %2969 = vst [vmem:[%s4713_s17 + $0x1d0] sm:$0xff] %v2696_v59  ;;  %v2633_v25 = vmul.f32 %v5812_v6, %v6155_v10  ;;  %v6249_v6 = vld [vmem:[#allocation30_spill] sm:$0xff] }
 0x22b   : > { %v2561_v19 = vadd.f32 %v2497_v40, %v2425_v53  ;;  %3675 = vpow2.f32 %v3296_v54  ;;  %v2737_v42 = vmul.f32 %v6201_v45, %v5626_v4  ;;  %v1706_v29 = vmul.f32 %v6249_v6, %v1631_v30 }
 0x22c   : > { %3001 = vst [vmem:[%s4733_s21 + $0xd0] sm:$0xff] %v2872_v31  ;;  %v2809_v49 = vmul.f32 %v6162_v41, %v2665_v39  ;;  %2938 = vst.msk [vmem:[%s4713_s17 + $0xd8] sm:$0xff] %vm2911_vm2, %v2665_v39  ;;  %v2904_v28 = vadd.f32 %v2840_v27, %v2768_v48  ;;  %3677 = vpow2.f32 %v3328_v20  ;;  %v2769_v12 = vmul.f32 %v6201_v45, %v6244_v16 }
 0x22d   : > { %v2697_v51 = vadd.f32 %v2633_v25, %v2561_v19  ;;  %v1707_v17 = vmul.f32 %v6250_v46, %v1631_v30  ;;  %v1770_v15 = vadd.f32 %v1706_v29, %v6251_v9  ;;  %v2738_v30 = vmul.f32 %v6164_v43, %v5678_v18 }
 0x22e   : > { %v3664_v37 = vpop.eup %3663  ;;  %v2873_v23 = vadd.f32 %v2809_v49, %v2737_v42  ;;  %3033 = vst [vmem:[%s4733_s21 + $0x1d0] sm:$0xff] %v2904_v28 }
 0x22f   : > { %v5873_v7 = vpop.eup %3665  ;;  %v2841_v4 = vmul.f32 %v6162_v41, %v2697_v51  ;;  %2970 = vst.msk [vmem:[%s4713_s17 + $0x1d8] sm:$0xff] %vm2911_vm2, %v2697_v51  ;;  %v1802_v5 = vsub.f32 %v5678_v18, %v3664_v37  ;;  %v2258_v47 = vmul.f32 2.0, %v3664_v37  ;;  %v1771_v0 = vadd.f32 %v1707_v17, %v6252_v44 }
 0x230   : > { %3002 = vst.msk [vmem:[%s4733_s21 + $0xd8] sm:$0xff] %vm2911_vm2, %v2873_v23  ;;  %v1834_v61 = vsub.f32 %v5681_v38, %v5873_v7  ;;  %v2290_v11 = vmul.f32 2.0, %v5873_v7  ;;  %v2602_v25 = vmul.f32 %v3664_v37, %v4280_v52 }
 0x231   : > { %v2905_v3 = vadd.f32 %v2841_v4, %v2769_v12  ;;  %v1874_v50 = vmul.f32 %v4277_v57, %v1802_v5  ;;  %v2322_v54 = vmul.f32 %v2258_v47, %v2258_v47  ;;  %v6253_v12 = vld [vmem:[#allocation88_spill] sm:$0xff] }
 0x232   : > { %v5890_v16 = vpop.eup %3667  ;;  %v1906_v1 = vmul.f32 %v4277_v57, %v1834_v61  ;;  %v2354_v59 = vmul.f32 %v2290_v11, %v2290_v11 }
 0x233   : > { %v5893_v33 = vpop.eup %3669  ;;  %3034 = vst.msk [vmem:[%s4733_s21 + $0x1d8] sm:$0xff] %vm2911_vm2, %v2905_v3  ;;  %v1938_v22 = vadd.f32 %v3664_v37, %v1874_v50  ;;  %v1803_v56 = vsub.f32 %v5684_v35, %v5890_v16  ;;  %v2259_v53 = vmul.f32 2.0, %v5890_v16  ;;  %v2394_v28 = vmul.f32 %v6154_v58, %v2322_v54 }
 0x234   : > { %v5900_v26 = vpop.eup %3671  ;;  %v1970_v8 = vadd.f32 %v5873_v7, %v1906_v1  ;;  %v1835_v32 = vsub.f32 %v5763_v24, %v5893_v33  ;;  %v2291_v39 = vmul.f32 2.0, %v5893_v33  ;;  %v2426_v5 = vmul.f32 %v6154_v58, %v2354_v59 }
 0x235   : > { %v2002_v60 = vmul.f32 2.0, %v1938_v22  ;;  %v1875_v48 = vmul.f32 %v4292_v34, %v1803_v56  ;;  %v1804_v20 = vsub.f32 %v5769_v21, %v5900_v26  ;;  %v2323_v47 = vmul.f32 %v2259_v53, %v2259_v53 }
 0x236   : > { %v2034_v40 = vmul.f32 2.0, %v1970_v8  ;;  %v1907_v31 = vmul.f32 %v4292_v34, %v1835_v32  ;;  %v3674_v27 = vpop.eup %3673  ;;  %v2355_v18 = vmul.f32 %v2291_v39, %v2291_v39  ;;  %v2260_v8 = vmul.f32 2.0, %v5900_v26 }
 0x237   : > { %v3357_v19 = vadd.f32 -0.5, %v2002_v60  ;;  %v1939_v42 = vadd.f32 %v5890_v16, %v1875_v48  ;;  %v1876_v29 = vmul.f32 %v4277_v57, %v1804_v20  ;;  %v1050_v9 = vadd.f32 1.0, %v3674_v27  ;;  %v6254_v60 = vld [vmem:[#allocation89_spill] sm:$0xff] }
 0x238   : > { %v3676_v49 = vpop.eup %3675  ;;  %v3389_v51 = vadd.f32 -0.5, %v2034_v40  ;;  %v1971_v23 = vadd.f32 %v5893_v33, %v1907_v31  ;;  %v2634_v39 = vmul.f32 %v5873_v7, %v4280_v52  ;;  %v2427_v7 = vmul.f32 %v6158_v63, %v2355_v18 }
 0x239   : > { %v2130_v4 = vadd.f32 %v3357_v19, %v6253_v12  ;;  %v2003_v17 = vmul.f32 2.0, %v1939_v42  ;;  %v3678_v37 = vpop.eup %3677  ;;  %v1940_v50 = vadd.f32 %v5900_v26, %v1876_v29  ;;  %v1019_v22 = vadd.f32 1.0, %v3676_v49  ;;  %v6255_v42 = vld [vmem:[#allocation83_spill] sm:$0xff] }
 0x23a   : > { %v2162_v61 = vadd.f32 %v3389_v51, %v1770_v15  ;;  %v2035_v3 = vmul.f32 2.0, %v1971_v23  ;;  %3679 = vrcp.f32 %v1050_v9  ;;  %v1051_v48 = vadd.f32 1.0, %v3678_v37 }
 0x23b   : > { %v2194_v11 = vmul.f32 8.0, %v2130_v4  ;;  %v3358_v1 = vadd.f32 -0.5, %v2003_v17  ;;  %v2004_v54 = vmul.f32 2.0, %v1940_v50  ;;  %3681 = vrcp.f32 %v1019_v22 }
 0x23c   : > { %v2226_v56 = vmul.f32 8.0, %v2162_v61  ;;  %v3390_v44 = vadd.f32 -0.5, %v2035_v3  ;;  %3683 = vrcp.f32 %v1051_v48  ;;  %v2324_v51 = vmul.f32 %v2260_v8, %v2260_v8 }
 0x23d   : > { %v2466_v32 = vmul.f32 %v6159_v55, %v2194_v11  ;;  %v2131_v59 = vadd.f32 %v3358_v1, %v6254_v60  ;;  %v3359_v40 = vadd.f32 -0.5, %v2004_v54  ;;  %v2770_v29 = vmul.f32 %v6164_v43, %v5681_v38 }
 0x23e   : > { %v2498_v15 = vmul.f32 %v6159_v55, %v2226_v56  ;;  %v2163_v53 = vadd.f32 %v3390_v44, %v1771_v0  ;;  %v2395_v0 = vmul.f32 %v6158_v63, %v2323_v47  ;;  %v2635_v38 = vmul.f32 %v5893_v33, %v6155_v10 }
 0x23f   : > { %v2530_v31 = vadd.f32 %v2466_v32, %v2394_v28  ;;  %v2195_v20 = vmul.f32 8.0, %v2131_v59  ;;  %v2132_v49 = vadd.f32 %v3359_v40, %v6255_v42  ;;  %v2396_v3 = vmul.f32 %v6154_v58, %v2324_v51 }
 0x240   : > { %v2562_v27 = vadd.f32 %v2498_v15, %v2426_v5  ;;  %v2227_v19 = vmul.f32 8.0, %v2163_v53  ;;  %v2739_v33 = vmul.f32 %v6201_v45, %v5684_v35  ;;  %v2740_v35 = vmul.f32 %v6164_v43, %v5769_v21  ;;  %v1636_v15 = vpop.permute.xlu1 %1635 }
 0x241   : > { %v2666_v23 = vadd.f32 %v2602_v25, %v2530_v31  ;;  %v2467_v28 = vmul.f32 %v6160_v13, %v2195_v20  ;;  %v2196_v17 = vmul.f32 8.0, %v2132_v49  ;;  %v2603_v25 = vmul.f32 %v5890_v16, %v6155_v10 }
 0x242   : > { %v2698_v12 = vadd.f32 %v2634_v39, %v2562_v27  ;;  %v2499_v4 = vmul.f32 %v6160_v13, %v2227_v19  ;;  %v2604_v16 = vmul.f32 %v5900_v26, %v4280_v52  ;;  %v1708_v20 = vmul.f32 %v6249_v6, %v1636_v15 }
 0x243   : > { %v2810_v5 = vmul.f32 %v6161_v62, %v2666_v23  ;;  %2939 = vst [vmem:[%s4713_s17 + $0xe0] sm:$0xff] %v2666_v23  ;;  %v2531_v37 = vadd.f32 %v2467_v28, %v2395_v0  ;;  %v2468_v18 = vmul.f32 %v6159_v55, %v2196_v17  ;;  %v1709_v49 = vmul.f32 %v6250_v46, %v1636_v15 }
 0x244   : > { %v2842_v47 = vmul.f32 %v6161_v62, %v2698_v12  ;;  %2971 = vst [vmem:[%s4713_s17 + $0x1e0] sm:$0xff] %v2698_v12  ;;  %v2563_v61 = vadd.f32 %v2499_v4, %v2427_v7  ;;  %v6256_v12 = vld [vmem:[#allocation26_spill] sm:$0xff] }
 0x245   : > { %v2874_v50 = vadd.f32 %v2810_v5, %v2738_v30  ;;  %v2667_v11 = vadd.f32 %v2603_v25, %v2531_v37  ;;  %v2532_v22 = vadd.f32 %v2468_v18, %v2396_v3  ;;  %v2771_v30 = vmul.f32 %v6201_v45, %v5763_v24  ;;  %v6257_v37 = vld [vmem:[#allocation27_spill] sm:$0xff] }
 0x246   : > { %v2906_v1 = vadd.f32 %v2842_v47, %v2770_v29  ;;  %v2699_v9 = vadd.f32 %v2635_v38, %v2563_v61  ;;  %v1773_v25 = vadd.f32 %v1709_v49, %v6257_v37 }
 0x247   : > { %3003 = vst [vmem:[%s4733_s21 + $0xe0] sm:$0xff] %v2874_v50  ;;  %v2811_v56 = vmul.f32 %v6162_v41, %v2667_v11  ;;  %2940 = vst.msk [vmem:[%s4713_s17 + $0xe8] sm:$0xff] %vm2911_vm2, %v2667_v11  ;;  %v2668_v54 = vadd.f32 %v2604_v16, %v2532_v22  ;;  %v3680_v8 = vpop.eup %3679 }
 0x248   : > { %3035 = vst [vmem:[%s4733_s21 + $0x1e0] sm:$0xff] %v2906_v1  ;;  %v2843_v44 = vmul.f32 %v6162_v41, %v2699_v9  ;;  %2972 = vst.msk [vmem:[%s4713_s17 + $0x1e8] sm:$0xff] %vm2911_vm2, %v2699_v9  ;;  %v3682_v59 = vpop.eup %3681  ;;  %v1836_v24 = vsub.f32 %v5798_v14, %v3680_v8  ;;  %v2292_v23 = vmul.f32 2.0, %v3680_v8 }
 0x249   : > { %v2875_v26 = vadd.f32 %v2811_v56, %v2739_v33  ;;  %v2812_v60 = vmul.f32 %v6161_v62, %v2668_v54  ;;  %2941 = vst [vmem:[%s4713_s17 + $0xf0] sm:$0xff] %v2668_v54  ;;  %v3684_v48 = vpop.eup %3683  ;;  %v1805_v40 = vsub.f32 %v5807_v2, %v3682_v59  ;;  %v2261_v28 = vmul.f32 2.0, %v3682_v59 }
 0x24a   : > { %v2907_v32 = vadd.f32 %v2843_v44, %v2771_v30  ;;  %v1908_v31 = vmul.f32 %v4277_v57, %v1836_v24  ;;  %v1837_v39 = vsub.f32 %v5854_v36, %v3684_v48  ;;  %v1772_v57 = vadd.f32 %v1708_v20, %v6256_v12 }
 0x24b   : > { %3004 = vst.msk [vmem:[%s4733_s21 + $0xe8] sm:$0xff] %vm2911_vm2, %v2875_v26  ;;  %v2876_v53 = vadd.f32 %v2812_v60, %v2740_v35  ;;  %v1877_v21 = vmul.f32 %v4292_v34, %v1805_v40  ;;  %v2293_v17 = vmul.f32 2.0, %v3684_v48  ;;  %v2356_v38 = vmul.f32 %v2292_v23, %v2292_v23 }
 0x24c   : > { %3036 = vst.msk [vmem:[%s4733_s21 + $0x1e8] sm:$0xff] %vm2911_vm2, %v2907_v32  ;;  %v1972_v27 = vadd.f32 %v3680_v8, %v1908_v31  ;;  %v1909_v19 = vmul.f32 %v4292_v34, %v1837_v39  ;;  %v6258_v34 = vld [vmem:[#allocation84_spill] sm:$0xff]  ;;  %v2325_v3 = vmul.f32 %v2261_v28, %v2261_v28  ;;  %v2636_v30 = vmul.f32 %v3680_v8, %v4280_v52 }
 0x24d   : > { %3005 = vst [vmem:[%s4733_s21 + $0xf0] sm:$0xff] %v2876_v53  ;;  %v1941_v42 = vadd.f32 %v3682_v59, %v1877_v21  ;;  %v2357_v50 = vmul.f32 %v2293_v17, %v2293_v17  ;;  %v2428_v1 = vmul.f32 %v6154_v58, %v2356_v38  ;;  %v2605_v58 = vmul.f32 %v3682_v59, %v6155_v10 }
 0x24e   : > { %v2036_v51 = vmul.f32 2.0, %v1972_v27  ;;  %v1973_v29 = vadd.f32 %v3684_v48, %v1909_v19  ;;  %v2397_v16 = vmul.f32 %v6158_v63, %v2325_v3  ;;  %v2637_v35 = vmul.f32 %v3684_v48, %v6155_v10 }
 0x24f   : > { %v2005_v0 = vmul.f32 2.0, %v1941_v42  ;;  %v2429_v44 = vmul.f32 %v6158_v63, %v2357_v50  ;;  %v2772_v24 = vmul.f32 %v6164_v43, %v5798_v14  ;;  %v2773_v10 = vmul.f32 %v6201_v45, %v5854_v36 }
 0x250   : > { %v3391_v7 = vadd.f32 -0.5, %v2036_v51  ;;  %v2037_v4 = vmul.f32 2.0, %v1973_v29 }
 0x251   : > { %v3360_v5 = vadd.f32 -0.5, %v2005_v0 }
 0x252   : > { %v2164_v6 = vadd.f32 %v3391_v7, %v1772_v57  ;;  %v3392_v47 = vadd.f32 -0.5, %v2037_v4 }
 0x253   : > { %v2133_v61 = vadd.f32 %v3360_v5, %v6258_v34 }
 0x254   : > { %v2228_v46 = vmul.f32 8.0, %v2164_v6  ;;  %v2165_v18 = vadd.f32 %v3392_v47, %v1773_v25 }
 0x255   : > { %v2197_v11 = vmul.f32 8.0, %v2133_v61 }
 0x256   : > { %v2500_v9 = vmul.f32 %v6159_v55, %v2228_v46  ;;  %v2229_v22 = vmul.f32 8.0, %v2165_v18 }
 0x257   : > { %v2469_v33 = vmul.f32 %v6160_v13, %v2197_v11 }
 0x258   : > { %v2564_v56 = vadd.f32 %v2500_v9, %v2428_v1  ;;  %v2501_v54 = vmul.f32 %v6160_v13, %v2229_v22  ;;  %v2741_v13 = vmul.f32 %v6201_v45, %v5807_v2 }
 0x259   : > { %v2533_v26 = vadd.f32 %v2469_v33, %v2397_v16 }
 0x25a   : > { %v2700_v32 = vadd.f32 %v2636_v30, %v2564_v56  ;;  %v2565_v55 = vadd.f32 %v2501_v54, %v2429_v44 }
 0x25b   : > { %v2669_v60 = vadd.f32 %v2605_v58, %v2533_v26 }
 0x25c   : > { %v2844_v52 = vmul.f32 %v6161_v62, %v2700_v32  ;;  %2973 = vst [vmem:[%s4713_s17 + $0x1f0] sm:$0xff] %v2700_v32  ;;  %v2701_v63 = vadd.f32 %v2637_v35, %v2565_v55 }
 0x25d   : > { %v2813_v8 = vmul.f32 %v6162_v41, %v2669_v60  ;;  %2942 = vst.msk [vmem:[%s4713_s17 + $0xf8] sm:$0xff] %vm2911_vm2, %v2669_v60 }
 0x25e   : > { %v2908_v59 = vadd.f32 %v2844_v52, %v2772_v24  ;;  %v2845_v48 = vmul.f32 %v6162_v41, %v2701_v63  ;;  %2974 = vst.msk [vmem:[%s4713_s17 + $0x1f8] sm:$0xff] %vm2911_vm2, %v2701_v63 }
 0x25f   : > { %v2877_v43 = vadd.f32 %v2813_v8, %v2741_v13 }
 0x260   : > { %3037 = vst [vmem:[%s4733_s21 + $0x1f0] sm:$0xff] %v2908_v59  ;;  %v2909_v62 = vadd.f32 %v2845_v48, %v2773_v10 }
 0x261   : > { %3006 = vst.msk [vmem:[%s4733_s21 + $0xf8] sm:$0xff] %vm2911_vm2, %v2877_v43 }
 0x262   : > { %3038 = vst.msk [vmem:[%s4733_s21 + $0x1f8] sm:$0xff] %vm2911_vm2, %v2909_v62 }
 0x263 PF: > { %s18_s26 = sadd.s32 1, %s3707_s26   ;;  %s6259_s24 = smov %s3703_s25 }
 0x264   : > { %p15_p5 = scmp.ge.s32.totalorder %s18_s26, 4   ;;  %s6260_s25 = smov %s6262_s27 }
 0x266   :  { %17 = sbr.rel (!%p15_p5) target bundleno = 2 (0x2), region = 92 }

</bundles_post_ra>
